<compile_context>
chip_gen: v5e
topology: v5e:2x2
jax: 0.10.0
libtpu: 0.0.40
codegen_flags: <defaults>
</compile_context>

<pallas_src>
import math

import jax
import jax.numpy as jnp
from jax.experimental import pallas as pl
from jax.experimental.pallas import tpu as pltpu

_MIB = 1024 * 1024


def _gelu_tanh(x):
    # torch.nn.functional.gelu(x, approximate='tanh')
    c = math.sqrt(2.0 / math.pi)
    return 0.5 * x * (1.0 + jnp.tanh(c * (x + 0.044715 * x * x * x)))


def mlp_kernel(x_ref, w1_ref, b1_ref, w2_ref, b2_ref, o_ref, acc_ref):
    # Grid: (token_tiles, I_tiles)   -- axis 1 is the reduction over I.
    # x_ref:  (ts, H)   bf16 token tile (constant across axis 1)
    # w1_ref: (H, ti)   bf16 c_fc weight slab (pre-blocked contiguous)
    # b1_ref: (1, ti)   f32  c_fc bias slab
    # w2_ref: (ti, H)   bf16 c_proj weight slab
    # b2_ref: (1, H)    f32  c_proj bias
    # o_ref:  (ts, H)   output tile (same block across the reduction axis)
    # acc_ref:(ts, H)   f32 VMEM accumulator
    k = pl.program_id(1)

    @pl.when(k == 0)
    def _():
        acc_ref[...] = jnp.zeros_like(acc_ref)

    # First matmul + bias + gelu in f32.
    h = jnp.dot(x_ref[...], w1_ref[...], preferred_element_type=jnp.float32)
    h = _gelu_tanh(h + b1_ref[...])

    # Second matmul: cast activation down for the MXU, accumulate in f32.
    acc_ref[...] += jnp.dot(
        h.astype(w2_ref.dtype), w2_ref[...], preferred_element_type=jnp.float32
    )

    @pl.when(k == pl.num_programs(1) - 1)
    def _():
        # b_proj is added exactly once, at finalize.
        o_ref[...] = (acc_ref[...] + b2_ref[...]).astype(o_ref.dtype)


def _round_up(x, m):
    return ((x + m - 1) // m) * m


def _tpu_target():
    """Per-generation tile candidates and a safe scoped-VMEM ceiling."""
    kind = ""
    try:
        kind = jax.devices()[0].device_kind.lower()
    except Exception:
        pass
    if "v7" in kind:
        # 64 MiB VMEM per TC, 2 TCs per chip, 3.2 TB/s HBM (MXU-bound sooner).
        return dict(name="v7x", vmem_cap=56 * _MIB,
                    ts=(512, 256, 128, 64, 32, 16, 8), ti=(256, 128), two_tc=True)
    if "v6" in kind:
        # Worst FLOPs:HBM ratio -> largest token tile that fits 128 MiB VMEM.
        return dict(name="v6e", vmem_cap=110 * _MIB,
                    ts=(1024, 512, 256, 128, 64, 32, 16, 8),
                    ti=(512, 256, 128), two_tc=False)
    if "v5" in kind or "v4" in kind:
        return dict(name="v5e", vmem_cap=110 * _MIB,
                    ts=(512, 256, 128, 64, 32, 16, 8),
                    ti=(512, 256, 128), two_tc=False)
    # Unknown / future parts: conservative VMEM budget, assume multi-core.
    return dict(name="unknown", vmem_cap=48 * _MIB,
                ts=(512, 256, 128, 64, 32, 16, 8), ti=(256, 128), two_tc=True)


def _vmem_estimate(ts, ti, H, out_bytes):
    """Upper-bound VMEM footprint (double-buffered windows + f32 accumulator)."""
    x = ts * H * 2 * 2                      # token tile (counted 2x to be safe)
    w1 = H * ti * 2 * 2                     # c_fc slab
    b1 = 8 * max(ti, 128) * 4 * 2           # (1, ti) pads sublanes to 8
    w2 = ti * H * 2 * 2                     # c_proj slab
    b2 = 8 * max(H, 128) * 4 * 2
    out = ts * H * out_bytes * 2
    acc = ts * H * 4
    return x + w1 + b1 + w2 + b2 + out + acc


def _select_tiles(S, H, I, out_bytes, target):
    ti_opts = [c for c in target["ti"] if I % c == 0] or [I]
    s_cap = max(8, _round_up(S, 8))
    ts_opts = [c for c in target["ts"] if c <= s_cap] or [s_cap]
    if target["two_tc"] and s_cap >= 16:
        # Keep >= 2 token tiles so the 'parallel' axis feeds both TensorCores.
        pref = [c for c in ts_opts if pl.cdiv(S, c) >= 2]
        if pref:
            ts_opts = pref
    # Prioritise the token tile (arithmetic intensity ~ ts); shrink ti first.
    for ts in ts_opts:
        for ti in ti_opts:
            if _vmem_estimate(ts, ti, H, out_bytes) <= target["vmem_cap"]:
                return ts, ti
    return ts_opts[-1], ti_opts[-1]


def mlp_pallas(
    x,
    w_fc,
    b_fc,
    w_proj,
    b_proj,
    *,
    token_tile=None,
    inner_tile=None,
    compute_dtype=jnp.bfloat16,
    out_dtype=jnp.bfloat16,
    vmem_limit_bytes=None,
):
    S, H = x.shape
    I = w_fc.shape[1]
    assert w_fc.shape == (H, I)
    assert w_proj.shape == (I, H)
    assert b_fc.shape == (I,)
    assert b_proj.shape == (H,)
    assert H % 128 == 0, "hidden size must be lane-aligned (multiple of 128)"

    target = _tpu_target()
    out_bytes = jnp.dtype(out_dtype).itemsize
    ts_auto, ti_auto = _select_tiles(S, H, I, out_bytes, target)
    ts = token_tile if token_tile is not None else ts_auto
    ti = inner_tile if inner_tile is not None else ti_auto
    assert ts % 8 == 0, "token tile must be sublane aligned"
    assert I % ti == 0 and (ti % 128 == 0 or ti == I)

    # Ragged token counts: pad up to a whole number of token tiles, slice back.
    S_pad = _round_up(S, ts)

    # bf16 operands for the MXU; biases stay f32 (added into f32 accumulators).
    xc = x.astype(compute_dtype)
    if S_pad != S:
        xc = jnp.pad(xc, ((0, S_pad - S), (0, 0)))

    # Pre-block c_fc weights into contiguous (I//ti, H, ti) slabs so each grid
    # step DMAs one fully contiguous 2*H*ti-byte slab instead of column-slicing
    # (H, ti) out of (H, I) (which reads only ti*2 contiguous bytes per row).
    n_k = I // ti
    w1c = jnp.transpose(w_fc.astype(compute_dtype).reshape(H, n_k, ti), (1, 0, 2))
    w2c = w_proj.astype(compute_dtype)      # (ti, H) row slabs are contiguous
    b_fc2 = b_fc.reshape(1, I).astype(jnp.float32)
    b_proj2 = b_proj.reshape(1, H).astype(jnp.float32)

    if vmem_limit_bytes is None:
        vmem_limit_bytes = min(
            target["vmem_cap"],
            int(_vmem_estimate(ts, ti, H, out_bytes) * 1.15) + 2 * _MIB,
        )

    grid = (S_pad // ts, n_k)  # reduction axis (I) last

    # Advisory cost estimate so XLA schedules surrounding ops sensibly.
    flops = 4 * S_pad * H * I
    bytes_accessed = (
        S_pad * H * 2                       # x
        + 2 * H * I * 2 * (S_pad // ts)     # both weights, re-streamed per token tile
        + (I + H) * 4                       # biases
        + S_pad * H * out_bytes             # output
    )
    cost = pl.CostEstimate(
        flops=flops, transcendentals=S_pad * I, bytes_accessed=bytes_accessed
    )

    def build(x_pipeline_mode):
        return pl.pallas_call(
            mlp_kernel,
            out_shape=jax.ShapeDtypeStruct((S_pad, H), out_dtype),
            grid_spec=pltpu.PrefetchScalarGridSpec(
                num_scalar_prefetch=0,
                grid=grid,
                in_specs=[
                    # x token tile: constant across k -> single buffer is enough.
                    pl.BlockSpec((ts, H), lambda i, k: (i, 0),
                                 pipeline_mode=x_pipeline_mode),
                    # c_fc weight slab, pre-blocked (leading dim squeezed).
                    pl.BlockSpec((None, H, ti), lambda i, k: (k, 0, 0)),
                    # c_fc bias slab.
                    pl.BlockSpec((1, ti), lambda i, k: (0, k)),
                    # c_proj weight slab (contiguous row block).
                    pl.BlockSpec((ti, H), lambda i, k: (k, 0)),
                    # c_proj bias.
                    pl.BlockSpec((1, H), lambda i, k: (0, 0)),
                ],
                out_specs=pl.BlockSpec((ts, H), lambda i, k: (i, 0)),
                scratch_shapes=[pltpu.VMEM((ts, H), jnp.float32)],
            ),
            compiler_params=pltpu.CompilerParams(
                dimension_semantics=("parallel", "arbitrary"),
                vmem_limit_bytes=int(vmem_limit_bytes),
            ),
            cost_estimate=cost,
        )

    args = (xc, w1c, b_fc2, w2c, b_proj2)
    try:
        out = build(pl.Buffered(1))(*args)
    except Exception:
        # Conservative fallback: default (double) buffering for the x tile.
        out = build(None)(*args)

    return out[:S] if S_pad != S else out


def mlp_ref(x, w_fc, b_fc, w_proj, b_proj, compute_dtype=jnp.bfloat16):
    # Reference matching the kernel's numerics: bf16-rounded operands, f32 math.
    xr = x.astype(compute_dtype).astype(jnp.float32)
    w1r = w_fc.astype(compute_dtype).astype(jnp.float32)
    w2r = w_proj.astype(compute_dtype).astype(jnp.float32)
    h = xr @ w1r + b_fc
    h = _gelu_tanh(h)
    h = h.astype(compute_dtype).astype(jnp.float32)
    return h @ w2r + b_proj


if __name__ == "__main__":
    # Small shapes consistent with the module (intermediate = 4 * hidden).
    # S is deliberately not a multiple of the token tile to exercise padding,
    # and both grid axes (token tiles, I-reduction tiles) are exercised.
    S, H, I = 190, 256, 1024
    key = jax.random.PRNGKey(0)
    kx, k1, kb1, k2, kb2 = jax.random.split(key, 5)

    x = jax.random.normal(kx, (S, H), dtype=jnp.float32)

    # Deterministic param init (mimicking nn.Linear uniform bounds), stored
    # pre-transposed as [in_features, out_features] like prepare_weights(None).
    bound1 = 1.0 / math.sqrt(H)
    w_fc = jax.random.uniform(k1, (H, I), minval=-bound1, maxval=bound1, dtype=jnp.float32)
    b_fc = jax.random.uniform(kb1, (I,), minval=-bound1, maxval=bound1, dtype=jnp.float32)

    bound2 = 1.0 / math.sqrt(I)
    w_proj = jax.random.uniform(k2, (I, H), minval=-bound2, maxval=bound2, dtype=jnp.float32)
    b_proj = jax.random.uniform(kb2, (H,), minval=-bound2, maxval=bound2, dtype=jnp.float32)

    out = mlp_pallas(x, w_fc, b_fc, w_proj, b_proj)
    out = jax.block_until_ready(out)

    ref = mlp_ref(x, w_fc, b_fc, w_proj, b_proj)
    assert out.shape == (S, H)
    out_f32 = out.astype(jnp.float32)
    max_err = float(jnp.max(jnp.abs(out_f32 - ref)))
    assert jnp.allclose(out_f32, ref, atol=3e-2, rtol=3e-2), f"mismatch vs reference (max |err| = {max_err})"

    print("KERNEL_OK")
</pallas_src>

<mosaic_0001>
module attributes {stable_mosaic.version = 11 : i64} {
  func.func @mlp_kernel(%arg0: i32, %arg1: i32, %arg2: memref<128x256xbf16, #tpu.memory_space<vmem>>, %arg3: memref<1x256x256xbf16, #tpu.memory_space<vmem>>, %arg4: memref<1x256xf32, #tpu.memory_space<vmem>>, %arg5: memref<256x256xbf16, #tpu.memory_space<vmem>>, %arg6: memref<1x256xf32, #tpu.memory_space<vmem>>, %arg7: memref<128x256xbf16, #tpu.memory_space<vmem>>, %arg8: memref<128x256xf32, #tpu.memory_space<vmem>>) attributes {dimension_semantics = [#tpu.dimension_semantics<parallel>, #tpu.dimension_semantics<arbitrary>], iteration_bounds = array<i64: 2, 4>, scalar_prefetch = 0 : i64, scratch_operands = 1 : i64, tpu.core_type = #tpu.core_type<tc>, window_params = [{pipeline_mode = #tpu.pipeline_mode<synchronous>, transform_indices = @transform_0, window_bounds = array<i64: 128, 256>}, {transform_indices = @transform_1, window_bounds = array<i64: 1, 256, 256>}, {transform_indices = @transform_2, window_bounds = array<i64: 1, 256>}, {transform_indices = @transform_3, window_bounds = array<i64: 256, 256>}, {pipeline_mode = #tpu.pipeline_mode<synchronous>, transform_indices = @transform_4, window_bounds = array<i64: 1, 256>}, {transform_indices = @transform_5, window_bounds = array<i64: 128, 256>}]} {
    %c0_i32 = arith.constant 0 : i32
    %0 = arith.cmpi eq, %arg1, %c0_i32 : i32
    %1 = arith.extui %0 : i1 to i32
    %c0_i32_0 = arith.constant 0 : i32
    %2 = arith.cmpi ne, %1, %c0_i32_0 : i32
    scf.if %2 {
      %cst_19 = arith.constant 0.000000e+00 : f32
      %32 = vector.broadcast %cst_19 : f32 to vector<128x256xf32>
      %c0_20 = arith.constant 0 : index
      %c0_21 = arith.constant 0 : index
      %33 = vector.load %arg8[%c0_20, %c0_21] : memref<128x256xf32, #tpu.memory_space<vmem>>, vector<128x256xf32>
      tpu.vector_store %arg8[%c0_20, %c0_21], %32 {strides = array<i32>} : memref<128x256xf32, #tpu.memory_space<vmem>>, vector<128x256xf32>,
    } else {
    }
    %c0 = arith.constant 0 : index
    %c0_1 = arith.constant 0 : index
    %3 = vector.load %arg2[%c0, %c0_1] : memref<128x256xbf16, #tpu.memory_space<vmem>>, vector<128x256xbf16>
    %c0_2 = arith.constant 0 : index
    %c0_3 = arith.constant 0 : index
    %c0_4 = arith.constant 0 : index
    %4 = vector.load %arg3[%c0_2, %c0_3, %c0_4] : memref<1x256x256xbf16, #tpu.memory_space<vmem>>, vector<1x256x256xbf16>
    %5 = vector.shape_cast %4 : vector<1x256x256xbf16> to vector<256x256xbf16>
    %cst = arith.constant dense<0.000000e+00> : vector<128x256xf32>
    %6 = tpu.matmul %3, %5, %cst {dimension_numbers = #tpu.dot_dimension_numbers<[1], [0], [0], [1], [0, 0, 1, 1], [], []>} : vector<128x256xbf16>, vector<256x256xbf16>, vector<128x256xf32> -> vector<128x256xf32>
    %c0_5 = arith.constant 0 : index
    %c0_6 = arith.constant 0 : index
    %7 = vector.load %arg4[%c0_5, %c0_6] : memref<1x256xf32, #tpu.memory_space<vmem>>, vector<1x256xf32>
    %8 = vector.broadcast %7 : vector<1x256xf32> to vector<128x256xf32>
    %9 = arith.addf %6, %8 : vector<128x256xf32>
    %cst_7 = arith.constant 5.000000e-01 : f32
    %10 = vector.broadcast %cst_7 : f32 to vector<128x256xf32>
    %11 = arith.mulf %10, %9 : vector<128x256xf32>
    %cst_8 = arith.constant 4.471500e-02 : f32
    %12 = vector.broadcast %cst_8 : f32 to vector<128x256xf32>
    %13 = arith.mulf %12, %9 : vector<128x256xf32>
    %14 = arith.mulf %13, %9 : vector<128x256xf32>
    %15 = arith.mulf %14, %9 : vector<128x256xf32>
    %16 = arith.addf %9, %15 : vector<128x256xf32>
    %cst_9 = arith.constant 0.797884583 : f32
    %17 = vector.broadcast %cst_9 : f32 to vector<128x256xf32>
    %18 = arith.mulf %17, %16 : vector<128x256xf32>
    %19 = math.tanh %18 : vector<128x256xf32>
    %cst_10 = arith.constant 1.000000e+00 : f32
    %20 = vector.broadcast %cst_10 : f32 to vector<128x256xf32>
    %21 = arith.addf %20, %19 : vector<128x256xf32>
    %22 = arith.mulf %11, %21 : vector<128x256xf32>
    %c0_11 = arith.constant 0 : index
    %c0_12 = arith.constant 0 : index
    %23 = vector.load %arg8[%c0_11, %c0_12] : memref<128x256xf32, #tpu.memory_space<vmem>>, vector<128x256xf32>
    %24 = arith.truncf %22 : vector<128x256xf32> to vector<128x256xbf16>
    %c0_13 = arith.constant 0 : index
    %c0_14 = arith.constant 0 : index
    %25 = vector.load %arg5[%c0_13, %c0_14] : memref<256x256xbf16, #tpu.memory_space<vmem>>, vector<256x256xbf16>
    %cst_15 = arith.constant dense<0.000000e+00> : vector<128x256xf32>
    %26 = tpu.matmul %24, %25, %cst_15 {dimension_numbers = #tpu.dot_dimension_numbers<[1], [0], [0], [1], [0, 0, 1, 1], [], []>} : vector<128x256xbf16>, vector<256x256xbf16>, vector<128x256xf32> -> vector<128x256xf32>
    %27 = arith.addf %23, %26 : vector<128x256xf32>
    %c0_16 = arith.constant 0 : index
    %c0_17 = arith.constant 0 : index
    %28 = vector.load %arg8[%c0_16, %c0_17] : memref<128x256xf32, #tpu.memory_space<vmem>>, vector<128x256xf32>
    tpu.vector_store %arg8[%c0_16, %c0_17], %27 {strides = array<i32>} : memref<128x256xf32, #tpu.memory_space<vmem>>, vector<128x256xf32>,
    %c3_i32 = arith.constant 3 : i32
    %29 = arith.cmpi eq, %arg1, %c3_i32 : i32
    %30 = arith.extui %29 : i1 to i32
    %c0_i32_18 = arith.constant 0 : i32
    %31 = arith.cmpi ne, %30, %c0_i32_18 : i32
    scf.if %31 {
      %c0_19 = arith.constant 0 : index
      %c0_20 = arith.constant 0 : index
      %32 = vector.load %arg8[%c0_19, %c0_20] : memref<128x256xf32, #tpu.memory_space<vmem>>, vector<128x256xf32>
      %c0_21 = arith.constant 0 : index
      %c0_22 = arith.constant 0 : index
      %33 = vector.load %arg6[%c0_21, %c0_22] : memref<1x256xf32, #tpu.memory_space<vmem>>, vector<1x256xf32>
      %34 = vector.broadcast %33 : vector<1x256xf32> to vector<128x256xf32>
      %35 = arith.addf %32, %34 : vector<128x256xf32>
      %36 = arith.truncf %35 : vector<128x256xf32> to vector<128x256xbf16>
      %c0_23 = arith.constant 0 : index
      %c0_24 = arith.constant 0 : index
      %37 = vector.load %arg7[%c0_23, %c0_24] : memref<128x256xbf16, #tpu.memory_space<vmem>>, vector<128x256xbf16>
      tpu.vector_store %arg7[%c0_23, %c0_24], %36 {strides = array<i32>} : memref<128x256xbf16, #tpu.memory_space<vmem>>, vector<128x256xbf16>,
    } else {
    }
    return
  }
  func.func @transform_0(%arg0: i32, %arg1: i32) -> (i32, i32) {
    %c0_i32 = arith.constant 0 : i32
    %c0_i32_0 = arith.constant 0 : i32
    return %arg0, %c0_i32 : i32, i32
  }
  func.func @transform_1(%arg0: i32, %arg1: i32) -> (i32, i32, i32) {
    %c0_i32 = arith.constant 0 : i32
    %c0_i32_0 = arith.constant 0 : i32
    %c0_i32_1 = arith.constant 0 : i32
    return %arg1, %c0_i32, %c0_i32_0 : i32, i32, i32
  }
  func.func @transform_2(%arg0: i32, %arg1: i32) -> (i32, i32) {
    %c0_i32 = arith.constant 0 : i32
    %c0_i32_0 = arith.constant 0 : i32
    return %c0_i32, %arg1 : i32, i32
  }
  func.func @transform_3(%arg0: i32, %arg1: i32) -> (i32, i32) {
    %c0_i32 = arith.constant 0 : i32
    %c0_i32_0 = arith.constant 0 : i32
    return %arg1, %c0_i32 : i32, i32
  }
  func.func @transform_4(%arg0: i32, %arg1: i32) -> (i32, i32) {
    %c0_i32 = arith.constant 0 : i32
    %c0_i32_0 = arith.constant 0 : i32
    %c0_i32_1 = arith.constant 0 : i32
    return %c0_i32, %c0_i32_0 : i32, i32
  }
  func.func @transform_5(%arg0: i32, %arg1: i32) -> (i32, i32) {
    %c0_i32 = arith.constant 0 : i32
    %c0_i32_0 = arith.constant 0 : i32
    return %arg0, %c0_i32 : i32, i32
  }
}

module attributes {stable_mosaic.version = 11 : i64} {
  func.func @mlp_kernel(%arg0: i32, %arg1: i32, %arg2: memref<128x256xbf16, #tpu.memory_space<vmem>>, %arg3: memref<1x256x256xbf16, #tpu.memory_space<vmem>>, %arg4: memref<1x256xf32, #tpu.memory_space<vmem>>, %arg5: memref<256x256xbf16, #tpu.memory_space<vmem>>, %arg6: memref<1x256xf32, #tpu.memory_space<vmem>>, %arg7: memref<128x256xbf16, #tpu.memory_space<vmem>>, %arg8: memref<128x256xf32, #tpu.memory_space<vmem>>) attributes {dimension_semantics = [#tpu.dimension_semantics<parallel>, #tpu.dimension_semantics<arbitrary>], iteration_bounds = array<i64: 2, 4>, scalar_prefetch = 0 : i64, scratch_operands = 1 : i64, tpu.core_type = #tpu.core_type<tc>, window_params = [{transform_indices = @transform_0, window_bounds = array<i64: 128, 256>}, {transform_indices = @transform_1, window_bounds = array<i64: 1, 256, 256>}, {transform_indices = @transform_2, window_bounds = array<i64: 1, 256>}, {transform_indices = @transform_3, window_bounds = array<i64: 256, 256>}, {pipeline_mode = #tpu.pipeline_mode<synchronous>, transform_indices = @transform_4, window_bounds = array<i64: 1, 256>}, {transform_indices = @transform_5, window_bounds = array<i64: 128, 256>}]} {
    %c0_i32 = arith.constant 0 : i32
    %0 = arith.cmpi eq, %arg1, %c0_i32 : i32
    %1 = arith.extui %0 : i1 to i32
    %c0_i32_0 = arith.constant 0 : i32
    %2 = arith.cmpi ne, %1, %c0_i32_0 : i32
    scf.if %2 {
      %cst_19 = arith.constant 0.000000e+00 : f32
      %32 = vector.broadcast %cst_19 : f32 to vector<128x256xf32>
      %c0_20 = arith.constant 0 : index
      %c0_21 = arith.constant 0 : index
      %33 = vector.load %arg8[%c0_20, %c0_21] : memref<128x256xf32, #tpu.memory_space<vmem>>, vector<128x256xf32>
      tpu.vector_store %arg8[%c0_20, %c0_21], %32 {strides = array<i32>} : memref<128x256xf32, #tpu.memory_space<vmem>>, vector<128x256xf32>,
    } else {
    }
    %c0 = arith.constant 0 : index
    %c0_1 = arith.constant 0 : index
    %3 = vector.load %arg2[%c0, %c0_1] : memref<128x256xbf16, #tpu.memory_space<vmem>>, vector<128x256xbf16>
    %c0_2 = arith.constant 0 : index
    %c0_3 = arith.constant 0 : index
    %c0_4 = arith.constant 0 : index
    %4 = vector.load %arg3[%c0_2, %c0_3, %c0_4] : memref<1x256x256xbf16, #tpu.memory_space<vmem>>, vector<1x256x256xbf16>
    %5 = vector.shape_cast %4 : vector<1x256x256xbf16> to vector<256x256xbf16>
    %cst = arith.constant dense<0.000000e+00> : vector<128x256xf32>
    %6 = tpu.matmul %3, %5, %cst {dimension_numbers = #tpu.dot_dimension_numbers<[1], [0], [0], [1], [0, 0, 1, 1], [], []>} : vector<128x256xbf16>, vector<256x256xbf16>, vector<128x256xf32> -> vector<128x256xf32>
    %c0_5 = arith.constant 0 : index
    %c0_6 = arith.constant 0 : index
    %7 = vector.load %arg4[%c0_5, %c0_6] : memref<1x256xf32, #tpu.memory_space<vmem>>, vector<1x256xf32>
    %8 = vector.broadcast %7 : vector<1x256xf32> to vector<128x256xf32>
    %9 = arith.addf %6, %8 : vector<128x256xf32>
    %cst_7 = arith.constant 5.000000e-01 : f32
    %10 = vector.broadcast %cst_7 : f32 to vector<128x256xf32>
    %11 = arith.mulf %10, %9 : vector<128x256xf32>
    %cst_8 = arith.constant 4.471500e-02 : f32
    %12 = vector.broadcast %cst_8 : f32 to vector<128x256xf32>
    %13 = arith.mulf %12, %9 : vector<128x256xf32>
    %14 = arith.mulf %13, %9 : vector<128x256xf32>
    %15 = arith.mulf %14, %9 : vector<128x256xf32>
    %16 = arith.addf %9, %15 : vector<128x256xf32>
    %cst_9 = arith.constant 0.797884583 : f32
    %17 = vector.broadcast %cst_9 : f32 to vector<128x256xf32>
    %18 = arith.mulf %17, %16 : vector<128x256xf32>
    %19 = math.tanh %18 : vector<128x256xf32>
    %cst_10 = arith.constant 1.000000e+00 : f32
    %20 = vector.broadcast %cst_10 : f32 to vector<128x256xf32>
    %21 = arith.addf %20, %19 : vector<128x256xf32>
    %22 = arith.mulf %11, %21 : vector<128x256xf32>
    %c0_11 = arith.constant 0 : index
    %c0_12 = arith.constant 0 : index
    %23 = vector.load %arg8[%c0_11, %c0_12] : memref<128x256xf32, #tpu.memory_space<vmem>>, vector<128x256xf32>
    %24 = arith.truncf %22 : vector<128x256xf32> to vector<128x256xbf16>
    %c0_13 = arith.constant 0 : index
    %c0_14 = arith.constant 0 : index
    %25 = vector.load %arg5[%c0_13, %c0_14] : memref<256x256xbf16, #tpu.memory_space<vmem>>, vector<256x256xbf16>
    %cst_15 = arith.constant dense<0.000000e+00> : vector<128x256xf32>
    %26 = tpu.matmul %24, %25, %cst_15 {dimension_numbers = #tpu.dot_dimension_numbers<[1], [0], [0], [1], [0, 0, 1, 1], [], []>} : vector<128x256xbf16>, vector<256x256xbf16>, vector<128x256xf32> -> vector<128x256xf32>
    %27 = arith.addf %23, %26 : vector<128x256xf32>
    %c0_16 = arith.constant 0 : index
    %c0_17 = arith.constant 0 : index
    %28 = vector.load %arg8[%c0_16, %c0_17] : memref<128x256xf32, #tpu.memory_space<vmem>>, vector<128x256xf32>
    tpu.vector_store %arg8[%c0_16, %c0_17], %27 {strides = array<i32>} : memref<128x256xf32, #tpu.memory_space<vmem>>, vector<128x256xf32>,
    %c3_i32 = arith.constant 3 : i32
    %29 = arith.cmpi eq, %arg1, %c3_i32 : i32
    %30 = arith.extui %29 : i1 to i32
    %c0_i32_18 = arith.constant 0 : i32
    %31 = arith.cmpi ne, %30, %c0_i32_18 : i32
    scf.if %31 {
      %c0_19 = arith.constant 0 : index
      %c0_20 = arith.constant 0 : index
      %32 = vector.load %arg8[%c0_19, %c0_20] : memref<128x256xf32, #tpu.memory_space<vmem>>, vector<128x256xf32>
      %c0_21 = arith.constant 0 : index
      %c0_22 = arith.constant 0 : index
      %33 = vector.load %arg6[%c0_21, %c0_22] : memref<1x256xf32, #tpu.memory_space<vmem>>, vector<1x256xf32>
      %34 = vector.broadcast %33 : vector<1x256xf32> to vector<128x256xf32>
      %35 = arith.addf %32, %34 : vector<128x256xf32>
      %36 = arith.truncf %35 : vector<128x256xf32> to vector<128x256xbf16>
      %c0_23 = arith.constant 0 : index
      %c0_24 = arith.constant 0 : index
      %37 = vector.load %arg7[%c0_23, %c0_24] : memref<128x256xbf16, #tpu.memory_space<vmem>>, vector<128x256xbf16>
      tpu.vector_store %arg7[%c0_23, %c0_24], %36 {strides = array<i32>} : memref<128x256xbf16, #tpu.memory_space<vmem>>, vector<128x256xbf16>,
    } else {
    }
    return
  }
  func.func @transform_0(%arg0: i32, %arg1: i32) -> (i32, i32) {
    %c0_i32 = arith.constant 0 : i32
    %c0_i32_0 = arith.constant 0 : i32
    return %arg0, %c0_i32 : i32, i32
  }
  func.func @transform_1(%arg0: i32, %arg1: i32) -> (i32, i32, i32) {
    %c0_i32 = arith.constant 0 : i32
    %c0_i32_0 = arith.constant 0 : i32
    %c0_i32_1 = arith.constant 0 : i32
    return %arg1, %c0_i32, %c0_i32_0 : i32, i32, i32
  }
  func.func @transform_2(%arg0: i32, %arg1: i32) -> (i32, i32) {
    %c0_i32 = arith.constant 0 : i32
    %c0_i32_0 = arith.constant 0 : i32
    return %c0_i32, %arg1 : i32, i32
  }
  func.func @transform_3(%arg0: i32, %arg1: i32) -> (i32, i32) {
    %c0_i32 = arith.constant 0 : i32
    %c0_i32_0 = arith.constant 0 : i32
    return %arg1, %c0_i32 : i32, i32
  }
  func.func @transform_4(%arg0: i32, %arg1: i32) -> (i32, i32) {
    %c0_i32 = arith.constant 0 : i32
    %c0_i32_0 = arith.constant 0 : i32
    %c0_i32_1 = arith.constant 0 : i32
    return %c0_i32, %c0_i32_0 : i32, i32
  }
  func.func @transform_5(%arg0: i32, %arg1: i32) -> (i32, i32) {
    %c0_i32 = arith.constant 0 : i32
    %c0_i32_0 = arith.constant 0 : i32
    return %arg0, %c0_i32 : i32, i32
  }
}

</mosaic_0001>

<bundles_post_ra>
// kernel: tpu_custom_call.1
= control target key start
LH: loop header
LB: loop body
LE: loop exit
PB: predicated region body
PF: predicated region fallthrough
CT: control target
= control target key end

     0   :  { %s3540_s0 = inlined_call_operand.hbm [shape: bf16[256,256], index: 0, kind: input, shape index: {}]   ;;  %s3541_s1 = inlined_call_operand.hbm [shape: bf16[4,256,256], index: 1, kind: input, shape index: {}]   ;;  %s3542_s2 = inlined_call_operand.hbm [shape: f32[1,1024], index: 2, kind: input, shape index: {}]   ;;  %s3543_s3 = inlined_call_operand.hbm [shape: bf16[1024,256], index: 3, kind: input, shape index: {}]   ;;  %s3544_s4 = inlined_call_operand.vmem [shape: f32[1,256], index: 4, kind: input, shape index: {}]   ;;  %s3545_s5 = inlined_call_operand.hbm [shape: bf16[256,256], index: 5, kind: output, shape index: {}]  }
   0x1   :  { %3566 = sst [smem:[#allocation28_spill]] %s3541_s1 }
   0x2   :  { %3567 = sst [smem:[#allocation29_spill]] %s3544_s4 }
   0x3   :  { %3568 = sst [smem:[#allocation30_spill]] %s3545_s5 }
   0x4   :  { %10 = vsyncpa [#allocation4], 0 }
   0x5   :  { %11 = vsyncpa [#allocation7], 0 }
   0x6   :  { %13 = vsyncpa [#allocation7 + $0x1], 0 }
   0x7   :  { %14 = vsyncpa [#allocation10], 0 }
   0x8   :  { %16 = vsyncpa [#allocation10 + $0x1], 0 }
   0x9   :  { %17 = vsyncpa [#allocation5], 0 }
   0xa   :  { %19 = vsyncpa [#allocation5 + $0x1], 0  ;;  %s2856_s18 = smov 0   ;;  %s2858_s19 = smov 0  }
   0xb   :  { %s2860_s20 = smov 0   ;;  %s2862_s21 = smov 0  }
   0xc   :  { %s2864_s22 = smov 0   ;;  %s2866_s23 = smov 0  }
   0xd   :  { %s2868_s24 = smov 0   ;;  %s2870_s25 = smov 0  }
   0xe   :  { %s2872_s26 = smov 0   ;;  %s2874_s27 = smov 0  }
   0xf   :  { %s2876_s28 = smov 0  }
  0x10 LB: > { %3569 = sst [smem:[#allocation16_spill]] %s2786_s20  ;;  %s34_s29 = sadd.s32 1, %s2810_s26  ;;  %s2818_s28 = sphi %s2876_s28, %s25_s28   ;;  %s2814_s27 = sphi %s2874_s27, %s3609_s27   ;;  %s2810_s26 = sphi %s2872_s26, %s3615_s26   ;;  %s2806_s25 = sphi %s2870_s25, %s3607_s25   ;;  %s2802_s24 = sphi %s2868_s24, %s3614_s24   ;;  %s2798_s23 = sphi %s2866_s23, %s3606_s23   ;;  %s2794_s22 = sphi %s2864_s22, %s3613_s22   ;;  %s2790_s21 = sphi %s2862_s21, %s3612_s21   ;;  %s2786_s20 = sphi %s2860_s20, %s3604_s20   ;;  %s2782_s19 = sphi %s2858_s19, %s3611_s19   ;;  %s2778_s18 = sphi %s2856_s18, %s3610_s18  }
  0x11   : > { %3570 = sst [smem:[#allocation17_spill]] %s2790_s21  ;;  %s37_s30 = sadd.s32 1, %s2814_s27 }
  0x12   : > { %3571 = sst [smem:[#allocation18_spill]] %s2798_s23  ;;  %p35_p0 = scmp.ge.s32.totalorder %s34_s29, 4 }
  0x13   : > { %3572 = sst [smem:[#allocation19_spill]] %s2806_s25  ;;  %s70_s6 = sadd.s32 1, %s2786_s20 }
  0x14   : > { %3573 = sst [smem:[#allocation20_spill]] %s2814_s27  ;;  %p77_p1 = scmp.ne.s32.totalorder %s2786_s20, %s2782_s19 }
  0x15   : > { %3574 = sst [smem:[#allocation21_spill]] %s2818_s28  ;;  %p78_p2 = scmp.eq.s32.totalorder %s2818_s28, 0 }
  0x16   : > { %s3617_s29 = smov (%p35_p0, %s34_s29), 0  ;;  %s3619_s30 = smov (!%p35_p0, %s37_s30), %s2814_s27 }
  0x17   : > { %3575 = sst [smem:[#allocation22_spill]] %s3617_s29  ;;  %s67_s7 = ssub.s32 %s2810_s26, %s3617_s29 }
  0x18   : > { %p2922_p3 = por %p78_p2, %p77_p1  ;;  %p39_p4 = scmp.ge.s32.totalorder %s3619_s30, 2 }
  0x19   : > { %p68_p5 = scmp.eq.s32.totalorder %s67_s7, 0  ;;  %p2408_p6 = scmp.lt.s32.totalorder %s2818_s28, 8 }
  0x1a   : > { %s3621_s30 = smov (%p39_p4, %s3619_s30), 0  ;;  %s227_s10 = sand.u32 1, %s2818_s28  }
  0x1b   : > { %3577 = sst [smem:[#allocation23_spill]] %s3621_s30  ;;  %s2934_s11 = sand.u32 1, %s2786_s20  }
  0x1c   : > { %s2929_s9 = scalar_select %p68_p5, %s2786_s20, %s70_s6  }
  0x1d   : > { %s3547_s12 = sshll.u32 %s2934_s11, 8  ;;  %s3548_s13 = sshll.u32 %s2810_s26, 8 }
  0x1e   : > { %3578 = sst [smem:[#allocation24_spill]] %s2929_s9  ;;  %s231_s17 = scalar_lea.vmem [#allocation6], %s3547_s12 }
  0x1f   : > { %s3579_s1 = sld [smem:[#allocation28_spill]]  ;;  %s239_s6 = sshll.u32 %s231_s17, 4  ;;  %s240_s6 = int_to_ptr.vmem [resolvable:$true] %s239_s6 }
  0x20   : > { %p2947_p7 = pnand %p2408_p6, %p2922_p3  ;;  %s2951_s14 = scalar_lea.sflag [#allocation7], %s227_s10 }
  0x21   : > { %s3549_s15 = smov 128   ;;  %s3551_s12 = smov 8  }
  0x22   : > { %s1945_s8 = sadd.s32 4294967294, %s2818_s28   ;;  %s41_s17 = ssub.s32 %s2814_s27, %s3621_s30 }
  0x23   : > { %p42_p8 = scmp.eq.s32.totalorder %s41_s17, 0  ;;  %s44_s10 = sadd.s32 1, %s2798_s23 }
  0x24   : > { %p57_p9 = scmp.ne.s32.totalorder %s2794_s22, %s2790_s21  ;;  %p83_p12 = scmp.ne.s32.totalorder %s2782_s19, %s2778_s18 }
  0x25   : > { %s236_s16 = scalar_lea.hbm %s3579_s1, %s3548_s13  ;;  %p179_p13 = scmp.ne.s32.totalorder %s2798_s23, %s2794_s22 }
  0x26   : > { %s237_s7 = sshll.u32 %s236_s16, 4  ;;  %s2960_s16 = sadd.s32 4294967295, %s2818_s28   ;;  %s238_s7 = int_to_ptr.hbm [resolvable:$true] %s237_s7 }
  0x27   : > { %2397 = dma.hbm_to_vmem [thread:$0]  (!%p2947_p7), %s238_s7, 4096, %s240_s6, %s2951_s14, %s3549_s15, %s3549_s15, %s3551_s12  }
  0x28   : > { %p58_p10 = scmp.eq.s32.totalorder %s2960_s16, 0  ;;  %p180_p0 = scmp.eq.s32.totalorder %s2960_s16, 7 }
  0x29   : > { %s2970_s13 = scalar_select %p42_p8, %s2798_s23, %s44_s10  }
  0x2a   : > { %p2972_p11 = por %p58_p10, %p57_p9  ;;  %p2981_p1 = por %p83_p12, %p58_p10 }
  0x2b   : > { %3581 = sst [smem:[#allocation25_spill]] %s2970_s13  ;;  %p186_p2 = scmp.eq.s32.totalorder %s1945_s8, 7 }
  0x2c   : > { %p2985_p3 = por %p180_p0, %p179_p13  ;;  %p1946_p4 = scmp.ge.s32.totalorder %s2818_s28, 1 }
  0x2d   : > { %p2990_p5 = por %p186_p2, %p57_p9  ;;  %p193_p6 = scmp.lt.s32.totalorder %s2818_s28, 9 }
  0x2e   : > { %s3584_s7 = scalar_select %p2985_p3, 1, 0 }
  0x2f   : > { %s3586_s17 = scalar_select %p2990_p5, 1, 0 }
  0x30   : > { %3585 = sst [smem:[#allocation26_spill]] %s3584_s7  ;;  %s3559_s18 = sshll.u32 %s2806_s25, 7 }
  0x31   : > { %3587 = sst [smem:[#allocation27_spill]] %s3586_s17  ;;  %p2996_p8 = pnand %p1946_p4, %p193_p6 }
  0x32   : > { %s207_s8 = scalar_lea.hbm %s3540_s0, %s3559_s18  ;;  %s2822_s27 = smov [#allocation3]  }
  0x33   : > { %s208_s30 = sshll.u32 %s207_s8, 4  ;;  %s210_s13 = sshll.u32 %s2822_s27, 4  ;;  %s209_s30 = int_to_ptr.hbm [resolvable:$true] %s208_s30  ;;  %s211_s13 = int_to_ptr.vmem [resolvable:$true] %s210_s13 }
  0x34   : > { %p2390_p9 = pneg %p2996_p8  ;;  %s1954_s23 = sshll.u32 %s2934_s11, 1 }
  0x35   : > { %s1955_s20 = sshll.u32 %s2810_s26, 1  ;;  %s253_s17 = scalar_lea.vmem [#allocation8], %s1954_s23 }
  0x36   : > { %p3010_p10 = pnand %p2390_p9, %p2972_p11  ;;  %s261_s21 = sshll.u32 %s253_s17, 4  ;;  %s262_s21 = int_to_ptr.vmem [resolvable:$true] %s261_s21 }
  0x37   : > { %s257_s8 = scalar_lea.hbm %s3542_s2, %s1955_s20  ;;  %s2598_s18 = sshra.s32 %s209_s30, 4  ;;  %s2599_s18 = int_to_ptr.hbm [resolvable:$true] %s2598_s18 }
  0x38   : > { %s2600_s27 = scalar_lea.hbm %s2599_s18, 128  ;;  %p2602_p13 = pneg %p3010_p10 }
  0x39   : > { %p2601_p12 = scmp.ne.s32.totalorder %s2599_s18, %s2600_s27  ;;  %s2605_s5 = scalar_lea.hbm %s3540_s0, 256 }
  0x3a   : > { %p2606_p4 = scmp.lt.s32.totalorder %s2599_s18, %s3540_s0  ;;  %p2607_p6 = scmp.lt.s32.totalorder %s2605_s5, %s2600_s27 }
  0x3b   : > { %p2603_p0 = pnand %p2602_p13, %p2601_p12 }
  0x3c   : > { %p2608_p9 = por %p2607_p6, %p2606_p4 }
  0x3d   : > { %p2604_p2 = pneg %p2603_p0 }
  0x3f   : > { %p2609_p5 = pnand %p2608_p9, %p2604_p2 }
  0x41   : > { %2612 = shalt.err (!%p2609_p5)
}
  0x42   : > { %s3590_s20 = smov 8   ;;  %s3591_s23 = smov 128  }
  0x43   : > { %2393 = dma.hbm_to_vmem [thread:$0]  (!%p3010_p10), %s209_s30, 2048, %s211_s13, [#allocation4], %s3591_s23, %s3591_s23, %s3590_s20  }
  0x44   : > { %s259_s28 = sshll.u32 %s257_s8, 4  ;;  %s3592_s4 = sshll.u32 %s2810_s26, 8  ;;  %s260_s28 = int_to_ptr.hbm [resolvable:$true] %s259_s28 }
  0x45   : > { %2400 = dma.hbm_to_vmem [thread:$0]  (!%p2947_p7), %s260_s28, 32, %s262_s21, %s2951_s14  }
  0x46   : > { %s278_s9 = scalar_lea.hbm %s3543_s3, %s3592_s4  ;;  %s3593_s17 = sshll.u32 %s2934_s11, 8 }
  0x47   : > { %s279_s7 = sshll.u32 %s278_s9, 4  ;;  %s272_s18 = scalar_lea.vmem [#allocation9], %s3593_s17  ;;  %s280_s7 = int_to_ptr.hbm [resolvable:$true] %s279_s7 }
  0x48   : > { %s281_s12 = sshll.u32 %s272_s18, 4  ;;  %s269_s15 = scalar_lea.sflag [#allocation10], %s2934_s11  ;;  %s282_s12 = int_to_ptr.vmem [resolvable:$true] %s281_s12 }
  0x49   : > { %2403 = dma.hbm_to_vmem [thread:$0]  (!%p2947_p7), %s280_s7, 4096, %s282_s12, %s269_s15, %s3591_s23, %s3591_s23, %s3590_s20  }
  0x4a   : > { %293 = sbr.rel (%p2996_p8) target bundleno = 632 (0x278), region = 40 }
  0x4f   : > { %2761 = dma.done.wait (%p2972_p11), [#allocation4], 2048  }
  0x50   : > { %2763 = vsyncadd (%p2972_p11), [#allocation4], 4294965248  ;;  %s300_s21 = sand.u32 1, %s2960_s16   ;;  %s302_s30 = sand.u32 1, %s2782_s19  }
  0x51   : > { %s1961_s11 = sshll.u32 %s302_s30, 8  ;;  %s301_s29 = scalar_lea.sflag [#allocation7], %s300_s21 }
  0x52   : > { %s3055_s13 = scalar_lea.vmem [#allocation6], %s1961_s11 }
  0x53   : > { %2765 = dma.done.wait (%p2981_p1), %s301_s29, 4128  }
  0x54   : > { %2767 = vsyncadd (%p2981_p1), %s301_s29, 4294963168  ;;  %s1962_s14 = sshll.u32 %s302_s30, 1  ;;  %s321_s1 = scalar_lea.sflag [#allocation10], %s302_s30 }
  0x55   : > { %s3061_s10 = scalar_lea.vmem [#allocation8], %s1962_s14  ;;  %s3063_s8 = scalar_lea.vmem [#allocation9], %s1961_s11 }
  0x56   : > { %2769 = dma.done.wait (%p2981_p1), %s321_s1, 4096  }
  0x57   : > { %2771 = vsyncadd (%p2981_p1), %s321_s1, 4294963200  ;;  %s359_s16 = sand.u32 1, %s2794_s22   ;;  %p1965_p7 = scmp.ne.s32.totalorder %s2802_s24, 0 }
  0x58   : > { %s1964_s27 = sshll.u32 %s359_s16, 7 }
  0x59   : > { %s3072_s20 = scalar_lea.vmem [#allocation11], %s1964_s27  ;;  %369 = sbr.rel (%p1965_p7) target bundleno = 127 (0x7f), region = 60 }
  0x5e   : > { %v2823_v0 = vmov 0.0  }
  0x5f   : > { %370 = vst [vmem:[#allocation2 + $0xb0] sm:$0xff] %v2823_v0 }
  0x60   : > { %371 = vst [vmem:[#allocation2] sm:$0xff] %v2823_v0 }
  0x61   : > { %372 = vst [vmem:[#allocation2 + $0xd8] sm:$0xff] %v2823_v0 }
  0x62   : > { %373 = vst [vmem:[#allocation2 + $0x18] sm:$0xff] %v2823_v0 }
  0x63   : > { %374 = vst [vmem:[#allocation2 + $0x50] sm:$0xff] %v2823_v0 }
  0x64   : > { %375 = vst [vmem:[#allocation2 + $0x68] sm:$0xff] %v2823_v0 }
  0x65   : > { %376 = vst [vmem:[#allocation2 + $0x30] sm:$0xff] %v2823_v0 }
  0x66   : > { %377 = vst [vmem:[#allocation2 + $0x48] sm:$0xff] %v2823_v0 }
  0x67   : > { %378 = vst [vmem:[#allocation2 + $0x80] sm:$0xff] %v2823_v0 }
  0x68   : > { %379 = vst [vmem:[#allocation2 + $0x88] sm:$0xff] %v2823_v0 }
  0x69   : > { %380 = vst [vmem:[#allocation2 + $0xe8] sm:$0xff] %v2823_v0 }
  0x6a   : > { %381 = vst [vmem:[#allocation2 + $0xb8] sm:$0xff] %v2823_v0 }
  0x6b   : > { %382 = vst [vmem:[#allocation2 + $0x60] sm:$0xff] %v2823_v0 }
  0x6c   : > { %383 = vst [vmem:[#allocation2 + $0xf0] sm:$0xff] %v2823_v0 }
  0x6d   : > { %384 = vst [vmem:[#allocation2 + $0x8] sm:$0xff] %v2823_v0 }
  0x6e   : > { %385 = vst [vmem:[#allocation2 + $0x78] sm:$0xff] %v2823_v0 }
  0x6f   : > { %386 = vst [vmem:[#allocation2 + $0x38] sm:$0xff] %v2823_v0 }
  0x70   : > { %387 = vst [vmem:[#allocation2 + $0x58] sm:$0xff] %v2823_v0 }
  0x71   : > { %388 = vst [vmem:[#allocation2 + $0x40] sm:$0xff] %v2823_v0 }
  0x72   : > { %389 = vst [vmem:[#allocation2 + $0xc8] sm:$0xff] %v2823_v0 }
  0x73   : > { %390 = vst [vmem:[#allocation2 + $0xe0] sm:$0xff] %v2823_v0 }
  0x74   : > { %391 = vst [vmem:[#allocation2 + $0x90] sm:$0xff] %v2823_v0 }
  0x75   : > { %392 = vst [vmem:[#allocation2 + $0x70] sm:$0xff] %v2823_v0 }
  0x76   : > { %393 = vst [vmem:[#allocation2 + $0xc0] sm:$0xff] %v2823_v0 }
  0x77   : > { %394 = vst [vmem:[#allocation2 + $0xa8] sm:$0xff] %v2823_v0 }
  0x78   : > { %395 = vst [vmem:[#allocation2 + $0xd0] sm:$0xff] %v2823_v0 }
  0x79   : > { %396 = vst [vmem:[#allocation2 + $0x10] sm:$0xff] %v2823_v0 }
  0x7a   : > { %397 = vst [vmem:[#allocation2 + $0x28] sm:$0xff] %v2823_v0 }
  0x7b   : > { %398 = vst [vmem:[#allocation2 + $0xa0] sm:$0xff] %v2823_v0 }
  0x7c   : > { %399 = vst [vmem:[#allocation2 + $0xf8] sm:$0xff] %v2823_v0 }
  0x7d   : > { %400 = vst [vmem:[#allocation2 + $0x20] sm:$0xff] %v2823_v0 }
  0x7e   : > { %401 = vst [vmem:[#allocation2 + $0x98] sm:$0xff] %v2823_v0 }
  0x7f PF: > { %v2088_v1 = vld [vmem:[%s3055_s13 + $0x70] sm:$0xf]  ;;  %v2329_v2 = vld [vmem:[%s3055_s13 + $0x74] sm:$0xf0]  ;;  %v2328_v6 = vld [vmem:[%s3055_s13 + $0x74] sm:$0xf] }
  0x80   : > { %v2152_v3 = vld [vmem:[%s3055_s13 + $0xf0] sm:$0xf]  ;;  %v2089_v4 = vor.u32 %v2329_v2, %v2088_v1  ;;  %v2345_v5 = vld [vmem:[%s3055_s13 + $0xf4] sm:$0xf0]  ;;  %v2090_v7 = vld [vmem:[%s3055_s13 + $0x78] sm:$0xf0] }
  0x81   : > { %v2153_v8 = vor.u32 %v2345_v5, %v2152_v3  ;;  %v2093_v9 = vor.u32 %v2328_v6, %v2090_v7  ;;  %v2344_v10 = vld [vmem:[%s3055_s13 + $0xf4] sm:$0xf]  ;;  %v2154_v11 = vld [vmem:[%s3055_s13 + $0xf8] sm:$0xf0]  ;;  %v2080_v12 = vld [vmem:[%s3055_s13 + $0x60] sm:$0xf] }
  0x82   : > { %696 = vmatpush.bf16.msra.mxu0 %v2089_v4  ;;  %v2157_v13 = vor.u32 %v2344_v10, %v2154_v11  ;;  %v2327_v14 = vld [vmem:[%s3055_s13 + $0x64] sm:$0xf0]  ;;  %v2144_v15 = vld [vmem:[%s3055_s13 + $0xe0] sm:$0xf]  ;;  %v2326_v19 = vld [vmem:[%s3055_s13 + $0x64] sm:$0xf] }
  0x83   : > { %v2343_v16 = vld [vmem:[%s3055_s13 + $0xe4] sm:$0xf0]  ;;  %745 = vmatpush.bf16.msra.mxu1 %v2153_v8  ;;  %794 = vmatpush.bf16.msra.mxu2 %v2093_v9  ;;  %v2081_v17 = vor.u32 %v2327_v14, %v2080_v12  ;;  %v2082_v20 = vld [vmem:[%s3055_s13 + $0x68] sm:$0xf0]  ;;  %v2342_v21 = vld [vmem:[%s3055_s13 + $0xe4] sm:$0xf] }
  0x84   : > { %v2145_v18 = vor.u32 %v2343_v16, %v2144_v15  ;;  %843 = vmatpush.bf16.msra.mxu3 %v2157_v13  ;;  %v2085_v22 = vor.u32 %v2326_v19, %v2082_v20  ;;  %v2146_v23 = vld [vmem:[%s3055_s13 + $0xe8] sm:$0xf0]  ;;  %v2072_v24 = vld [vmem:[%s3055_s13 + $0x50] sm:$0xf]  ;;  %v2325_v25 = vld [vmem:[%s3055_s13 + $0x54] sm:$0xf0] }
  0x85   : > { %v2149_v26 = vor.u32 %v2342_v21, %v2146_v23  ;;  %v2136_v27 = vld [vmem:[%s3055_s13 + $0xd0] sm:$0xf]  ;;  %v2341_v28 = vld [vmem:[%s3055_s13 + $0xd4] sm:$0xf0]  ;;  %v2324_v29 = vld [vmem:[%s3055_s13 + $0x54] sm:$0xf]  ;;  %v2073_v30 = vor.u32 %v2325_v25, %v2072_v24 }
  0x86   : > { %697 = vmatpush.bf16.msra.mxu0 %v2081_v17  ;;  %v2074_v31 = vld [vmem:[%s3055_s13 + $0x58] sm:$0xf0]  ;;  %v2340_v32 = vld [vmem:[%s3055_s13 + $0xd4] sm:$0xf]  ;;  %v2137_v34 = vor.u32 %v2341_v28, %v2136_v27  ;;  %v2064_v36 = vld [vmem:[%s3055_s13 + $0x40] sm:$0xf] }
  0x87   : > { %v2138_v33 = vld [vmem:[%s3055_s13 + $0xd8] sm:$0xf0]  ;;  %746 = vmatpush.bf16.msra.mxu1 %v2145_v18  ;;  %795 = vmatpush.bf16.msra.mxu2 %v2085_v22  ;;  %v2077_v35 = vor.u32 %v2324_v29, %v2074_v31  ;;  %v2323_v37 = vld [vmem:[%s3055_s13 + $0x44] sm:$0xf0]  ;;  %v2128_v38 = vld [vmem:[%s3055_s13 + $0xc0] sm:$0xf] }
  0x88   : > { %844 = vmatpush.bf16.msra.mxu3 %v2149_v26  ;;  %v2141_v39 = vor.u32 %v2340_v32, %v2138_v33  ;;  %v2339_v40 = vld [vmem:[%s3055_s13 + $0xc4] sm:$0xf0]  ;;  %v2322_v41 = vld [vmem:[%s3055_s13 + $0x44] sm:$0xf]  ;;  %v2066_v42 = vld [vmem:[%s3055_s13 + $0x48] sm:$0xf0]  ;;  %v2065_v45 = vor.u32 %v2323_v37, %v2064_v36 }
  0x89   : > { %v2338_v43 = vld [vmem:[%s3055_s13 + $0xc4] sm:$0xf]  ;;  %v2130_v44 = vld [vmem:[%s3055_s13 + $0xc8] sm:$0xf0]  ;;  %v2129_v46 = vor.u32 %v2339_v40, %v2128_v38  ;;  %v2069_v47 = vor.u32 %v2322_v41, %v2066_v42  ;;  %v2056_v48 = vld [vmem:[%s3055_s13 + $0x30] sm:$0xf] }
  0x8a   : > { %698 = vmatpush.bf16.msra.mxu0 %v2073_v30  ;;  %v2321_v49 = vld [vmem:[%s3055_s13 + $0x34] sm:$0xf0]  ;;  %v2120_v50 = vld [vmem:[%s3055_s13 + $0xb0] sm:$0xf]  ;;  %v2133_v51 = vor.u32 %v2338_v43, %v2130_v44  ;;  %v2320_v53 = vld [vmem:[%s3055_s13 + $0x34] sm:$0xf] }
  0x8b   : > { %747 = vmatpush.bf16.msra.mxu1 %v2137_v34  ;;  %796 = vmatpush.bf16.msra.mxu2 %v2077_v35  ;;  %v2337_v52 = vld [vmem:[%s3055_s13 + $0xb4] sm:$0xf0]  ;;  %v2058_v54 = vld [vmem:[%s3055_s13 + $0x38] sm:$0xf0]  ;;  %v2336_v55 = vld [vmem:[%s3055_s13 + $0xb4] sm:$0xf]  ;;  %v2057_v57 = vor.u32 %v2321_v49, %v2056_v48 }
  0x8c   : > { %845 = vmatpush.bf16.msra.mxu3 %v2141_v39  ;;  %v2122_v56 = vld [vmem:[%s3055_s13 + $0xb8] sm:$0xf0]  ;;  %v2121_v58 = vor.u32 %v2337_v52, %v2120_v50  ;;  %v2061_v59 = vor.u32 %v2320_v53, %v2058_v54  ;;  %v2048_v60 = vld [vmem:[%s3055_s13 + $0x20] sm:$0xf]  ;;  %v2319_v61 = vld [vmem:[%s3055_s13 + $0x24] sm:$0xf0] }
  0x8d   : > { %v2112_v62 = vld [vmem:[%s3055_s13 + $0xa0] sm:$0xf]  ;;  %v2125_v63 = vor.u32 %v2336_v55, %v2122_v56  ;;  %v2335_v0 = vld [vmem:[%s3055_s13 + $0xa4] sm:$0xf0]  ;;  %v2318_v1 = vld [vmem:[%s3055_s13 + $0x24] sm:$0xf]  ;;  %v2049_v5 = vor.u32 %v2319_v61, %v2048_v60 }
  0x8e   : > { %699 = vmatpush.bf16.msra.mxu0 %v2065_v45  ;;  %v2050_v2 = vld [vmem:[%s3055_s13 + $0x28] sm:$0xf0]  ;;  %v2334_v3 = vld [vmem:[%s3055_s13 + $0xa4] sm:$0xf]  ;;  %v2113_v6 = vor.u32 %v2335_v0, %v2112_v62  ;;  %v2040_v8 = vld [vmem:[%s3055_s13 + $0x10] sm:$0xf] }
  0x8f   : > { %748 = vmatpush.bf16.msra.mxu1 %v2129_v46  ;;  %797 = vmatpush.bf16.msra.mxu2 %v2069_v47  ;;  %v2114_v4 = vld [vmem:[%s3055_s13 + $0xa8] sm:$0xf0]  ;;  %v2053_v7 = vor.u32 %v2318_v1, %v2050_v2  ;;  %v2317_v9 = vld [vmem:[%s3055_s13 + $0x14] sm:$0xf0]  ;;  %v2104_v10 = vld [vmem:[%s3055_s13 + $0x90] sm:$0xf] }
  0x90   : > { %846 = vmatpush.bf16.msra.mxu3 %v2133_v51  ;;  %v2117_v11 = vor.u32 %v2334_v3, %v2114_v4  ;;  %v2333_v12 = vld [vmem:[%s3055_s13 + $0x94] sm:$0xf0]  ;;  %v2316_v13 = vld [vmem:[%s3055_s13 + $0x14] sm:$0xf]  ;;  %v2042_v14 = vld [vmem:[%s3055_s13 + $0x18] sm:$0xf0]  ;;  %v2041_v17 = vor.u32 %v2317_v9, %v2040_v8 }
  0x91   : > { %v2332_v15 = vld [vmem:[%s3055_s13 + $0x94] sm:$0xf]  ;;  %v2106_v16 = vld [vmem:[%s3055_s13 + $0x98] sm:$0xf0]  ;;  %v2105_v18 = vor.u32 %v2333_v12, %v2104_v10  ;;  %v2045_v19 = vor.u32 %v2316_v13, %v2042_v14  ;;  %v2032_v20 = vld [vmem:[%s3055_s13] sm:$0xf] }
  0x92   : > { %700 = vmatpush.bf16.msra.mxu0 %v2057_v57  ;;  %v2315_v21 = vld [vmem:[%s3055_s13 + $0x4] sm:$0xf0]  ;;  %v2096_v22 = vld [vmem:[%s3055_s13 + $0x80] sm:$0xf]  ;;  %v2109_v23 = vor.u32 %v2332_v15, %v2106_v16  ;;  %v2314_v25 = vld [vmem:[%s3055_s13 + $0x4] sm:$0xf] }
  0x93   : > { %749 = vmatpush.bf16.msra.mxu1 %v2121_v58  ;;  %798 = vmatpush.bf16.msra.mxu2 %v2061_v59  ;;  %v2331_v24 = vld [vmem:[%s3055_s13 + $0x84] sm:$0xf0]  ;;  %v2034_v26 = vld [vmem:[%s3055_s13 + $0x8] sm:$0xf0]  ;;  %v2330_v27 = vld [vmem:[%s3055_s13 + $0x84] sm:$0xf]  ;;  %v2033_v29 = vor.u32 %v2315_v21, %v2032_v20 }
  0x94   : > { %847 = vmatpush.bf16.msra.mxu3 %v2125_v63  ;;  %v2098_v28 = vld [vmem:[%s3055_s13 + $0x88] sm:$0xf0]  ;;  %v1968_v30 = vld [vmem:[#allocation3] sm:$0xf]  ;;  %v2299_v31 = vld [vmem:[#allocation3 + $0x4] sm:$0xf0]  ;;  %v2097_v32 = vor.u32 %v2331_v24, %v2096_v22  ;;  %v2037_v33 = vor.u32 %v2314_v25, %v2034_v26 }
  0x95   : > { %v2298_v34 = vld [vmem:[#allocation3 + $0x4] sm:$0xf]  ;;  %v1970_v35 = vld [vmem:[#allocation3 + $0x8] sm:$0xf0]  ;;  %v2101_v36 = vor.u32 %v2330_v27, %v2098_v28  ;;  %v1969_v37 = vor.u32 %v2299_v31, %v1968_v30  ;;  %v2360_v39 = vld [vmem:[%s3063_s8 + $0x74] sm:$0xf] }
  0x96   : > { %701 = vmatpush.bf16.msra.mxu0 %v2049_v5  ;;  %v1973_v38 = vor.u32 %v2298_v34, %v1970_v35  ;;  %v2218_v40 = vld [vmem:[%s3063_s8 + $0x78] sm:$0xf0]  ;;  %v2376_v41 = vld [vmem:[%s3063_s8 + $0xf4] sm:$0xf]  ;;  %v2216_v44 = vld [vmem:[%s3063_s8 + $0x70] sm:$0xf] }
  0x97   : > { %750 = vmatpush.bf16.msra.mxu1 %v2113_v6  ;;  %799 = vmatpush.bf16.msra.mxu2 %v2053_v7  ;;  %v2221_v42 = vor.u32 %v2360_v39, %v2218_v40  ;;  %v2282_v43 = vld [vmem:[%s3063_s8 + $0xf8] sm:$0xf0]  ;;  %v2361_v45 = vld [vmem:[%s3063_s8 + $0x74] sm:$0xf0]  ;;  %v2280_v48 = vld [vmem:[%s3063_s8 + $0xf0] sm:$0xf] }
  0x98   : > { %848 = vmatpush.bf16.msra.mxu3 %v2117_v11  ;;  %v2285_v46 = vor.u32 %v2376_v41, %v2282_v43  ;;  %v2217_v47 = vor.u32 %v2361_v45, %v2216_v44  ;;  %v2377_v49 = vld [vmem:[%s3063_s8 + $0xf4] sm:$0xf0]  ;;  %v1976_v51 = vld [vmem:[#allocation3 + $0x10] sm:$0xf]  ;;  %v2301_v52 = vld [vmem:[#allocation3 + $0x14] sm:$0xf0] }
  0x99   : > { %v2281_v50 = vor.u32 %v2377_v49, %v2280_v48  ;;  %v2300_v53 = vld [vmem:[#allocation3 + $0x14] sm:$0xf]  ;;  %v1978_v54 = vld [vmem:[#allocation3 + $0x18] sm:$0xf0]  ;;  %v1977_v55 = vor.u32 %v2301_v52, %v1976_v51  ;;  %v2358_v57 = vld [vmem:[%s3063_s8 + $0x64] sm:$0xf] }
  0x9a   : > { %702 = vmatpush.bf16.msra.mxu0 %v2041_v17  ;;  %v1981_v56 = vor.u32 %v2300_v53, %v1978_v54  ;;  %v2210_v58 = vld [vmem:[%s3063_s8 + $0x68] sm:$0xf0]  ;;  %v2374_v59 = vld [vmem:[%s3063_s8 + $0xe4] sm:$0xf]  ;;  %v2208_v62 = vld [vmem:[%s3063_s8 + $0x60] sm:$0xf] }
  0x9b   : > { %751 = vmatpush.bf16.msra.mxu1 %v2105_v18  ;;  %800 = vmatpush.bf16.msra.mxu2 %v2045_v19  ;;  %v2213_v60 = vor.u32 %v2358_v57, %v2210_v58  ;;  %v2274_v61 = vld [vmem:[%s3063_s8 + $0xe8] sm:$0xf0]  ;;  %v2359_v63 = vld [vmem:[%s3063_s8 + $0x64] sm:$0xf0]  ;;  %v2272_v2 = vld [vmem:[%s3063_s8 + $0xe0] sm:$0xf] }
  0x9c   : > { %849 = vmatpush.bf16.msra.mxu3 %v2109_v23  ;;  %v2277_v0 = vor.u32 %v2374_v59, %v2274_v61  ;;  %v2209_v1 = vor.u32 %v2359_v63, %v2208_v62  ;;  %v2375_v3 = vld [vmem:[%s3063_s8 + $0xe4] sm:$0xf0]  ;;  %v1984_v5 = vld [vmem:[#allocation3 + $0x20] sm:$0xf]  ;;  %v2303_v6 = vld [vmem:[#allocation3 + $0x24] sm:$0xf0] }
  0x9d   : > { %v2273_v4 = vor.u32 %v2375_v3, %v2272_v2  ;;  %v2302_v7 = vld [vmem:[#allocation3 + $0x24] sm:$0xf]  ;;  %v1986_v8 = vld [vmem:[#allocation3 + $0x28] sm:$0xf0]  ;;  %v1985_v9 = vor.u32 %v2303_v6, %v1984_v5  ;;  %v2356_v11 = vld [vmem:[%s3063_s8 + $0x54] sm:$0xf] }
  0x9e   : > { %703 = vmatpush.bf16.msra.mxu0 %v2033_v29  ;;  %v1989_v10 = vor.u32 %v2302_v7, %v1986_v8  ;;  %v2202_v12 = vld [vmem:[%s3063_s8 + $0x58] sm:$0xf0]  ;;  %v2372_v13 = vld [vmem:[%s3063_s8 + $0xd4] sm:$0xf]  ;;  %v2200_v16 = vld [vmem:[%s3063_s8 + $0x50] sm:$0xf] }
  0x9f   : > { %752 = vmatpush.bf16.msra.mxu1 %v2097_v32  ;;  %801 = vmatpush.bf16.msra.mxu2 %v2037_v33  ;;  %v2205_v14 = vor.u32 %v2356_v11, %v2202_v12  ;;  %v2266_v15 = vld [vmem:[%s3063_s8 + $0xd8] sm:$0xf0]  ;;  %v2357_v17 = vld [vmem:[%s3063_s8 + $0x54] sm:$0xf0]  ;;  %v2264_v20 = vld [vmem:[%s3063_s8 + $0xd0] sm:$0xf] }
  0xa0   : > { %850 = vmatpush.bf16.msra.mxu3 %v2101_v36  ;;  %v2269_v18 = vor.u32 %v2372_v13, %v2266_v15  ;;  %v2201_v19 = vor.u32 %v2357_v17, %v2200_v16  ;;  %v2373_v21 = vld [vmem:[%s3063_s8 + $0xd4] sm:$0xf0]  ;;  %v1992_v23 = vld [vmem:[#allocation3 + $0x30] sm:$0xf]  ;;  %v2305_v24 = vld [vmem:[#allocation3 + $0x34] sm:$0xf0] }
  0xa1   : > { %704 = vmatmul.bf16.vlgmr.msra.gmra.mxu0 %v1969_v37  ;;  %v2265_v22 = vor.u32 %v2373_v21, %v2264_v20  ;;  %v2304_v25 = vld [vmem:[#allocation3 + $0x34] sm:$0xf]  ;;  %v1994_v26 = vld [vmem:[#allocation3 + $0x38] sm:$0xf0]  ;;  %v1993_v27 = vor.u32 %v2305_v24, %v1992_v23  ;;  %v2354_v29 = vld [vmem:[%s3063_s8 + $0x44] sm:$0xf] }
  0xa2   : > { %753 = vmatmul.bf16.vlgmr.msra.gmra.mxu1 %v1973_v38  ;;  %802 = vmatmul.bf16.vlgmr.msra.gmra.mxu2 %v1969_v37  ;;  %v1997_v28 = vor.u32 %v2304_v25, %v1994_v26  ;;  %v2194_v30 = vld [vmem:[%s3063_s8 + $0x48] sm:$0xf0]  ;;  %v2370_v31 = vld [vmem:[%s3063_s8 + $0xc4] sm:$0xf]  ;;  %v2192_v34 = vld [vmem:[%s3063_s8 + $0x40] sm:$0xf] }
  0xa3   : > { %851 = vmatmul.bf16.vlgmr.msra.gmra.mxu3 %v1973_v38  ;;  %1518 = vmatpush.bf16.msrb.mxu2 %v2221_v42  ;;  %v2197_v32 = vor.u32 %v2354_v29, %v2194_v30  ;;  %v2258_v33 = vld [vmem:[%s3063_s8 + $0xc8] sm:$0xf0]  ;;  %v2355_v35 = vld [vmem:[%s3063_s8 + $0x44] sm:$0xf0]  ;;  %v2256_v38 = vld [vmem:[%s3063_s8 + $0xc0] sm:$0xf] }
  0xa4   : > { %1567 = vmatpush.bf16.msrb.mxu3 %v2285_v46  ;;  %1420 = vmatpush.bf16.msrb.mxu0 %v2217_v47  ;;  %v2261_v36 = vor.u32 %v2370_v31, %v2258_v33  ;;  %v2193_v37 = vor.u32 %v2355_v35, %v2192_v34  ;;  %v2371_v39 = vld [vmem:[%s3063_s8 + $0xc4] sm:$0xf0]  ;;  %v2000_v41 = vld [vmem:[#allocation3 + $0x40] sm:$0xf]  ;;  %v2307_v42 = vld [vmem:[#allocation3 + $0x44] sm:$0xf0] }
  0xa5   : > { %1469 = vmatpush.bf16.msrb.mxu1 %v2281_v50  ;;  %v2257_v40 = vor.u32 %v2371_v39, %v2256_v38  ;;  %v2306_v43 = vld [vmem:[#allocation3 + $0x44] sm:$0xf]  ;;  %v2002_v44 = vld [vmem:[#allocation3 + $0x48] sm:$0xf0]  ;;  %v2001_v45 = vor.u32 %v2307_v42, %v2000_v41  ;;  %v2352_v47 = vld [vmem:[%s3063_s8 + $0x34] sm:$0xf] }
  0xa6   : > { %v2005_v46 = vor.u32 %v2306_v43, %v2002_v44  ;;  %v2186_v48 = vld [vmem:[%s3063_s8 + $0x38] sm:$0xf0]  ;;  %v2368_v49 = vld [vmem:[%s3063_s8 + $0xb4] sm:$0xf]  ;;  %v2184_v52 = vld [vmem:[%s3063_s8 + $0x30] sm:$0xf] }
  0xa7   : > { %1519 = vmatpush.bf16.msrb.mxu2 %v2213_v60  ;;  %v2189_v50 = vor.u32 %v2352_v47, %v2186_v48  ;;  %v2250_v51 = vld [vmem:[%s3063_s8 + $0xb8] sm:$0xf0]  ;;  %v2353_v53 = vld [vmem:[%s3063_s8 + $0x34] sm:$0xf0]  ;;  %v2008_v59 = vld [vmem:[#allocation3 + $0x50] sm:$0xf] }
  0xa8   : > { %1568 = vmatpush.bf16.msrb.mxu3 %v2277_v0  ;;  %1421 = vmatpush.bf16.msrb.mxu0 %v2209_v1  ;;  %v2253_v54 = vor.u32 %v2368_v49, %v2250_v51  ;;  %v2369_v57 = vld [vmem:[%s3063_s8 + $0xb4] sm:$0xf0]  ;;  %v2309_v60 = vld [vmem:[#allocation3 + $0x54] sm:$0xf0]  ;;  %v2308_v61 = vld [vmem:[#allocation3 + $0x54] sm:$0xf] }
  0xa9   : > { %1470 = vmatpush.bf16.msrb.mxu1 %v2273_v4  ;;  %v2010_v62 = vld [vmem:[#allocation3 + $0x58] sm:$0xf0]  ;;  %v2009_v63 = vor.u32 %v2309_v60, %v2008_v59  ;;  %v2350_v1 = vld [vmem:[%s3063_s8 + $0x24] sm:$0xf]  ;;  %v2178_v2 = vld [vmem:[%s3063_s8 + $0x28] sm:$0xf0] }
  0xaa   : > { %v2013_v0 = vor.u32 %v2308_v61, %v2010_v62  ;;  %v2366_v3 = vld [vmem:[%s3063_s8 + $0xa4] sm:$0xf]  ;;  %v2181_v4 = vor.u32 %v2350_v1, %v2178_v2  ;;  %v2242_v5 = vld [vmem:[%s3063_s8 + $0xa8] sm:$0xf0]  ;;  %v2016_v7 = vld [vmem:[#allocation3 + $0x60] sm:$0xf] }
  0xab   : > { %1520 = vmatpush.bf16.msrb.mxu2 %v2205_v14  ;;  %v2245_v6 = vor.u32 %v2366_v3, %v2242_v5  ;;  %v2311_v8 = vld [vmem:[#allocation3 + $0x64] sm:$0xf0]  ;;  %v2176_v13 = vld [vmem:[%s3063_s8 + $0x20] sm:$0xf]  ;;  %v2351_v14 = vld [vmem:[%s3063_s8 + $0x24] sm:$0xf0] }
  0xac   : > { %1569 = vmatpush.bf16.msrb.mxu3 %v2269_v18  ;;  %1422 = vmatpush.bf16.msrb.mxu0 %v2201_v19  ;;  %v2017_v11 = vor.u32 %v2311_v8, %v2016_v7  ;;  %v2240_v15 = vld [vmem:[%s3063_s8 + $0xa0] sm:$0xf]  ;;  %v2177_v16 = vor.u32 %v2351_v14, %v2176_v13  ;;  %v2367_v17 = vld [vmem:[%s3063_s8 + $0xa4] sm:$0xf0]  ;;  %v2024_v19 = vld [vmem:[#allocation3 + $0x70] sm:$0xf] }
  0xad   : > { %1471 = vmatpush.bf16.msrb.mxu1 %v2265_v22  ;;  %v2241_v18 = vor.u32 %v2367_v17, %v2240_v15  ;;  %v2313_v20 = vld [vmem:[#allocation3 + $0x74] sm:$0xf0]  ;;  %v2312_v21 = vld [vmem:[#allocation3 + $0x74] sm:$0xf]  ;;  %v2026_v22 = vld [vmem:[#allocation3 + $0x78] sm:$0xf0] }
  0xae   : > { %v2025_v23 = vor.u32 %v2313_v20, %v2024_v19  ;;  %v2348_v24 = vld [vmem:[%s3063_s8 + $0x14] sm:$0xf]  ;;  %v2170_v25 = vld [vmem:[%s3063_s8 + $0x18] sm:$0xf0]  ;;  %v2168_v31 = vld [vmem:[%s3063_s8 + $0x10] sm:$0xf] }
  0xaf   : > { %1521 = vmatpush.bf16.msrb.mxu2 %v2197_v32  ;;  %v2364_v26 = vld [vmem:[%s3063_s8 + $0x94] sm:$0xf]  ;;  %v2234_v29 = vld [vmem:[%s3063_s8 + $0x98] sm:$0xf0]  ;;  %v2349_v32 = vld [vmem:[%s3063_s8 + $0x14] sm:$0xf0] }
  0xb0   : > { %1570 = vmatpush.bf16.msrb.mxu3 %v2261_v36  ;;  %1423 = vmatpush.bf16.msrb.mxu0 %v2193_v37  ;;  %v2237_v30 = vor.u32 %v2364_v26, %v2234_v29  ;;  %v2232_v33 = vld [vmem:[%s3063_s8 + $0x90] sm:$0xf]  ;;  %v2169_v34 = vor.u32 %v2349_v32, %v2168_v31  ;;  %v2365_v35 = vld [vmem:[%s3063_s8 + $0x94] sm:$0xf0]  ;;  %v450_v37 = vld [vmem:[%s3061_s10] sm:$0x3] }
  0xb1   : > { %709 = vmatmul.bf16.gmra.mxu0 %v1977_v55  ;;  %1472 = vmatpush.bf16.msrb.mxu1 %v2257_v40  ;;  %v2233_v36 = vor.u32 %v2365_v35, %v2232_v33  ;;  %v2346_v38 = vld [vmem:[%s3063_s8 + $0x4] sm:$0xf]  ;;  %v2162_v39 = vld [vmem:[%s3063_s8 + $0x8] sm:$0xf0]  ;;  %v3199_v41 = vperm.slane %v450_v37, 0  ;;  %p2286_p11 = scmp.ne.s32.totalorder %s2802_s24, 3 }
  0xb2   : > { %758 = vmatmul.bf16.gmra.mxu1 %v1981_v56  ;;  %807 = vmatmul.bf16.gmra.mxu2 %v1977_v55  ;;  %v2185_v55 = vor.u32 %v2353_v53, %v2184_v52  ;;  %v2362_v40 = vld [vmem:[%s3063_s8 + $0x84] sm:$0xf]  ;;  %v2165_v42 = vor.u32 %v2346_v38, %v2162_v39  ;;  %v2226_v43 = vld [vmem:[%s3063_s8 + $0x88] sm:$0xf0]  ;;  %v2347_v47 = vld [vmem:[%s3063_s8 + $0x4] sm:$0xf0] }
  0xb3   : > { %856 = vmatmul.bf16.gmra.mxu3 %v1981_v56  ;;  %v2248_v56 = vld [vmem:[%s3063_s8 + $0xb0] sm:$0xf]  ;;  %1522 = vmatpush.bf16.msrb.mxu2 %v2189_v50  ;;  %v2229_v44 = vor.u32 %v2362_v40, %v2226_v43  ;;  %v3205_v52 = vperm.slane %v450_v37, 1  ;;  %s3594_s28 = sld [smem:[#allocation29_spill]] (!%p2286_p11) }
  0xb4   : > { %v2249_v58 = vor.u32 %v2369_v57, %v2248_v56  ;;  %1571 = vmatpush.bf16.msrb.mxu3 %v2253_v54  ;;  %1424 = vmatpush.bf16.msrb.mxu0 %v2185_v55  ;;  %v2224_v54 = vld [vmem:[%s3063_s8 + $0x80] sm:$0xf]  ;;  %v2363_v55 = vld [vmem:[%s3063_s8 + $0x84] sm:$0xf0] }
  0xb5   : > { %v2225_v56 = vor.u32 %v2363_v55, %v2224_v54 }
  0xb6   : > { %1473 = vmatpush.bf16.msrb.mxu1 %v2249_v58 }
  0xb7   : > { %1523 = vmatpush.bf16.msrb.mxu2 %v2181_v4 }
  0xb8   : > { %1572 = vmatpush.bf16.msrb.mxu3 %v2245_v6  ;;  %1425 = vmatpush.bf16.msrb.mxu0 %v2177_v16 }
  0xba   : > { %1474 = vmatpush.bf16.msrb.mxu1 %v2241_v18 }
  0xbc   : > { %1573 = vmatpush.bf16.msrb.mxu3 %v2237_v30  ;;  %1426 = vmatpush.bf16.msrb.mxu0 %v2169_v34 }
  0xbe   : > { %1475 = vmatpush.bf16.msrb.mxu1 %v2233_v36 }
  0xc0   : > { %1574 = vmatpush.bf16.msrb.mxu3 %v2229_v44 }
  0xc1   : > { %714 = vmatmul.bf16.gmra.mxu0 %v1985_v9 }
  0xc2   : > { %763 = vmatmul.bf16.gmra.mxu1 %v1989_v10  ;;  %812 = vmatmul.bf16.gmra.mxu2 %v1985_v9  ;;  %v2310_v9 = vld [vmem:[#allocation3 + $0x64] sm:$0xf] }
  0xc3   : > { %861 = vmatmul.bf16.gmra.mxu3 %v1989_v10  ;;  %v2018_v10 = vld [vmem:[#allocation3 + $0x68] sm:$0xf0]  ;;  %1476 = vmatpush.bf16.msrb.mxu1 %v2225_v56 }
  0xc4   : > { %v2021_v12 = vor.u32 %v2310_v9, %v2018_v10 }
  0xd1   : > { %719 = vmatmul.bf16.gmra.mxu0 %v1993_v27 }
  0xd2   : > { %768 = vmatmul.bf16.gmra.mxu1 %v1997_v28  ;;  %817 = vmatmul.bf16.gmra.mxu2 %v1993_v27  ;;  %v2029_v27 = vor.u32 %v2312_v21, %v2026_v22 }
  0xd3   : > { %866 = vmatmul.bf16.gmra.mxu3 %v1997_v28  ;;  %v2173_v28 = vor.u32 %v2348_v24, %v2170_v25 }
  0xd5   : > { %1524 = vmatpush.bf16.msrb.mxu2 %v2173_v28 }
  0xd9   : > { %1525 = vmatpush.bf16.msrb.mxu2 %v2165_v42 }
  0xe1   : > { %724 = vmatmul.bf16.gmra.mxu0 %v2001_v45 }
  0xe2   : > { %773 = vmatmul.bf16.gmra.mxu1 %v2005_v46  ;;  %822 = vmatmul.bf16.gmra.mxu2 %v2001_v45 }
  0xe3   : > { %871 = vmatmul.bf16.gmra.mxu3 %v2005_v46  ;;  %v2160_v46 = vld [vmem:[%s3063_s8] sm:$0xf] }
  0xe4   : > { %v2161_v50 = vor.u32 %v2347_v47, %v2160_v46 }
  0xe6   : > { %1427 = vmatpush.bf16.msrb.mxu0 %v2161_v50 }
  0xf1   : > { %729 = vmatmul.bf16.gmra.mxu0 %v2009_v63 }
  0xf2   : > { %778 = vmatmul.bf16.gmra.mxu1 %v2013_v0  ;;  %827 = vmatmul.bf16.gmra.mxu2 %v2009_v63 }
  0xf3   : > { %876 = vmatmul.bf16.gmra.mxu3 %v2013_v0 }
 0x101   : > { %734 = vmatmul.bf16.gmra.mxu0 %v2017_v11 }
 0x102   : > { %783 = vmatmul.bf16.gmra.mxu1 %v2021_v12  ;;  %832 = vmatmul.bf16.gmra.mxu2 %v2017_v11 }
 0x103   : > { %881 = vmatmul.bf16.gmra.mxu3 %v2021_v12 }
 0x111   : > { %739 = vmatmul.bf16.gmra.mxu0 %v2025_v23 }
 0x112   : > { %788 = vmatmul.bf16.gmra.mxu1 %v2029_v27  ;;  %837 = vmatmul.bf16.gmra.mxu2 %v2025_v23 }
 0x113   : > { %886 = vmatmul.bf16.gmra.mxu3 %v2029_v27 }
 0x11e   : > { %v705_v45 = vpop.f32.mrf.mxu0 }
 0x11f   : > { %v706_v48 = vadd.f32 %v705_v45, %v3199_v41  ;;  %v754_v49 = vpop.f32.mrf.mxu1 }
 0x121   : > { %v755_v51 = vadd.f32 %v754_v49, %v706_v48 }
 0x123   : > { %v924_v53 = vmul.f32 0.044715, %v755_v51  ;;  %v892_v45 = vmul.f32 0.5, %v755_v51 }
 0x125   : > { %v956_v57 = vmul.f32 %v924_v53, %v755_v51  ;;  %v803_v58 = vpop.f32.mrf.mxu2 }
 0x126   : > { %v804_v59 = vadd.f32 %v803_v58, %v3205_v52  ;;  %v852_v60 = vpop.f32.mrf.mxu3  ;;  %v707_v61 = vpop.f32.mrf.mxu0 }
 0x127   : > { %v708_v62 = vadd.f32 %v707_v61, %v3199_v41  ;;  %v756_v63 = vpop.f32.mrf.mxu1  ;;  %v988_v0 = vmul.f32 %v956_v57, %v755_v51 }
 0x128   : > { %v3211_v1 = vadd.f32 %v852_v60, %v804_v59 }
 0x129   : > { %v757_v2 = vadd.f32 %v756_v63, %v708_v62  ;;  %v1020_v3 = vadd.f32 %v988_v0, %v755_v51 }
 0x12a   : > { %v925_v4 = vmul.f32 0.044715, %v3211_v1 }
 0x12b   : > { %v926_v5 = vmul.f32 0.044715, %v757_v2  ;;  %v1052_v9 = vmul.f32 0.7978846, %v1020_v3  ;;  %v894_v47 = vmul.f32 0.5, %v757_v2 }
 0x12c   : > { %v957_v6 = vmul.f32 %v925_v4, %v3211_v1 }
 0x12d   : > { %v958_v7 = vmul.f32 %v926_v5, %v757_v2  ;;  %v805_v8 = vpop.f32.mrf.mxu2  ;;  %2504 = vtanh.f32 %v1052_v9 }
 0x12e   : > { %v806_v10 = vadd.f32 %v805_v8, %v3205_v52  ;;  %v854_v11 = vpop.f32.mrf.mxu3  ;;  %v710_v12 = vpop.f32.mrf.mxu0  ;;  %v989_v13 = vmul.f32 %v957_v6, %v3211_v1  ;;  %v893_v8 = vmul.f32 0.5, %v3211_v1 }
 0x12f   : > { %v711_v14 = vadd.f32 %v710_v12, %v3199_v41  ;;  %v759_v15 = vpop.f32.mrf.mxu1  ;;  %v990_v16 = vmul.f32 %v958_v7, %v757_v2 }
 0x130   : > { %v855_v17 = vadd.f32 %v854_v11, %v806_v10  ;;  %v1021_v18 = vadd.f32 %v989_v13, %v3211_v1 }
 0x131   : > { %v3219_v19 = vadd.f32 %v759_v15, %v711_v14  ;;  %v1022_v20 = vadd.f32 %v990_v16, %v757_v2 }
 0x132   : > { %v927_v21 = vmul.f32 0.044715, %v855_v17  ;;  %v1053_v25 = vmul.f32 0.7978846, %v1021_v18  ;;  %v895_v11 = vmul.f32 0.5, %v855_v17 }
 0x133   : > { %v928_v22 = vmul.f32 0.044715, %v3219_v19  ;;  %v1054_v23 = vmul.f32 0.7978846, %v1022_v20  ;;  %v2505_v32 = vpop.eup %2504 }
 0x134   : > { %v959_v24 = vmul.f32 %v927_v21, %v855_v17  ;;  %v1116_v42 = vadd.f32 1.0, %v2505_v32 }
 0x135   : > { %v808_v26 = vpop.f32.mrf.mxu2  ;;  %2506 = vtanh.f32 %v1054_v23  ;;  %v960_v27 = vmul.f32 %v928_v22, %v3219_v19 }
 0x136   : > { %v809_v28 = vadd.f32 %v808_v26, %v3205_v52  ;;  %v857_v29 = vpop.f32.mrf.mxu3  ;;  %v712_v30 = vpop.f32.mrf.mxu0  ;;  %v991_v31 = vmul.f32 %v959_v24, %v855_v17  ;;  %2508 = vtanh.f32 %v1053_v25  ;;  %v1148_v59 = vmul.f32 %v1116_v42, %v892_v45 }
 0x137   : > { %v713_v33 = vadd.f32 %v712_v30, %v3199_v41  ;;  %v761_v34 = vpop.f32.mrf.mxu1  ;;  %v992_v35 = vmul.f32 %v960_v27, %v3219_v19 }
 0x138   : > { %v3226_v36 = vadd.f32 %v857_v29, %v809_v28  ;;  %v1023_v37 = vadd.f32 %v991_v31, %v855_v17 }
 0x139   : > { %v3228_v38 = vadd.f32 %v761_v34, %v713_v33  ;;  %v1024_v39 = vadd.f32 %v992_v35, %v3219_v19 }
 0x13a   : > { %v929_v40 = vmul.f32 0.044715, %v3226_v36  ;;  %v1055_v43 = vmul.f32 0.7978846, %v1023_v37 }
 0x13b   : > { %v2507_v44 = vpop.eup %2506  ;;  %v930_v46 = vmul.f32 0.044715, %v3228_v38  ;;  %v1056_v54 = vmul.f32 0.7978846, %v1024_v39  ;;  %v896_v39 = vmul.f32 0.5, %v3219_v19  ;;  %v898_v42 = vmul.f32 0.5, %v3228_v38 }
 0x13c   : > { %v1118_v48 = vadd.f32 1.0, %v2507_v44  ;;  %2510 = vtanh.f32 %v1055_v43  ;;  %v961_v49 = vmul.f32 %v929_v40, %v3226_v36  ;;  %v2509_v55 = vpop.eup %2508 }
 0x13d   : > { %v810_v50 = vpop.f32.mrf.mxu2  ;;  %v962_v53 = vmul.f32 %v930_v46, %v3228_v38  ;;  %v1117_v5 = vadd.f32 1.0, %v2509_v55  ;;  %2512 = vtanh.f32 %v1056_v54 }
 0x13e   : > { %v811_v56 = vadd.f32 %v810_v50, %v3205_v52  ;;  %v859_v57 = vpop.f32.mrf.mxu3  ;;  %v715_v58 = vpop.f32.mrf.mxu0  ;;  %v1150_v60 = vmul.f32 %v1118_v48, %v894_v47  ;;  %v993_v51 = vmul.f32 %v961_v49, %v3226_v36 }
 0x13f   : > { %v716_v61 = vadd.f32 %v715_v58, %v3199_v41  ;;  %v764_v62 = vpop.f32.mrf.mxu1  ;;  %v994_v63 = vmul.f32 %v962_v53, %v3228_v38  ;;  %v1149_v18 = vmul.f32 %v1117_v5, %v893_v8 }
 0x140   : > { %v3239_v0 = vadd.f32 %v859_v57, %v811_v56  ;;  %v1212_v2 = vpack.c.bf16 %v1150_v60, %v1148_v59  ;;  %v1025_v3 = vadd.f32 %v993_v51, %v3226_v36 }
 0x141   : > { %v3242_v4 = vadd.f32 %v764_v62, %v716_v61  ;;  %v1026_v6 = vadd.f32 %v994_v63, %v3228_v38 }
 0x142   : > { %v2511_v7 = vpop.eup %2510  ;;  %1428 = vmatmul.bf16.vlgmr.msrb.gmra.mxu0 %v1212_v2  ;;  %1526 = vmatmul.bf16.vlgmr.msrb.gmra.mxu2 %v1212_v2  ;;  %v931_v9 = vmul.f32 0.044715, %v3239_v0  ;;  %v1057_v15 = vmul.f32 0.7978846, %v1025_v3  ;;  %v897_v2 = vmul.f32 0.5, %v3226_v36 }
 0x143   : > { %v932_v10 = vmul.f32 0.044715, %v3242_v4  ;;  %v1119_v12 = vadd.f32 1.0, %v2511_v7  ;;  %v1058_v13 = vmul.f32 0.7978846, %v1026_v6  ;;  %v2513_v25 = vpop.eup %2512  ;;  %v899_v6 = vmul.f32 0.5, %v3239_v0 }
 0x144   : > { %v963_v14 = vmul.f32 %v931_v9, %v3239_v0  ;;  %v1120_v34 = vadd.f32 1.0, %v2513_v25 }
 0x145   : > { %v813_v16 = vpop.f32.mrf.mxu2  ;;  %v1151_v20 = vmul.f32 %v1119_v12, %v895_v11  ;;  %2514 = vtanh.f32 %v1058_v13  ;;  %v964_v21 = vmul.f32 %v932_v10, %v3242_v4 }
 0x146   : > { %v814_v22 = vadd.f32 %v813_v16, %v3205_v52  ;;  %v862_v23 = vpop.f32.mrf.mxu3  ;;  %v717_v1 = vpop.f32.mrf.mxu0  ;;  %v995_v24 = vmul.f32 %v963_v14, %v3239_v0  ;;  %2516 = vtanh.f32 %v1057_v15  ;;  %v1152_v54 = vmul.f32 %v1120_v34, %v896_v39 }
 0x147   : > { %v718_v17 = vadd.f32 %v717_v1, %v3199_v41  ;;  %v766_v26 = vpop.f32.mrf.mxu1  ;;  %v1213_v27 = vpack.c.bf16 %v1151_v20, %v1149_v18  ;;  %v996_v28 = vmul.f32 %v964_v21, %v3242_v4 }
 0x148   : > { %v3254_v29 = vadd.f32 %v862_v23, %v814_v22  ;;  %v1027_v30 = vadd.f32 %v995_v24, %v3239_v0 }
 0x149   : > { %v3257_v31 = vadd.f32 %v766_v26, %v718_v17  ;;  %1477 = vmatmul.bf16.vlgmr.msrb.gmra.mxu1 %v1213_v27  ;;  %1575 = vmatmul.bf16.vlgmr.msrb.gmra.mxu3 %v1213_v27  ;;  %v1028_v32 = vadd.f32 %v996_v28, %v3242_v4 }
 0x14a   : > { %v933_v33 = vmul.f32 0.044715, %v3254_v29  ;;  %v1059_v35 = vmul.f32 0.7978846, %v1027_v30 }
 0x14b   : > { %v2515_v37 = vpop.eup %2514  ;;  %v934_v40 = vmul.f32 0.044715, %v3257_v31  ;;  %v1060_v47 = vmul.f32 0.7978846, %v1028_v32  ;;  %v900_v32 = vmul.f32 0.5, %v3242_v4  ;;  %v902_v34 = vmul.f32 0.5, %v3257_v31 }
 0x14c   : > { %v1122_v43 = vadd.f32 1.0, %v2515_v37  ;;  %2518 = vtanh.f32 %v1059_v35  ;;  %v965_v44 = vmul.f32 %v933_v33, %v3254_v29  ;;  %v2517_v48 = vpop.eup %2516 }
 0x14d   : > { %v815_v45 = vpop.f32.mrf.mxu2  ;;  %v966_v46 = vmul.f32 %v934_v40, %v3257_v31  ;;  %v1121_v61 = vadd.f32 1.0, %v2517_v48  ;;  %2520 = vtanh.f32 %v1060_v47 }
 0x14e   : > { %v816_v49 = vadd.f32 %v815_v45, %v3205_v52  ;;  %v864_v50 = vpop.f32.mrf.mxu3  ;;  %v720_v53 = vpop.f32.mrf.mxu0  ;;  %v1154_v55 = vmul.f32 %v1122_v43, %v898_v42  ;;  %v997_v19 = vmul.f32 %v965_v44, %v3254_v29 }
 0x14f   : > { %v721_v56 = vadd.f32 %v720_v53, %v3199_v41  ;;  %v769_v38 = vpop.f32.mrf.mxu1  ;;  %v998_v57 = vmul.f32 %v966_v46, %v3257_v31  ;;  %v1153_v12 = vmul.f32 %v1121_v61, %v897_v2 }
 0x150   : > { %v3270_v58 = vadd.f32 %v864_v50, %v816_v49  ;;  %v1214_v59 = vpack.c.bf16 %v1154_v55, %v1152_v54  ;;  %v1029_v60 = vadd.f32 %v997_v19, %v3254_v29 }
 0x151   : > { %v3273_v51 = vadd.f32 %v769_v38, %v721_v56  ;;  %v1030_v62 = vadd.f32 %v998_v57, %v3257_v31 }
 0x152   : > { %v2519_v63 = vpop.eup %2518  ;;  %1433 = vmatmul.bf16.gmra.mxu0 %v1214_v59  ;;  %1531 = vmatmul.bf16.gmra.mxu2 %v1214_v59  ;;  %v935_v3 = vmul.f32 0.044715, %v3270_v58  ;;  %v1061_v10 = vmul.f32 0.7978846, %v1029_v60  ;;  %v901_v59 = vmul.f32 0.5, %v3254_v29 }
 0x153   : > { %v936_v5 = vmul.f32 0.044715, %v3273_v51  ;;  %v1123_v7 = vadd.f32 1.0, %v2519_v63  ;;  %v1062_v8 = vmul.f32 0.7978846, %v1030_v62  ;;  %v2521_v20 = vpop.eup %2520  ;;  %v903_v62 = vmul.f32 0.5, %v3270_v58 }
 0x154   : > { %v967_v9 = vmul.f32 %v935_v3, %v3270_v58  ;;  %v1124_v27 = vadd.f32 1.0, %v2521_v20 }
 0x155   : > { %v818_v11 = vpop.f32.mrf.mxu2  ;;  %v1155_v13 = vmul.f32 %v1123_v7, %v899_v6  ;;  %2522 = vtanh.f32 %v1062_v8  ;;  %v968_v14 = vmul.f32 %v936_v5, %v3273_v51 }
 0x156   : > { %v819_v15 = vadd.f32 %v818_v11, %v3205_v52  ;;  %v867_v36 = vpop.f32.mrf.mxu3  ;;  %v722_v16 = vpop.f32.mrf.mxu0  ;;  %v999_v18 = vmul.f32 %v967_v9, %v3270_v58  ;;  %2524 = vtanh.f32 %v1061_v10  ;;  %v1156_v47 = vmul.f32 %v1124_v27, %v900_v32 }
 0x157   : > { %v723_v0 = vadd.f32 %v722_v16, %v3199_v41  ;;  %v771_v21 = vpop.f32.mrf.mxu1  ;;  %v1215_v22 = vpack.c.bf16 %v1155_v13, %v1153_v12  ;;  %v1000_v23 = vmul.f32 %v968_v14, %v3273_v51 }
 0x158   : > { %v3286_v1 = vadd.f32 %v867_v36, %v819_v15  ;;  %v1031_v24 = vadd.f32 %v999_v18, %v3270_v58 }
 0x159   : > { %v3289_v25 = vadd.f32 %v771_v21, %v723_v0  ;;  %1482 = vmatmul.bf16.gmra.mxu1 %v1215_v22  ;;  %1580 = vmatmul.bf16.gmra.mxu3 %v1215_v22  ;;  %v1032_v17 = vadd.f32 %v1000_v23, %v3273_v51 }
 0x15a   : > { %v937_v26 = vmul.f32 0.044715, %v3286_v1  ;;  %v1063_v28 = vmul.f32 0.7978846, %v1031_v24 }
 0x15b   : > { %v2523_v30 = vpop.eup %2522  ;;  %v938_v33 = vmul.f32 0.044715, %v3289_v25  ;;  %v1064_v42 = vmul.f32 0.7978846, %v1032_v17 }
 0x15c   : > { %v1126_v35 = vadd.f32 1.0, %v2523_v30  ;;  %2526 = vtanh.f32 %v1063_v28  ;;  %v969_v37 = vmul.f32 %v937_v26, %v3286_v1  ;;  %v2525_v43 = vpop.eup %2524  ;;  %v904_v26 = vmul.f32 0.5, %v3273_v51 }
 0x15d   : > { %v820_v39 = vpop.f32.mrf.mxu2  ;;  %v970_v40 = vmul.f32 %v938_v33, %v3289_v25  ;;  %v1125_v56 = vadd.f32 1.0, %v2525_v43  ;;  %2528 = vtanh.f32 %v1064_v42  ;;  %v906_v28 = vmul.f32 0.5, %v3289_v25 }
 0x15e   : > { %v821_v44 = vadd.f32 %v820_v39, %v3205_v52  ;;  %v869_v45 = vpop.f32.mrf.mxu3  ;;  %v725_v46 = vpop.f32.mrf.mxu0  ;;  %v1158_v48 = vmul.f32 %v1126_v35, %v902_v34  ;;  %v1001_v4 = vmul.f32 %v969_v37, %v3286_v1 }
 0x15f   : > { %v726_v49 = vadd.f32 %v725_v46, %v3199_v41  ;;  %v774_v31 = vpop.f32.mrf.mxu1  ;;  %v1002_v50 = vmul.f32 %v970_v40, %v3289_v25  ;;  %v1157_v8 = vmul.f32 %v1125_v56, %v901_v59 }
 0x160   : > { %v3302_v53 = vadd.f32 %v869_v45, %v821_v44  ;;  %v1216_v54 = vpack.c.bf16 %v1158_v48, %v1156_v47  ;;  %v1033_v55 = vadd.f32 %v1001_v4, %v3286_v1 }
 0x161   : > { %v3305_v19 = vadd.f32 %v774_v31, %v726_v49  ;;  %v1034_v38 = vadd.f32 %v1002_v50, %v3289_v25 }
 0x162   : > { %v2527_v57 = vpop.eup %2526  ;;  %1438 = vmatmul.bf16.gmra.mxu0 %v1216_v54  ;;  %1536 = vmatmul.bf16.gmra.mxu2 %v1216_v54  ;;  %v939_v60 = vmul.f32 0.044715, %v3302_v53  ;;  %v1065_v5 = vmul.f32 0.7978846, %v1033_v55  ;;  %v905_v55 = vmul.f32 0.5, %v3286_v1 }
 0x163   : > { %v940_v61 = vmul.f32 0.044715, %v3305_v19  ;;  %v1127_v63 = vadd.f32 1.0, %v2527_v57  ;;  %v1066_v2 = vmul.f32 0.7978846, %v1034_v38  ;;  %v2529_v13 = vpop.eup %2528  ;;  %v907_v38 = vmul.f32 0.5, %v3302_v53 }
 0x164   : > { %v971_v3 = vmul.f32 %v939_v60, %v3302_v53  ;;  %v1128_v22 = vadd.f32 1.0, %v2529_v13 }
 0x165   : > { %v972_v6 = vmul.f32 %v940_v61, %v3305_v19  ;;  %v823_v7 = vpop.f32.mrf.mxu2  ;;  %v1159_v9 = vmul.f32 %v1127_v63, %v903_v62  ;;  %2530 = vtanh.f32 %v1066_v2 }
 0x166   : > { %v824_v10 = vadd.f32 %v823_v7, %v3205_v52  ;;  %v872_v29 = vpop.f32.mrf.mxu3  ;;  %v727_v11 = vpop.f32.mrf.mxu0  ;;  %v1003_v12 = vmul.f32 %v971_v3, %v3302_v53  ;;  %2532 = vtanh.f32 %v1065_v5  ;;  %v1160_v42 = vmul.f32 %v1128_v22, %v904_v26 }
 0x167   : > { %v728_v58 = vadd.f32 %v727_v11, %v3199_v41  ;;  %v776_v14 = vpop.f32.mrf.mxu1  ;;  %v1217_v15 = vpack.c.bf16 %v1159_v9, %v1157_v8  ;;  %v1004_v36 = vmul.f32 %v972_v6, %v3305_v19 }
 0x168   : > { %v3318_v16 = vadd.f32 %v872_v29, %v824_v10  ;;  %v1035_v18 = vadd.f32 %v1003_v12, %v3302_v53 }
 0x169   : > { %v3321_v20 = vadd.f32 %v776_v14, %v728_v58  ;;  %1487 = vmatmul.bf16.gmra.mxu1 %v1217_v15  ;;  %1585 = vmatmul.bf16.gmra.mxu3 %v1217_v15  ;;  %v1036_v0 = vadd.f32 %v1004_v36, %v3305_v19 }
 0x16a   : > { %v941_v21 = vmul.f32 0.044715, %v3318_v16  ;;  %v1067_v23 = vmul.f32 0.7978846, %v1035_v18 }
 0x16b   : > { %v2531_v24 = vpop.eup %2530  ;;  %v942_v17 = vmul.f32 0.044715, %v3321_v20  ;;  %v1068_v34 = vmul.f32 0.7978846, %v1036_v0 }
 0x16c   : > { %v973_v27 = vmul.f32 %v941_v21, %v3318_v16  ;;  %v1130_v30 = vadd.f32 1.0, %v2531_v24  ;;  %2534 = vtanh.f32 %v1067_v23  ;;  %v2533_v35 = vpop.eup %2532  ;;  %v908_v21 = vmul.f32 0.5, %v3305_v19 }
 0x16d   : > { %v974_v32 = vmul.f32 %v942_v17, %v3321_v20  ;;  %v825_v33 = vpop.f32.mrf.mxu2  ;;  %v1129_v49 = vadd.f32 1.0, %v2533_v35  ;;  %2536 = vtanh.f32 %v1068_v34  ;;  %v910_v23 = vmul.f32 0.5, %v3321_v20 }
 0x16e   : > { %v826_v37 = vadd.f32 %v825_v33, %v3205_v52  ;;  %v874_v39 = vpop.f32.mrf.mxu3  ;;  %v730_v40 = vpop.f32.mrf.mxu0  ;;  %v1162_v43 = vmul.f32 %v1130_v30, %v906_v28  ;;  %v1005_v44 = vmul.f32 %v973_v27, %v3318_v16 }
 0x16f   : > { %v731_v51 = vadd.f32 %v730_v40, %v3199_v41  ;;  %v779_v45 = vpop.f32.mrf.mxu1  ;;  %v1006_v25 = vmul.f32 %v974_v32, %v3321_v20  ;;  %v1161_v2 = vmul.f32 %v1129_v49, %v905_v55 }
 0x170   : > { %v3334_v46 = vadd.f32 %v874_v39, %v826_v37  ;;  %v1218_v47 = vpack.c.bf16 %v1162_v43, %v1160_v42  ;;  %v1037_v48 = vadd.f32 %v1005_v44, %v3318_v16 }
 0x171   : > { %v3337_v4 = vadd.f32 %v779_v45, %v731_v51  ;;  %v1038_v31 = vadd.f32 %v1006_v25, %v3321_v20 }
 0x172   : > { %v2535_v50 = vpop.eup %2534  ;;  %v943_v54 = vmul.f32 0.044715, %v3334_v46  ;;  %1443 = vmatmul.bf16.gmra.mxu0 %v1218_v47  ;;  %1541 = vmatmul.bf16.gmra.mxu2 %v1218_v47  ;;  %v1069_v61 = vmul.f32 0.7978846, %v1037_v48  ;;  %v909_v48 = vmul.f32 0.5, %v3318_v16 }
 0x173   : > { %v944_v56 = vmul.f32 0.044715, %v3337_v4  ;;  %v1131_v57 = vadd.f32 1.0, %v2535_v50  ;;  %v1070_v59 = vmul.f32 0.7978846, %v1038_v31  ;;  %v2537_v8 = vpop.eup %2536  ;;  %v911_v31 = vmul.f32 0.5, %v3334_v46 }
 0x174   : > { %v975_v60 = vmul.f32 %v943_v54, %v3334_v46  ;;  %v1132_v15 = vadd.f32 1.0, %v2537_v8 }
 0x175   : > { %v976_v62 = vmul.f32 %v944_v56, %v3337_v4  ;;  %v828_v63 = vpop.f32.mrf.mxu2  ;;  %v1163_v3 = vmul.f32 %v1131_v57, %v907_v38  ;;  %2538 = vtanh.f32 %v1070_v59 }
 0x176   : > { %v829_v5 = vadd.f32 %v828_v63, %v3205_v52  ;;  %v877_v6 = vpop.f32.mrf.mxu3  ;;  %v732_v7 = vpop.f32.mrf.mxu0  ;;  %v1007_v1 = vmul.f32 %v975_v60, %v3334_v46  ;;  %2540 = vtanh.f32 %v1069_v61  ;;  %v1164_v34 = vmul.f32 %v1132_v15, %v908_v21 }
 0x177   : > { %v733_v53 = vadd.f32 %v732_v7, %v3199_v41  ;;  %v781_v9 = vpop.f32.mrf.mxu1  ;;  %v1219_v10 = vpack.c.bf16 %v1163_v3, %v1161_v2  ;;  %v1008_v29 = vmul.f32 %v976_v62, %v3337_v4 }
 0x178   : > { %v3350_v11 = vadd.f32 %v877_v6, %v829_v5  ;;  %v1039_v12 = vadd.f32 %v1007_v1, %v3334_v46 }
 0x179   : > { %v3353_v13 = vadd.f32 %v781_v9, %v733_v53  ;;  %1492 = vmatmul.bf16.gmra.mxu1 %v1219_v10  ;;  %1590 = vmatmul.bf16.gmra.mxu3 %v1219_v10  ;;  %v1040_v58 = vadd.f32 %v1008_v29, %v3337_v4 }
 0x17a   : > { %v945_v14 = vmul.f32 0.044715, %v3350_v11  ;;  %v1071_v36 = vmul.f32 0.7978846, %v1039_v12 }
 0x17b   : > { %v2539_v18 = vpop.eup %2538  ;;  %v946_v0 = vmul.f32 0.044715, %v3353_v13  ;;  %v1072_v27 = vmul.f32 0.7978846, %v1040_v58 }
 0x17c   : > { %v977_v22 = vmul.f32 %v945_v14, %v3350_v11  ;;  %v1134_v24 = vadd.f32 1.0, %v2539_v18  ;;  %2542 = vtanh.f32 %v1071_v36  ;;  %v2541_v28 = vpop.eup %2540  ;;  %v912_v14 = vmul.f32 0.5, %v3337_v4 }
 0x17d   : > { %v978_v17 = vmul.f32 %v946_v0, %v3353_v13  ;;  %v830_v26 = vpop.f32.mrf.mxu2  ;;  %v1133_v51 = vadd.f32 1.0, %v2541_v28  ;;  %2544 = vtanh.f32 %v1072_v27  ;;  %v914_v36 = vmul.f32 0.5, %v3353_v13 }
 0x17e   : > { %v831_v30 = vadd.f32 %v830_v26, %v3205_v52  ;;  %v879_v32 = vpop.f32.mrf.mxu3  ;;  %v735_v33 = vpop.f32.mrf.mxu0  ;;  %v1166_v35 = vmul.f32 %v1134_v24, %v910_v23  ;;  %v1009_v37 = vmul.f32 %v977_v22, %v3350_v11 }
 0x17f   : > { %v736_v19 = vadd.f32 %v735_v33, %v3199_v41  ;;  %v784_v39 = vpop.f32.mrf.mxu1  ;;  %v1010_v20 = vmul.f32 %v978_v17, %v3353_v13  ;;  %v1165_v59 = vmul.f32 %v1133_v51, %v909_v48 }
 0x180   : > { %v3366_v40 = vadd.f32 %v879_v32, %v831_v30  ;;  %v1220_v42 = vpack.c.bf16 %v1166_v35, %v1164_v34  ;;  %v1041_v43 = vadd.f32 %v1009_v37, %v3350_v11 }
 0x181   : > { %v3369_v44 = vadd.f32 %v784_v39, %v736_v19  ;;  %v1042_v45 = vadd.f32 %v1010_v20, %v3353_v13 }
 0x182   : > { %v2543_v25 = vpop.eup %2542  ;;  %v947_v47 = vmul.f32 0.044715, %v3366_v40  ;;  %1448 = vmatmul.bf16.gmra.mxu0 %v1220_v42  ;;  %1546 = vmatmul.bf16.gmra.mxu2 %v1220_v42  ;;  %v1073_v56 = vmul.f32 0.7978846, %v1041_v43  ;;  %v913_v43 = vmul.f32 0.5, %v3350_v11 }
 0x183   : > { %v948_v49 = vmul.f32 0.044715, %v3369_v44  ;;  %v1135_v50 = vadd.f32 1.0, %v2543_v25  ;;  %v1074_v54 = vmul.f32 0.7978846, %v1042_v45  ;;  %v2545_v2 = vpop.eup %2544  ;;  %v915_v45 = vmul.f32 0.5, %v3366_v40 }
 0x184   : > { %v979_v55 = vmul.f32 %v947_v47, %v3366_v40  ;;  %v1136_v10 = vadd.f32 1.0, %v2545_v2 }
 0x185   : > { %v980_v38 = vmul.f32 %v948_v49, %v3369_v44  ;;  %v833_v57 = vpop.f32.mrf.mxu2  ;;  %v1167_v60 = vmul.f32 %v1135_v50, %v911_v31  ;;  %2546 = vtanh.f32 %v1074_v54 }
 0x186   : > { %v834_v61 = vadd.f32 %v833_v57, %v3205_v52  ;;  %v882_v62 = vpop.f32.mrf.mxu3  ;;  %v737_v63 = vpop.f32.mrf.mxu0  ;;  %v1011_v16 = vmul.f32 %v979_v55, %v3366_v40  ;;  %2548 = vtanh.f32 %v1073_v56  ;;  %v1168_v27 = vmul.f32 %v1136_v10, %v912_v14 }
 0x187   : > { %v738_v46 = vadd.f32 %v737_v63, %v3199_v41  ;;  %v786_v3 = vpop.f32.mrf.mxu1  ;;  %v1221_v5 = vpack.c.bf16 %v1167_v60, %v1165_v59  ;;  %v1012_v6 = vmul.f32 %v980_v38, %v3369_v44 }
 0x188   : > { %v3382_v7 = vadd.f32 %v882_v62, %v834_v61  ;;  %v1043_v1 = vadd.f32 %v1011_v16, %v3366_v40 }
 0x189   : > { %v3385_v8 = vadd.f32 %v786_v3, %v738_v46  ;;  %1497 = vmatmul.bf16.gmra.mxu1 %v1221_v5  ;;  %1595 = vmatmul.bf16.gmra.mxu3 %v1221_v5  ;;  %v1044_v53 = vadd.f32 %v1012_v6, %v3369_v44 }
 0x18a   : > { %v949_v9 = vmul.f32 0.044715, %v3382_v7  ;;  %v1075_v29 = vmul.f32 0.7978846, %v1043_v1 }
 0x18b   : > { %v2547_v12 = vpop.eup %2546  ;;  %v950_v58 = vmul.f32 0.044715, %v3385_v8  ;;  %v1076_v22 = vmul.f32 0.7978846, %v1044_v53  ;;  %v916_v53 = vmul.f32 0.5, %v3369_v44  ;;  %v918_v10 = vmul.f32 0.5, %v3385_v8 }
 0x18c   : > { %v981_v15 = vmul.f32 %v949_v9, %v3382_v7  ;;  %v1138_v18 = vadd.f32 1.0, %v2547_v12  ;;  %2550 = vtanh.f32 %v1075_v29  ;;  %v2549_v23 = vpop.eup %2548 }
 0x18d   : > { %v982_v0 = vmul.f32 %v950_v58, %v3385_v8  ;;  %v835_v21 = vpop.f32.mrf.mxu2  ;;  %v1137_v19 = vadd.f32 1.0, %v2549_v23  ;;  %2552 = vtanh.f32 %v1076_v22 }
 0x18e   : > { %v836_v24 = vadd.f32 %v835_v21, %v3205_v52  ;;  %v884_v17 = vpop.f32.mrf.mxu3  ;;  %v740_v26 = vpop.f32.mrf.mxu0  ;;  %v1170_v28 = vmul.f32 %v1138_v18, %v914_v36  ;;  %v1013_v30 = vmul.f32 %v981_v15, %v3382_v7 }
 0x18f   : > { %v741_v4 = vadd.f32 %v740_v26, %v3199_v41  ;;  %v789_v32 = vpop.f32.mrf.mxu1  ;;  %v1014_v13 = vmul.f32 %v982_v0, %v3385_v8  ;;  %v1169_v54 = vmul.f32 %v1137_v19, %v913_v43 }
 0x190   : > { %v3398_v33 = vadd.f32 %v884_v17, %v836_v24  ;;  %v1222_v34 = vpack.c.bf16 %v1170_v28, %v1168_v27  ;;  %v1045_v35 = vadd.f32 %v1013_v30, %v3382_v7  ;;  %v917_v30 = vmul.f32 0.5, %v3382_v7 }
 0x191   : > { %v3401_v37 = vadd.f32 %v789_v32, %v741_v4  ;;  %v1046_v39 = vadd.f32 %v1014_v13, %v3385_v8 }
 0x192   : > { %v2551_v20 = vpop.eup %2550  ;;  %v951_v42 = vmul.f32 0.044715, %v3398_v33  ;;  %1453 = vmatmul.bf16.gmra.mxu0 %v1222_v34  ;;  %1551 = vmatmul.bf16.gmra.mxu2 %v1222_v34  ;;  %v1077_v49 = vmul.f32 0.7978846, %v1045_v35 }
 0x193   : > { %v952_v51 = vmul.f32 0.044715, %v3401_v37  ;;  %v1139_v25 = vadd.f32 1.0, %v2551_v20  ;;  %v1078_v47 = vmul.f32 0.7978846, %v1046_v39  ;;  %v2553_v59 = vpop.eup %2552  ;;  %v920_v7 = vmul.f32 0.5, %v3401_v37 }
 0x194   : > { %v983_v48 = vmul.f32 %v951_v42, %v3398_v33  ;;  %v1140_v5 = vadd.f32 1.0, %v2553_v59 }
 0x195   : > { %v984_v31 = vmul.f32 %v952_v51, %v3401_v37  ;;  %v838_v50 = vpop.f32.mrf.mxu2  ;;  %v1171_v55 = vmul.f32 %v1139_v25, %v915_v45  ;;  %2554 = vtanh.f32 %v1078_v47 }
 0x196   : > { %v839_v56 = vadd.f32 %v838_v50, %v3205_v52  ;;  %v887_v38 = vpop.f32.mrf.mxu3  ;;  %v742_v57 = vpop.f32.mrf.mxu0  ;;  %v1015_v11 = vmul.f32 %v983_v48, %v3398_v33  ;;  %2556 = vtanh.f32 %v1077_v49  ;;  %v1172_v18 = vmul.f32 %v1140_v5, %v916_v53 }
 0x197   : > { %v743_v40 = vadd.f32 %v742_v57, %v3199_v41  ;;  %v1223_v60 = vpack.c.bf16 %v1171_v55, %v1169_v54  ;;  %v1016_v61 = vmul.f32 %v984_v31, %v3401_v37  ;;  %v791_v63 = vpop.f32.mrf.mxu1 }
 0x198   : > { %v3414_v62 = vadd.f32 %v887_v38, %v839_v56  ;;  %v1047_v16 = vadd.f32 %v1015_v11, %v3398_v33 }
 0x199   : > { %v792_v2 = vadd.f32 %v791_v63, %v743_v40  ;;  %1502 = vmatmul.bf16.gmra.mxu1 %v1223_v60  ;;  %1600 = vmatmul.bf16.gmra.mxu3 %v1223_v60  ;;  %v1048_v46 = vadd.f32 %v1016_v61, %v3401_v37  ;;  %v1180_v61 = vld [vmem:[#allocation2 + $0xb0] sm:$0xff] }
 0x19a   : > { %v953_v3 = vmul.f32 0.044715, %v3414_v62  ;;  %v1079_v6 = vmul.f32 0.7978846, %v1047_v16  ;;  %v921_v56 = vmul.f32 0.5, %v3414_v62 }
 0x19b   : > { %v2555_v1 = vpop.eup %2554  ;;  %v954_v41 = vmul.f32 0.044715, %v792_v2  ;;  %v1080_v14 = vmul.f32 0.7978846, %v1048_v46 }
 0x19c   : > { %v985_v9 = vmul.f32 %v953_v3, %v3414_v62  ;;  %v1142_v29 = vadd.f32 1.0, %v2555_v1  ;;  %2558 = vtanh.f32 %v1079_v6  ;;  %v2557_v15 = vpop.eup %2556  ;;  %v1181_v3 = vld [vmem:[#allocation2] sm:$0xff] }
 0x19d   : > { %v986_v12 = vmul.f32 %v954_v41, %v792_v2  ;;  %v840_v58 = vpop.f32.mrf.mxu2  ;;  %v1141_v26 = vadd.f32 1.0, %v2557_v15  ;;  %2560 = vtanh.f32 %v1080_v14 }
 0x19e   : > { %v841_v36 = vadd.f32 %v840_v58, %v3205_v52  ;;  %v1174_v0 = vmul.f32 %v1142_v29, %v918_v10  ;;  %v1017_v21 = vmul.f32 %v985_v9, %v3414_v62  ;;  %v889_v22 = vpop.f32.mrf.mxu3  ;;  %v919_v52 = vmul.f32 0.5, %v3398_v33 }
 0x19f   : > { %v1018_v23 = vmul.f32 %v986_v12, %v792_v2  ;;  %v1173_v35 = vmul.f32 %v1141_v26, %v917_v30  ;;  %v922_v33 = vmul.f32 0.5, %v792_v2  ;;  %v1183_v12 = vld [vmem:[#allocation2 + $0x18] sm:$0xff] }
 0x1a0   : > { %v890_v24 = vadd.f32 %v889_v22, %v841_v36  ;;  %v1224_v44 = vpack.c.bf16 %v1174_v0, %v1172_v18  ;;  %v1049_v17 = vadd.f32 %v1017_v21, %v3414_v62  ;;  %v1182_v62 = vld [vmem:[#allocation2 + $0xd8] sm:$0xff]  ;;  %v1184_v36 = vld [vmem:[#allocation2 + $0x50] sm:$0xff] }
 0x1a1   : > { %v1050_v8 = vadd.f32 %v1018_v23, %v792_v2 }
 0x1a2   : > { %v2559_v27 = vpop.eup %2558  ;;  %v955_v28 = vmul.f32 0.044715, %v890_v24  ;;  %1458 = vmatmul.bf16.gmra.mxu0 %v1224_v44  ;;  %1556 = vmatmul.bf16.gmra.mxu2 %v1224_v44  ;;  %v1081_v34 = vmul.f32 0.7978846, %v1049_v17  ;;  %v923_v38 = vmul.f32 0.5, %v890_v24 }
 0x1a3   : > { %v1143_v4 = vadd.f32 1.0, %v2559_v27  ;;  %v1082_v32 = vmul.f32 0.7978846, %v1050_v8  ;;  %v2561_v20 = vpop.eup %2560  ;;  %v1186_v8 = vld [vmem:[#allocation2 + $0x30] sm:$0xff] }
 0x1a4   : > { %v987_v13 = vmul.f32 %v955_v28, %v890_v24  ;;  %v1144_v51 = vadd.f32 1.0, %v2561_v20 }
 0x1a5   : > { %v1175_v19 = vmul.f32 %v1143_v4, %v919_v52  ;;  %2562 = vtanh.f32 %v1082_v32  ;;  %v1187_v32 = vld [vmem:[#allocation2 + $0x48] sm:$0xff] }
 0x1a6   : > { %v1019_v39 = vmul.f32 %v987_v13, %v890_v24  ;;  %2564 = vtanh.f32 %v1081_v34  ;;  %v1176_v49 = vmul.f32 %v1144_v51, %v920_v7 }
 0x1a7   : > { %v1225_v42 = vpack.c.bf16 %v1175_v19, %v1173_v35  ;;  %v1188_v19 = vld [vmem:[#allocation2 + $0x80] sm:$0xff] }
 0x1a8   : > { %v1051_v43 = vadd.f32 %v1019_v39, %v890_v24  ;;  %v1185_v24 = vld [vmem:[#allocation2 + $0x68] sm:$0xff] }
 0x1a9   : > { %1507 = vmatmul.bf16.gmra.mxu1 %v1225_v42  ;;  %1605 = vmatmul.bf16.gmra.mxu3 %v1225_v42 }
 0x1aa   : > { %v1083_v45 = vmul.f32 0.7978846, %v1051_v43 }
 0x1ab   : > { %v2563_v25 = vpop.eup %2562 }
 0x1ac   : > { %v1146_v47 = vadd.f32 1.0, %v2563_v25  ;;  %2566 = vtanh.f32 %v1083_v45  ;;  %v2565_v48 = vpop.eup %2564  ;;  %v1189_v45 = vld [vmem:[#allocation2 + $0x88] sm:$0xff] }
 0x1ad   : > { %v1145_v54 = vadd.f32 1.0, %v2565_v48 }
 0x1ae   : > { %v1178_v31 = vmul.f32 %v1146_v47, %v922_v33  ;;  %v1190_v47 = vld [vmem:[#allocation2 + $0xe8] sm:$0xff] }
 0x1af   : > { %v1177_v11 = vmul.f32 %v1145_v54, %v921_v56 }
 0x1b0   : > { %v1226_v50 = vpack.c.bf16 %v1178_v31, %v1176_v49 }
 0x1b2   : > { %v2567_v55 = vpop.eup %2566  ;;  %1463 = vmatmul.bf16.gmra.mxu0 %v1226_v50  ;;  %1561 = vmatmul.bf16.gmra.mxu2 %v1226_v50 }
 0x1b3   : > { %v1147_v57 = vadd.f32 1.0, %v2567_v55  ;;  %v1191_v55 = vld [vmem:[#allocation2 + $0xb8] sm:$0xff] }
 0x1b5   : > { %v1179_v59 = vmul.f32 %v1147_v57, %v923_v38 }
 0x1b7   : > { %v1227_v40 = vpack.c.bf16 %v1179_v59, %v1177_v11  ;;  %v1192_v11 = vld [vmem:[#allocation2 + $0x60] sm:$0xff] }
 0x1b9   : > { %1512 = vmatmul.bf16.gmra.mxu1 %v1227_v40  ;;  %1610 = vmatmul.bf16.gmra.mxu3 %v1227_v40 }
 0x1bf   : > { %v1429_v37 = vpop.f32.mrf.mxu0 }
 0x1c5   : > { %v1527_v60 = vpop.f32.mrf.mxu2 }
 0x1c6   : > { %v1478_v63 = vpop.f32.mrf.mxu1 }
 0x1c7   : > { %v1479_v16 = vadd.f32 %v1478_v63, %v1429_v37  ;;  %v1431_v2 = vpop.f32.mrf.mxu0  ;;  %v1193_v63 = vld [vmem:[#allocation2 + $0xf0] sm:$0xff] }
 0x1c9   : > { %v1616_v46 = vadd.f32 %v1479_v16, %v1180_v61 }
 0x1cb   : > { %1648 = vst [vmem:[#allocation2 + $0xb0] sm:$0xff] %v1616_v46 }
 0x1cc   : > { %v1576_v5 = vpop.f32.mrf.mxu3 }
 0x1cd   : > { %v1577_v6 = vadd.f32 %v1576_v5, %v1527_v60  ;;  %v1529_v1 = vpop.f32.mrf.mxu2 }
 0x1ce   : > { %v1480_v41 = vpop.f32.mrf.mxu1 }
 0x1cf   : > { %v1617_v53 = vadd.f32 %v1577_v6, %v1181_v3  ;;  %v1481_v9 = vadd.f32 %v1480_v41, %v1431_v2  ;;  %v1434_v10 = vpop.f32.mrf.mxu0  ;;  %v1194_v3 = vld [vmem:[#allocation2 + $0x8] sm:$0xff] }
 0x1d1   : > { %1649 = vst [vmem:[#allocation2] sm:$0xff] %v1617_v53  ;;  %v1618_v29 = vadd.f32 %v1481_v9, %v1182_v62  ;;  %v1195_v53 = vld [vmem:[#allocation2 + $0x78] sm:$0xff] }
 0x1d3   : > { %1650 = vst [vmem:[#allocation2 + $0xd8] sm:$0xff] %v1618_v29 }
 0x1d4   : > { %v1578_v58 = vpop.f32.mrf.mxu3 }
 0x1d5   : > { %v1579_v14 = vadd.f32 %v1578_v58, %v1529_v1  ;;  %v1532_v15 = vpop.f32.mrf.mxu2 }
 0x1d6   : > { %v1483_v18 = vpop.f32.mrf.mxu1 }
 0x1d7   : > { %v1619_v0 = vadd.f32 %v1579_v14, %v1183_v12  ;;  %v1484_v21 = vadd.f32 %v1483_v18, %v1434_v10  ;;  %v1436_v22 = vpop.f32.mrf.mxu0  ;;  %v1196_v12 = vld [vmem:[#allocation2 + $0x38] sm:$0xff] }
 0x1d9   : > { %1651 = vst [vmem:[#allocation2 + $0x18] sm:$0xff] %v1619_v0  ;;  %v1620_v23 = vadd.f32 %v1484_v21, %v1184_v36  ;;  %v1197_v0 = vld [vmem:[#allocation2 + $0x58] sm:$0xff] }
 0x1db   : > { %1652 = vst [vmem:[#allocation2 + $0x50] sm:$0xff] %v1620_v23 }
 0x1dc   : > { %v1581_v44 = vpop.f32.mrf.mxu3 }
 0x1dd   : > { %v1582_v17 = vadd.f32 %v1581_v44, %v1532_v15  ;;  %v1534_v26 = vpop.f32.mrf.mxu2 }
 0x1de   : > { %v1485_v27 = vpop.f32.mrf.mxu1 }
 0x1df   : > { %v1621_v28 = vadd.f32 %v1582_v17, %v1185_v24  ;;  %v1486_v30 = vadd.f32 %v1485_v27, %v1436_v22  ;;  %v1439_v52 = vpop.f32.mrf.mxu0  ;;  %v1198_v24 = vld [vmem:[#allocation2 + $0x40] sm:$0xff] }
 0x1e1   : > { %1653 = vst [vmem:[#allocation2 + $0x68] sm:$0xff] %v1621_v28  ;;  %v1622_v4 = vadd.f32 %v1486_v30, %v1186_v8  ;;  %v1199_v28 = vld [vmem:[#allocation2 + $0xc8] sm:$0xff] }
 0x1e3   : > { %1654 = vst [vmem:[#allocation2 + $0x30] sm:$0xff] %v1622_v4 }
 0x1e4   : > { %v1583_v13 = vpop.f32.mrf.mxu3 }
 0x1e5   : > { %v1584_v34 = vadd.f32 %v1583_v13, %v1534_v26  ;;  %v1537_v35 = vpop.f32.mrf.mxu2 }
 0x1e6   : > { %v1488_v39 = vpop.f32.mrf.mxu1 }
 0x1e7   : > { %v1623_v20 = vadd.f32 %v1584_v34, %v1187_v32  ;;  %v1489_v42 = vadd.f32 %v1488_v39, %v1439_v52  ;;  %v1441_v43 = vpop.f32.mrf.mxu0  ;;  %v1200_v32 = vld [vmem:[#allocation2 + $0xe0] sm:$0xff] }
 0x1e9   : > { %1655 = vst [vmem:[#allocation2 + $0x48] sm:$0xff] %v1623_v20  ;;  %v1624_v51 = vadd.f32 %v1489_v42, %v1188_v19  ;;  %v1201_v20 = vld [vmem:[#allocation2 + $0x90] sm:$0xff] }
 0x1eb   : > { %1656 = vst [vmem:[#allocation2 + $0x80] sm:$0xff] %v1624_v51 }
 0x1ec   : > { %v1586_v25 = vpop.f32.mrf.mxu3 }
 0x1ed   : > { %v1587_v7 = vadd.f32 %v1586_v25, %v1537_v35  ;;  %v1539_v33 = vpop.f32.mrf.mxu2 }
 0x1ee   : > { %v1490_v48 = vpop.f32.mrf.mxu1 }
 0x1ef   : > { %v1625_v49 = vadd.f32 %v1587_v7, %v1189_v45  ;;  %v1491_v31 = vadd.f32 %v1490_v48, %v1441_v43  ;;  %v1444_v50 = vpop.f32.mrf.mxu0  ;;  %v1202_v45 = vld [vmem:[#allocation2 + $0x70] sm:$0xff] }
 0x1f1   : > { %1657 = vst [vmem:[#allocation2 + $0x88] sm:$0xff] %v1625_v49  ;;  %v1626_v54 = vadd.f32 %v1491_v31, %v1190_v47  ;;  %v1203_v49 = vld [vmem:[#allocation2 + $0xc0] sm:$0xff] }
 0x1f3   : > { %1658 = vst [vmem:[#allocation2 + $0xe8] sm:$0xff] %v1626_v54  ;;  %v1204_v54 = vld [vmem:[#allocation2 + $0xa8] sm:$0xff] }
 0x1f4   : > { %v1588_v56 = vpop.f32.mrf.mxu3 }
 0x1f5   : > { %v1589_v38 = vadd.f32 %v1588_v56, %v1539_v33  ;;  %v1542_v57 = vpop.f32.mrf.mxu2 }
 0x1f6   : > { %v1493_v59 = vpop.f32.mrf.mxu1 }
 0x1f7   : > { %v1627_v40 = vadd.f32 %v1589_v38, %v1191_v55  ;;  %v1494_v37 = vadd.f32 %v1493_v59, %v1444_v50  ;;  %v1446_v60 = vpop.f32.mrf.mxu0 }
 0x1f9   : > { %1659 = vst [vmem:[#allocation2 + $0xb8] sm:$0xff] %v1627_v40  ;;  %v1628_v61 = vadd.f32 %v1494_v37, %v1192_v11  ;;  %v1205_v40 = vld [vmem:[#allocation2 + $0xd0] sm:$0xff] }
 0x1fb   : > { %1660 = vst [vmem:[#allocation2 + $0x60] sm:$0xff] %v1628_v61  ;;  %v1206_v61 = vld [vmem:[#allocation2 + $0x10] sm:$0xff] }
 0x1fc   : > { %v1591_v16 = vpop.f32.mrf.mxu3 }
 0x1fd   : > { %v1592_v2 = vadd.f32 %v1591_v16, %v1542_v57  ;;  %v1544_v46 = vpop.f32.mrf.mxu2 }
 0x1fe   : > { %v1495_v5 = vpop.f32.mrf.mxu1 }
 0x1ff   : > { %v1629_v6 = vadd.f32 %v1592_v2, %v1193_v63  ;;  %v1496_v1 = vadd.f32 %v1495_v5, %v1446_v60  ;;  %v1449_v62 = vpop.f32.mrf.mxu0 }
 0x201   : > { %1661 = vst [vmem:[#allocation2 + $0xf0] sm:$0xff] %v1629_v6  ;;  %v1630_v41 = vadd.f32 %v1496_v1, %v1194_v3  ;;  %v1207_v6 = vld [vmem:[#allocation2 + $0x28] sm:$0xff] }
 0x203   : > { %1662 = vst [vmem:[#allocation2 + $0x8] sm:$0xff] %v1630_v41  ;;  %v1208_v41 = vld [vmem:[#allocation2 + $0xa0] sm:$0xff] }
 0x204   : > { %v1593_v9 = vpop.f32.mrf.mxu3 }
 0x205   : > { %v1594_v10 = vadd.f32 %v1593_v9, %v1544_v46  ;;  %v1547_v29 = vpop.f32.mrf.mxu2 }
 0x206   : > { %v1498_v58 = vpop.f32.mrf.mxu1 }
 0x207   : > { %v1631_v14 = vadd.f32 %v1594_v10, %v1195_v53  ;;  %v1499_v15 = vadd.f32 %v1498_v58, %v1449_v62  ;;  %v1451_v36 = vpop.f32.mrf.mxu0  ;;  %v1209_v58 = vld [vmem:[#allocation2 + $0xf8] sm:$0xff] }
 0x209   : > { %1663 = vst [vmem:[#allocation2 + $0x78] sm:$0xff] %v1631_v14  ;;  %v1632_v18 = vadd.f32 %v1499_v15, %v1196_v12 }
 0x20b   : > { %1664 = vst [vmem:[#allocation2 + $0x38] sm:$0xff] %v1632_v18  ;;  %v1210_v18 = vld [vmem:[#allocation2 + $0x20] sm:$0xff] }
 0x20c   : > { %v1596_v21 = vpop.f32.mrf.mxu3 }
 0x20d   : > { %v1597_v22 = vadd.f32 %v1596_v21, %v1547_v29  ;;  %v1549_v23 = vpop.f32.mrf.mxu2 }
 0x20e   : > { %v1500_v44 = vpop.f32.mrf.mxu1 }
 0x20f   : > { %v1633_v17 = vadd.f32 %v1597_v22, %v1197_v0  ;;  %v1501_v26 = vadd.f32 %v1500_v44, %v1451_v36  ;;  %v1454_v8 = vpop.f32.mrf.mxu0  ;;  %v1211_v44 = vld [vmem:[#allocation2 + $0x98] sm:$0xff] }
 0x211   : > { %1665 = vst [vmem:[#allocation2 + $0x58] sm:$0xff] %v1633_v17  ;;  %v1634_v27 = vadd.f32 %v1501_v26, %v1198_v24 }
 0x213   : > { %1666 = vst [vmem:[#allocation2 + $0x40] sm:$0xff] %v1634_v27 }
 0x214   : > { %v1598_v30 = vpop.f32.mrf.mxu3 }
 0x215   : > { %v1599_v52 = vadd.f32 %v1598_v30, %v1549_v23  ;;  %v1552_v4 = vpop.f32.mrf.mxu2 }
 0x216   : > { %v1503_v13 = vpop.f32.mrf.mxu1 }
 0x217   : > { %v1635_v34 = vadd.f32 %v1599_v52, %v1199_v28  ;;  %v1504_v35 = vadd.f32 %v1503_v13, %v1454_v8  ;;  %v1456_v19 = vpop.f32.mrf.mxu0 }
 0x219   : > { %1667 = vst [vmem:[#allocation2 + $0xc8] sm:$0xff] %v1635_v34  ;;  %v1636_v39 = vadd.f32 %v1504_v35, %v1200_v32 }
 0x21b   : > { %1668 = vst [vmem:[#allocation2 + $0xe0] sm:$0xff] %v1636_v39 }
 0x21c   : > { %v1601_v42 = vpop.f32.mrf.mxu3 }
 0x21d   : > { %v1602_v43 = vadd.f32 %v1601_v42, %v1552_v4  ;;  %v1554_v51 = vpop.f32.mrf.mxu2 }
 0x21e   : > { %v1505_v25 = vpop.f32.mrf.mxu1 }
 0x21f   : > { %v1637_v7 = vadd.f32 %v1602_v43, %v1201_v20  ;;  %v1506_v33 = vadd.f32 %v1505_v25, %v1456_v19  ;;  %v1459_v47 = vpop.f32.mrf.mxu0 }
 0x221   : > { %1669 = vst [vmem:[#allocation2 + $0x90] sm:$0xff] %v1637_v7  ;;  %v1638_v48 = vadd.f32 %v1506_v33, %v1202_v45 }
 0x223   : > { %1670 = vst [vmem:[#allocation2 + $0x70] sm:$0xff] %v1638_v48 }
 0x224   : > { %v1603_v31 = vpop.f32.mrf.mxu3 }
 0x225   : > { %v1604_v50 = vadd.f32 %v1603_v31, %v1554_v51  ;;  %v1557_v56 = vpop.f32.mrf.mxu2 }
 0x226   : > { %v1508_v55 = vpop.f32.mrf.mxu1 }
 0x227   : > { %v1639_v38 = vadd.f32 %v1604_v50, %v1203_v49  ;;  %v1509_v57 = vadd.f32 %v1508_v55, %v1459_v47  ;;  %v1461_v59 = vpop.f32.mrf.mxu0 }
 0x229   : > { %1671 = vst [vmem:[#allocation2 + $0xc0] sm:$0xff] %v1639_v38  ;;  %v1640_v11 = vadd.f32 %v1509_v57, %v1204_v54 }
 0x22b   : > { %1672 = vst [vmem:[#allocation2 + $0xa8] sm:$0xff] %v1640_v11 }
 0x22c   : > { %v1606_v37 = vpop.f32.mrf.mxu3 }
 0x22d   : > { %v1607_v60 = vadd.f32 %v1606_v37, %v1557_v56  ;;  %v1559_v46 = vpop.f32.mrf.mxu2 }
 0x22e   : > { %v1510_v63 = vpop.f32.mrf.mxu1 }
 0x22f   : > { %v1641_v16 = vadd.f32 %v1607_v60, %v1205_v40  ;;  %v1511_v2 = vadd.f32 %v1510_v63, %v1461_v59  ;;  %v1464_v5 = vpop.f32.mrf.mxu0 }
 0x231   : > { %1673 = vst [vmem:[#allocation2 + $0xd0] sm:$0xff] %v1641_v16  ;;  %v1642_v3 = vadd.f32 %v1511_v2, %v1206_v61 }
 0x233   : > { %1674 = vst [vmem:[#allocation2 + $0x10] sm:$0xff] %v1642_v3 }
 0x234   : > { %v1608_v1 = vpop.f32.mrf.mxu3 }
 0x235   : > { %v1609_v62 = vadd.f32 %v1608_v1, %v1559_v46  ;;  %v1562_v12 = vpop.f32.mrf.mxu2 }
 0x236   : > { %v1513_v53 = vpop.f32.mrf.mxu1 }
 0x237   : > { %v1643_v9 = vadd.f32 %v1609_v62, %v1207_v6  ;;  %v1514_v10 = vadd.f32 %v1513_v53, %v1464_v5  ;;  %v1466_v36 = vpop.f32.mrf.mxu0 }
 0x239   : > { %1675 = vst [vmem:[#allocation2 + $0x28] sm:$0xff] %v1643_v9  ;;  %v1644_v29 = vadd.f32 %v1514_v10, %v1208_v41 }
 0x23b   : > { %1676 = vst [vmem:[#allocation2 + $0xa0] sm:$0xff] %v1644_v29 }
 0x23c   : > { %v1611_v14 = vpop.f32.mrf.mxu3 }
 0x23d   : > { %v1612_v15 = vadd.f32 %v1611_v14, %v1562_v12  ;;  %v1564_v24 = vpop.f32.mrf.mxu2 }
 0x23e   : > { %v1515_v0 = vpop.f32.mrf.mxu1 }
 0x23f   : > { %v1645_v21 = vadd.f32 %v1612_v15, %v1209_v58  ;;  %v1516_v22 = vadd.f32 %v1515_v0, %v1466_v36 }
 0x241   : > { %1677 = vst [vmem:[#allocation2 + $0xf8] sm:$0xff] %v1645_v21  ;;  %v1646_v23 = vadd.f32 %v1516_v22, %v1210_v18 }
 0x243   : > { %1678 = vst [vmem:[#allocation2 + $0x20] sm:$0xff] %v1646_v23 }
 0x244   : > { %v1613_v17 = vpop.f32.mrf.mxu3 }
 0x245   : > { %v1614_v26 = vadd.f32 %v1613_v17, %v1564_v24  ;;  %1683 = sbr.rel (%p2286_p11) target bundleno = 610 (0x262), region = 64 }
 0x247   : > { %v1647_v8 = vadd.f32 %v1614_v26, %v1211_v44 }
 0x249   : > { %1679 = vst [vmem:[#allocation2 + $0x98] sm:$0xff] %v1647_v8 }
 0x24a   : > { %v1684_v27 = vld [vmem:[#allocation2 + $0xb0] sm:$0xff]  ;;  %v1685_v28 = vld [vmem:[#allocation2] sm:$0xff]  ;;  %v1686_v32 = vld [vmem:[#allocation2 + $0xd8] sm:$0xff] }
 0x24b   : > { %v1716_v30 = vld [vmem:[%s3594_s28] sm:$0x3]  ;;  %v1687_v13 = vld [vmem:[#allocation2 + $0x18] sm:$0xff]  ;;  %v1688_v34 = vld [vmem:[#allocation2 + $0x50] sm:$0xff] }
 0x24c   : > { %v3433_v52 = vperm.slane %v1716_v30, 0  ;;  %v3435_v4 = vperm.slane %v1716_v30, 1  ;;  %v1689_v35 = vld [vmem:[#allocation2 + $0x68] sm:$0xff]  ;;  %v1690_v19 = vld [vmem:[#allocation2 + $0x30] sm:$0xff]  ;;  %v1692_v45 = vld [vmem:[#allocation2 + $0x80] sm:$0xff] }
 0x24d   : > { %v1691_v39 = vld [vmem:[#allocation2 + $0x48] sm:$0xff]  ;;  %v1695_v31 = vld [vmem:[#allocation2 + $0xb8] sm:$0xff]  ;;  %v1696_v50 = vld [vmem:[#allocation2 + $0x60] sm:$0xff] }
 0x24e   : > { %v1722_v20 = vadd.f32 %v3433_v52, %v1684_v27  ;;  %v1723_v42 = vadd.f32 %v3435_v4, %v1685_v28  ;;  %v1724_v43 = vadd.f32 %v3433_v52, %v1686_v32  ;;  %v1725_v51 = vadd.f32 %v3435_v4, %v1687_v13  ;;  %v1693_v25 = vld [vmem:[#allocation2 + $0x88] sm:$0xff]  ;;  %v1697_v54 = vld [vmem:[#allocation2 + $0xf0] sm:$0xff]  ;;  %v1699_v59 = vld [vmem:[#allocation2 + $0x78] sm:$0xff] }
 0x24f   : > { %v1694_v7 = vld [vmem:[#allocation2 + $0xe8] sm:$0xff]  ;;  %v1726_v33 = vadd.f32 %v3433_v52, %v1688_v34  ;;  %v1727_v47 = vadd.f32 %v3435_v4, %v1689_v35  ;;  %v1728_v48 = vadd.f32 %v3433_v52, %v1690_v19  ;;  %v1729_v49 = vadd.f32 %v3435_v4, %v1691_v39  ;;  %v1700_v40 = vld [vmem:[#allocation2 + $0x38] sm:$0xff]  ;;  %v1702_v2 = vld [vmem:[#allocation2 + $0x40] sm:$0xff] }
 0x250   : > { %v1754_v55 = vpack.c.bf16 %v1723_v42, %v1722_v20  ;;  %v1755_v56 = vpack.c.bf16 %v1725_v51, %v1724_v43  ;;  %v1730_v38 = vadd.f32 %v3433_v52, %v1692_v45  ;;  %v1731_v57 = vadd.f32 %v3435_v4, %v1693_v25  ;;  %v1698_v11 = vld [vmem:[#allocation2 + $0x8] sm:$0xff]  ;;  %v1701_v16 = vld [vmem:[#allocation2 + $0x58] sm:$0xff]  ;;  %v1704_v62 = vld [vmem:[#allocation2 + $0xe0] sm:$0xff] }
 0x251   : > { %v1756_v37 = vpack.c.bf16 %v1727_v47, %v1726_v33  ;;  %v1757_v60 = vpack.c.bf16 %v1729_v49, %v1728_v48  ;;  %v1732_v61 = vadd.f32 %v3433_v52, %v1694_v7  ;;  %v1733_v63 = vadd.f32 %v3435_v4, %v1695_v31  ;;  %v1703_v46 = vld [vmem:[#allocation2 + $0xc8] sm:$0xff]  ;;  %v1705_v41 = vld [vmem:[#allocation2 + $0x90] sm:$0xff]  ;;  %v1707_v58 = vld [vmem:[#allocation2 + $0xc0] sm:$0xff] }
 0x252   : > { %1770 = vst [vmem:[%s3072_s20] sm:$0xff] %v1754_v55  ;;  %v1758_v3 = vpack.c.bf16 %v1731_v57, %v1730_v38  ;;  %v1734_v5 = vadd.f32 %v3433_v52, %v1696_v50  ;;  %v1735_v6 = vadd.f32 %v3435_v4, %v1697_v54  ;;  %v1736_v1 = vadd.f32 %v3433_v52, %v1698_v11  ;;  %v1706_v53 = vld [vmem:[#allocation2 + $0x70] sm:$0xff]  ;;  %v1708_v14 = vld [vmem:[#allocation2 + $0xa8] sm:$0xff]  ;;  %v1712_v26 = vld [vmem:[#allocation2 + $0xa0] sm:$0xff] }
 0x253   : > { %1771 = vst [vmem:[%s3072_s20 + $0x8] sm:$0xff] %v1755_v56  ;;  %v1759_v9 = vpack.c.bf16 %v1733_v63, %v1732_v61  ;;  %v1737_v10 = vadd.f32 %v3435_v4, %v1699_v59  ;;  %v1738_v29 = vadd.f32 %v3433_v52, %v1700_v40  ;;  %v1739_v12 = vadd.f32 %v3435_v4, %v1701_v16  ;;  %v1709_v15 = vld [vmem:[#allocation2 + $0xd0] sm:$0xff]  ;;  %v1711_v23 = vld [vmem:[#allocation2 + $0x28] sm:$0xff]  ;;  %v1713_v8 = vld [vmem:[#allocation2 + $0xf8] sm:$0xff] }
 0x254   : > { %1772 = vst [vmem:[%s3072_s20 + $0x10] sm:$0xff] %v1756_v37  ;;  %v1760_v36 = vpack.c.bf16 %v1735_v6, %v1734_v5  ;;  %v1740_v18 = vadd.f32 %v3433_v52, %v1702_v2  ;;  %v1741_v0 = vadd.f32 %v3435_v4, %v1703_v46  ;;  %v1742_v21 = vadd.f32 %v3433_v52, %v1704_v62  ;;  %v1710_v22 = vld [vmem:[#allocation2 + $0x10] sm:$0xff]  ;;  %v1714_v13 = vld [vmem:[#allocation2 + $0x20] sm:$0xff]  ;;  %v1715_v34 = vld [vmem:[#allocation2 + $0x98] sm:$0xff] }
 0x255   : > { %1773 = vst [vmem:[%s3072_s20 + $0x18] sm:$0xff] %v1757_v60  ;;  %v1761_v24 = vpack.c.bf16 %v1737_v10, %v1736_v1  ;;  %v1743_v44 = vadd.f32 %v3435_v4, %v1705_v41  ;;  %v1744_v17 = vadd.f32 %v3433_v52, %v1706_v53  ;;  %v1762_v27 = vpack.c.bf16 %v1739_v12, %v1738_v29 }
 0x256   : > { %1774 = vst [vmem:[%s3072_s20 + $0x20] sm:$0xff] %v1758_v3  ;;  %v1745_v28 = vadd.f32 %v3435_v4, %v1707_v58  ;;  %v1746_v30 = vadd.f32 %v3433_v52, %v1708_v14  ;;  %v1747_v32 = vadd.f32 %v3435_v4, %v1709_v15  ;;  %v1763_v35 = vpack.c.bf16 %v1741_v0, %v1740_v18 }
 0x257   : > { %1775 = vst [vmem:[%s3072_s20 + $0x28] sm:$0xff] %v1759_v9  ;;  %v1748_v19 = vadd.f32 %v3433_v52, %v1710_v22  ;;  %v1749_v39 = vadd.f32 %v3435_v4, %v1711_v23  ;;  %v1764_v20 = vpack.c.bf16 %v1743_v44, %v1742_v21  ;;  %v1750_v42 = vadd.f32 %v3433_v52, %v1712_v26 }
 0x258   : > { %1776 = vst [vmem:[%s3072_s20 + $0x30] sm:$0xff] %v1760_v36  ;;  %v1751_v43 = vadd.f32 %v3435_v4, %v1713_v8  ;;  %v1765_v51 = vpack.c.bf16 %v1745_v28, %v1744_v17  ;;  %v1752_v45 = vadd.f32 %v3433_v52, %v1714_v13  ;;  %v1753_v25 = vadd.f32 %v3435_v4, %v1715_v34 }
 0x259   : > { %1777 = vst [vmem:[%s3072_s20 + $0x38] sm:$0xff] %v1761_v24  ;;  %v1766_v7 = vpack.c.bf16 %v1747_v32, %v1746_v30  ;;  %v1767_v33 = vpack.c.bf16 %v1749_v39, %v1748_v19 }
 0x25a   : > { %1778 = vst [vmem:[%s3072_s20 + $0x40] sm:$0xff] %v1762_v27  ;;  %v1768_v47 = vpack.c.bf16 %v1751_v43, %v1750_v42  ;;  %v1769_v48 = vpack.c.bf16 %v1753_v25, %v1752_v45 }
 0x25b   : > { %1779 = vst [vmem:[%s3072_s20 + $0x48] sm:$0xff] %v1763_v35 }
 0x25c   : > { %1780 = vst [vmem:[%s3072_s20 + $0x50] sm:$0xff] %v1764_v20 }
 0x25d   : > { %1781 = vst [vmem:[%s3072_s20 + $0x58] sm:$0xff] %v1765_v51 }
 0x25e   : > { %1782 = vst [vmem:[%s3072_s20 + $0x60] sm:$0xff] %v1766_v7 }
 0x25f   : > { %1783 = vst [vmem:[%s3072_s20 + $0x68] sm:$0xff] %v1767_v33 }
 0x260   : > { %1784 = vst [vmem:[%s3072_s20 + $0x70] sm:$0xff] %v1768_v47 }
 0x261   : > { %1785 = vst [vmem:[%s3072_s20 + $0x78] sm:$0xff] %v1769_v48 }
 0x262 PF: > { %s3595_s24 = sld [smem:[#allocation19_spill]]  ;;  %s1800_s18 = sshll.u32 %s3072_s20, 4  ;;  %s1801_s18 = int_to_ptr.vmem [resolvable:$true] %s1800_s18 }
 0x263   : > { %s3597_s9 = sld [smem:[#allocation30_spill]]  ;;  %s1787_s15 = scalar_lea.sflag [#allocation5], %s359_s16 }
 0x268   : > { %s3596_s4 = sshll.u32 %s3595_s24, 7 }
 0x269   : > { %s1799_s17 = scalar_lea.hbm %s3597_s9, %s3596_s4  ;;  %s2708_s13 = scalar_lea.hbm %s3597_s9, 256 }
 0x26a   : > { %s1802_s12 = sshll.u32 %s1799_s17, 4  ;;  %s1803_s12 = int_to_ptr.hbm [resolvable:$true] %s1802_s12 }
 0x26b   : > { %s2702_s21 = sshra.s32 %s1803_s12, 4  ;;  %s2703_s21 = int_to_ptr.hbm [resolvable:$true] %s2702_s21 }
 0x26c   : > { %s2704_s30 = scalar_lea.hbm %s2703_s21, 128  ;;  %p2709_p10 = scmp.lt.s32.totalorder %s2703_s21, %s3597_s9 }
 0x26d   : > { %p2705_p1 = scmp.ne.s32.totalorder %s2703_s21, %s2704_s30  ;;  %p2710_p12 = scmp.lt.s32.totalorder %s2708_s13, %s2704_s30 }
 0x26f   : > { %p2706_p5 = pnand %p2705_p1, %p2985_p3  ;;  %p2711_p13 = por %p2710_p12, %p2709_p10 }
 0x271   : > { %p2707_p8 = pneg %p2706_p5 }
 0x273   : > { %p2712_p0 = pnand %p2711_p13, %p2707_p8 }
 0x275   : > { %2715 = shalt.err (!%p2712_p0)
}
 0x276   : > { %s2824_s1 = smov 128   ;;  %s2825_s8 = smov 8  }
 0x277   : > { %2388 = dma.vmem_to_hbm [thread:$0]  (%p2985_p3), %s1801_s18, 2048, %s1803_s12, %s1787_s15, %s2824_s1, %s2824_s1, %s2825_s8  }
 0x278 PF: > { %s3599_s16 = sld [smem:[#allocation21_spill]] }
 0x279   : > { %s3600_s27 = sld [smem:[#allocation17_spill]] }
 0x27a   : > { %s3601_s20 = sld [smem:[#allocation27_spill]] }
 0x27e   : > { %p2409_p2 = scmp.ge.s32.totalorder %s3599_s16, 2 }
 0x27f   : > { %s1817_s6 = sand.u32 1, %s3600_s27  }
 0x280   : > { %p3602_p4 = scmp.ne.s32.totalorder %s3601_s20, 0  ;;  %s1818_s23 = scalar_lea.sflag [#allocation5], %s1817_s6 }
 0x282   : > { %p2405_p6 = pnand %p2409_p2, %p3602_p4 }
 0x284   : > { %p2406_p9 = pneg %p2405_p6 }
 0x286   : > { %2773 = dma.done.wait (%p2406_p9), %s1818_s23, 2048  }
 0x287   : > { %2775 = vsyncadd (%p2406_p9), %s1818_s23, 4294965248  ;;  %s25_s28 = sadd.s32 1, %s3599_s16   ;;  %s3603_s24 = sld [smem:[#allocation16_spill]] }
 0x288   : > { %p22_p7 = scmp.ge.s32.totalorder %s25_s28, 10   ;;  %s3604_s20 = sld [smem:[#allocation24_spill]] }
 0x289   : > { %s3605_s4 = sld [smem:[#allocation18_spill]]  ;;  %s3610_s18 = smov %s2782_s19 }
 0x28a   : > { %s3606_s23 = sld [smem:[#allocation25_spill]]  ;;  %s3612_s21 = smov %s2794_s22 }
 0x28b   : > { %s3607_s25 = sld [smem:[#allocation20_spill]] }
 0x28c   : > { %s3608_s5 = sld [smem:[#allocation22_spill]] }
 0x28d   : > { %s3609_s27 = sld [smem:[#allocation23_spill]]  ;;  %s3611_s19 = smov %s3603_s24 }
 0x28e   : > { %s3614_s24 = smov %s2810_s26  ;;  %24 = sbr.rel (!%p22_p7) target bundleno = 16 (0x10), region = 123 }
 0x28f   : > { %s3613_s22 = smov %s3605_s4 }
 0x292   : > { %s3615_s26 = smov %s3608_s5 }
 0x293   :  { %1824 = vsyncpa [#allocation4], 1 }
 0x294   :  { %1826 = vsyncpa [#allocation4 + $0x1], 1 }
 0x295   :  { %1827 = vsyncpa [#allocation7], 1 }
 0x296   :  { %1829 = vsyncpa [#allocation7 + $0x1], 1 }
 0x297   :  { %1830 = vsyncpa [#allocation10], 1 }
 0x298   :  { %1832 = vsyncpa [#allocation10 + $0x1], 1 }
 0x299   :  { %1833 = vsyncpa [#allocation5], 1 }
 0x29a   :  { %1835 = vsyncpa [#allocation5 + $0x1], 1 }

// kernel: tpu_custom_call.1
= control target key start
LH: loop header
LB: loop body
LE: loop exit
PB: predicated region body
PF: predicated region fallthrough
CT: control target
= control target key end

     0   :  { %s3611_s0 = inlined_call_operand.hbm [shape: bf16[256,256], index: 0, kind: input, shape index: {}]   ;;  %s3612_s1 = inlined_call_operand.hbm [shape: bf16[4,256,256], index: 1, kind: input, shape index: {}]   ;;  %s3613_s2 = inlined_call_operand.hbm [shape: f32[1,1024], index: 2, kind: input, shape index: {}]   ;;  %s3614_s3 = inlined_call_operand.hbm [shape: bf16[1024,256], index: 3, kind: input, shape index: {}]   ;;  %s3615_s4 = inlined_call_operand.vmem [shape: f32[1,256], index: 4, kind: input, shape index: {}]   ;;  %s3616_s5 = inlined_call_operand.hbm [shape: bf16[256,256], index: 5, kind: output, shape index: {}]  }
   0x1   :  { %3635 = sst [smem:[#allocation28_spill]] %s3611_s0 }
   0x2   :  { %3636 = sst [smem:[#allocation29_spill]] %s3612_s1 }
   0x3   :  { %3637 = sst [smem:[#allocation30_spill]] %s3613_s2 }
   0x4   :  { %3638 = sst [smem:[#allocation31_spill]] %s3615_s4 }
   0x5   :  { %3639 = sst [smem:[#allocation32_spill]] %s3616_s5 }
   0x6   :  { %10 = vsyncpa [#allocation4], 0 }
   0x7   :  { %12 = vsyncpa [#allocation4 + $0x1], 0 }
   0x8   :  { %13 = vsyncpa [#allocation7], 0 }
   0x9   :  { %15 = vsyncpa [#allocation7 + $0x1], 0 }
   0xa   :  { %16 = vsyncpa [#allocation10], 0 }
   0xb   :  { %18 = vsyncpa [#allocation10 + $0x1], 0 }
   0xc   :  { %19 = vsyncpa [#allocation5], 0 }
   0xd   :  { %21 = vsyncpa [#allocation5 + $0x1], 0  ;;  %s2881_s18 = smov 0   ;;  %s2883_s19 = smov 0  }
   0xe   :  { %s2885_s20 = smov 0   ;;  %s2887_s21 = smov 0  }
   0xf   :  { %s2889_s22 = smov 0   ;;  %s2891_s23 = smov 0  }
  0x10   :  { %s2893_s24 = smov 0   ;;  %s2895_s25 = smov 0  }
  0x11   :  { %s2897_s26 = smov 0   ;;  %s2899_s27 = smov 0  }
  0x12   :  { %s2901_s28 = smov 0  }
  0x13 LB: > { %3640 = sst [smem:[#allocation16_spill]] %s2812_s20  ;;  %s36_s29 = sadd.s32 1, %s2836_s26  ;;  %s2844_s28 = sphi %s2901_s28, %s27_s28   ;;  %s2840_s27 = sphi %s2899_s27, %s3681_s27   ;;  %s2836_s26 = sphi %s2897_s26, %s3687_s26   ;;  %s2832_s25 = sphi %s2895_s25, %s3679_s25   ;;  %s2828_s24 = sphi %s2893_s24, %s3686_s24   ;;  %s2824_s23 = sphi %s2891_s23, %s3678_s23   ;;  %s2820_s22 = sphi %s2889_s22, %s3685_s22   ;;  %s2816_s21 = sphi %s2887_s21, %s3684_s21   ;;  %s2812_s20 = sphi %s2885_s20, %s3676_s20   ;;  %s2808_s19 = sphi %s2883_s19, %s3683_s19   ;;  %s2804_s18 = sphi %s2881_s18, %s3682_s18  }
  0x14   : > { %3641 = sst [smem:[#allocation17_spill]] %s2816_s21  ;;  %p54_p0 = scmp.eq.s32.totalorder %s2844_s28, 0 }
  0x15   : > { %3642 = sst [smem:[#allocation18_spill]] %s2824_s23  ;;  %p2938_p1 = scmp.ge.s32.totalorder %s36_s29, 4 }
  0x16   : > { %3643 = sst [smem:[#allocation19_spill]] %s2832_s25  ;;  %s72_s6 = sadd.s32 1, %s2812_s20 }
  0x17   : > { %3644 = sst [smem:[#allocation20_spill]] %s2840_s27  ;;  %p79_p2 = scmp.ne.s32.totalorder %s2812_s20, %s2808_s19 }
  0x18   : > { %3645 = sst [smem:[#allocation21_spill]] %s2844_s28  ;;  %p85_p3 = scmp.ne.s32.totalorder %s2808_s19, %s2804_s18 }
  0x19   : > { %s3689_s29 = smov (%p2938_p1, %s36_s29), 0  ;;  %p2953_p4 = por %p79_p2, %p54_p0 }
  0x1a   : > { %3647 = sst [smem:[#allocation22_spill]] %s3689_s29  ;;  %s69_s8 = ssub.s32 %s2836_s26, %s3689_s29 }
  0x1b   : > { %p2435_p5 = scmp.lt.s32.totalorder %s2844_s28, 8  ;;  %p70_p6 = scmp.eq.s32.totalorder %s69_s8, 0 }
  0x1c   : > { %s234_s9 = sand.u32 1, %s2844_s28   ;;  %s2965_s11 = sand.u32 1, %s2812_s20  }
  0x1d   : > { %s2962_s10 = scalar_select %p70_p6, %s2812_s20, %s72_s6  }
  0x1e   : > { %s3617_s12 = sshll.u32 %s2965_s11, 8  ;;  %s3618_s13 = sshll.u32 %s2836_s26, 8 }
  0x1f   : > { %3649 = sst [smem:[#allocation23_spill]] %s2962_s10  ;;  %s238_s6 = scalar_lea.vmem [#allocation6], %s3617_s12 }
  0x20   : > { %s3650_s1 = sld [smem:[#allocation29_spill]]  ;;  %s246_s8 = sshll.u32 %s238_s6, 4  ;;  %s247_s8 = int_to_ptr.vmem [resolvable:$true] %s246_s8 }
  0x21   : > { %p2980_p7 = pnand %p2435_p5, %p2953_p4  ;;  %p1987_p8 = scmp.ge.s32.totalorder %s2844_s28, 1 }
  0x22   : > { %p296_p9 = scmp.lt.s32.totalorder %s2844_s28, 9  ;;  %s2986_s15 = scalar_lea.sflag [#allocation7], %s234_s9 }
  0x23   : > { %s3621_s7 = smov 8   ;;  %s2999_s12 = sadd.s32 4294967295, %s2844_s28  }
  0x24   : > { %p2994_p10 = pnand %p1987_p8, %p296_p9  ;;  %s1971_s9 = sadd.s32 4294967294, %s2844_s28  }
  0x25   : > { %p53_p11 = scmp.ne.s32.totalorder %s2824_s23, %s2820_s22  ;;  %p59_p13 = scmp.ne.s32.totalorder %s2820_s22, %s2816_s21 }
  0x26   : > { %s243_s16 = scalar_lea.hbm %s3650_s1, %s3618_s13  ;;  %s39_s13 = sadd.s32 1, %s2840_s27 }
  0x27   : > { %s244_s17 = sshll.u32 %s243_s16, 4  ;;  %s3619_s16 = smov 128   ;;  %s245_s17 = int_to_ptr.hbm [resolvable:$true] %s244_s17 }
  0x28   : > { %2424 = dma.hbm_to_vmem [thread:$0]  (!%p2980_p7), %s245_s17, 4096, %s247_s8, %s2986_s15, %s3619_s16, %s3619_s16, %s3621_s7  }
  0x29   : > { %s3691_s13 = smov (!%p2938_p1, %s39_s13), %s2840_s27  ;;  %s46_s1 = sadd.s32 1, %s2824_s23 }
  0x2a   : > { %p41_p12 = scmp.ge.s32.totalorder %s3691_s13, 2  ;;  %p3013_p2 = por %p54_p0, %p53_p11 }
  0x2b   : > { %p60_p4 = scmp.eq.s32.totalorder %s2999_s12, 0  ;;  %p182_p0 = scmp.eq.s32.totalorder %s2999_s12, 7 }
  0x2c   : > { %s3693_s13 = smov (%p41_p12, %s3691_s13), 0  ;;  %p188_p9 = scmp.eq.s32.totalorder %s1971_s9, 7 }
  0x2d   : > { %3654 = sst [smem:[#allocation24_spill]] %s3693_s13  ;;  %p3023_p6 = por %p60_p4, %p59_p13 }
  0x2e   : > { %p3030_p1 = por %p85_p3, %p60_p4  ;;  %s43_s16 = ssub.s32 %s2840_s27, %s3693_s13 }
  0x2f   : > { %p44_p8 = scmp.eq.s32.totalorder %s43_s16, 0  ;;  %p3037_p12 = por %p182_p0, %p53_p11 }
  0x30   : > { %s211_s29 = sand.u32 1, %s2824_s23   ;;  %p3048_p3 = por %p188_p9, %p59_p13 }
  0x31   : > { %s3657_s7 = scalar_select %p3037_p12, 1, 0 }
  0x32   : > { %s3043_s10 = scalar_select %p44_p8, %s2824_s23, %s46_s1  }
  0x33   : > { %3658 = sst [smem:[#allocation25_spill]] %s3657_s7  ;;  %s1974_s13 = sshll.u32 %s211_s29, 7 }
  0x34   : > { %3659 = sst [smem:[#allocation26_spill]] %s3043_s10  ;;  %s2322_s20 = sshll.u32 %s2840_s27, 7 }
  0x35   : > { %s3660_s18 = scalar_select %p3048_p3, 1, 0 }
  0x36   : > { %s3662_s0 = sld [smem:[#allocation28_spill]]  ;;  %s215_s9 = scalar_lea.vmem [#allocation3], %s1974_s13 }
  0x37   : > { %3661 = sst [smem:[#allocation27_spill]] %s3660_s18  ;;  %s224_s7 = sshll.u32 %s215_s9, 4  ;;  %s225_s7 = int_to_ptr.vmem [resolvable:$true] %s224_s7 }
  0x38   : > { %p2419_p11 = pnand %p2435_p5, %p3013_p2  ;;  %s1981_s1 = sshll.u32 %s2965_s11, 1 }
  0x39   : > { %s1982_s10 = sshll.u32 %s2836_s26, 1  ;;  %s3663_s2 = sld [smem:[#allocation30_spill]] }
  0x3a   : > { %s3664_s25 = smov 8   ;;  %s260_s9 = scalar_lea.vmem [#allocation8], %s1981_s1 }
  0x3b   : > { %s3666_s17 = sshll.u32 %s2836_s26, 8  ;;  %s3667_s27 = sshll.u32 %s2965_s11, 8 }
  0x3c   : > { %s221_s16 = scalar_lea.hbm %s3662_s0, %s2322_s20  ;;  %s212_s20 = scalar_lea.sflag [#allocation4], %s211_s29 }
  0x3d   : > { %s222_s4 = sshll.u32 %s221_s16, 4  ;;  %s3665_s16 = smov 128   ;;  %s223_s4 = int_to_ptr.hbm [resolvable:$true] %s222_s4 }
  0x3e   : > { %2421 = dma.hbm_to_vmem [thread:$0]  (!%p2419_p11), %s223_s4, 2048, %s225_s7, %s212_s20, %s3665_s16, %s3665_s16, %s3664_s25  }
  0x3f   : > { %s264_s5 = scalar_lea.hbm %s3663_s2, %s1982_s10  ;;  %s268_s0 = sshll.u32 %s260_s9, 4  ;;  %s269_s0 = int_to_ptr.vmem [resolvable:$true] %s268_s0 }
  0x40   : > { %s266_s13 = sshll.u32 %s264_s5, 4  ;;  %s285_s23 = scalar_lea.hbm %s3614_s3, %s3666_s17  ;;  %s267_s13 = int_to_ptr.hbm [resolvable:$true] %s266_s13 }
  0x41   : > { %2427 = dma.hbm_to_vmem [thread:$0]  (!%p2980_p7), %s267_s13, 32, %s269_s0, %s2986_s15  }
  0x42   : > { %s279_s10 = scalar_lea.vmem [#allocation9], %s3667_s27  ;;  %s286_s29 = sshll.u32 %s285_s23, 4  ;;  %s287_s29 = int_to_ptr.hbm [resolvable:$true] %s286_s29 }
  0x43   : > { %s288_s2 = sshll.u32 %s279_s10, 4  ;;  %s276_s28 = scalar_lea.sflag [#allocation10], %s2965_s11  ;;  %s289_s2 = int_to_ptr.vmem [resolvable:$true] %s288_s2 }
  0x44   : > { %2430 = dma.hbm_to_vmem [thread:$0]  (!%p2980_p7), %s287_s29, 4096, %s289_s2, %s276_s28, %s3665_s16, %s3665_s16, %s3664_s25  }
  0x45   : > { %300 = sbr.rel (%p2994_p10) target bundleno = 627 (0x273), region = 40  ;;  %s3087_s0 = sand.u32 (!%p2994_p10), 1, %s2820_s22  }
  0x46   : > { %s1988_s4 = sshll.u32 (!%p2994_p10), %s3087_s0, 7  ;;  %s303_s21 = scalar_lea.sflag (!%p2994_p10), [#allocation4], %s3087_s0 }
  0x47   : > { %s3091_s15 = scalar_lea.vmem (!%p2994_p10), [#allocation3], %s1988_s4 }
  0x4a   : > { %2787 = dma.done.wait (%p3023_p6), %s303_s21, 2048  }
  0x4b   : > { %2789 = vsyncadd (%p3023_p6), %s303_s21, 4294965248  ;;  %s312_s2 = sand.u32 1, %s2999_s12   ;;  %s314_s28 = sand.u32 1, %s2808_s19  }
  0x4c   : > { %s1989_s11 = sshll.u32 %s314_s28, 8  ;;  %s313_s14 = scalar_lea.sflag [#allocation7], %s312_s2 }
  0x4d   : > { %s3099_s7 = scalar_lea.vmem [#allocation6], %s1989_s11 }
  0x4e   : > { %2791 = dma.done.wait (%p3030_p1), %s313_s14, 4128  }
  0x4f   : > { %2793 = vsyncadd (%p3030_p1), %s313_s14, 4294963168  ;;  %s1990_s6 = sshll.u32 %s314_s28, 1  ;;  %s333_s30 = scalar_lea.sflag [#allocation10], %s314_s28 }
  0x50   : > { %s3105_s18 = scalar_lea.vmem [#allocation8], %s1990_s6  ;;  %s3107_s1 = scalar_lea.vmem [#allocation9], %s1989_s11 }
  0x51   : > { %2795 = dma.done.wait (%p3030_p1), %s333_s30, 4096  }
  0x52   : > { %2797 = vsyncadd (%p3030_p1), %s333_s30, 4294963200  ;;  %s3113_s12 = scalar_lea.vmem [#allocation11], %s1988_s4  ;;  %p1993_p5 = scmp.ne.s32.totalorder %s2828_s24, 0 }
  0x54   : > { %386 = sbr.rel (%p1993_p5) target bundleno = 122 (0x7a), region = 60 }
  0x59   : > { %v2848_v0 = vmov 0.0  }
  0x5a   : > { %387 = vst [vmem:[#allocation2 + $0xb0] sm:$0xff] %v2848_v0 }
  0x5b   : > { %388 = vst [vmem:[#allocation2] sm:$0xff] %v2848_v0 }
  0x5c   : > { %389 = vst [vmem:[#allocation2 + $0xd8] sm:$0xff] %v2848_v0 }
  0x5d   : > { %390 = vst [vmem:[#allocation2 + $0x18] sm:$0xff] %v2848_v0 }
  0x5e   : > { %391 = vst [vmem:[#allocation2 + $0x50] sm:$0xff] %v2848_v0 }
  0x5f   : > { %392 = vst [vmem:[#allocation2 + $0x68] sm:$0xff] %v2848_v0 }
  0x60   : > { %393 = vst [vmem:[#allocation2 + $0x30] sm:$0xff] %v2848_v0 }
  0x61   : > { %394 = vst [vmem:[#allocation2 + $0x48] sm:$0xff] %v2848_v0 }
  0x62   : > { %395 = vst [vmem:[#allocation2 + $0x80] sm:$0xff] %v2848_v0 }
  0x63   : > { %396 = vst [vmem:[#allocation2 + $0x88] sm:$0xff] %v2848_v0 }
  0x64   : > { %397 = vst [vmem:[#allocation2 + $0xe8] sm:$0xff] %v2848_v0 }
  0x65   : > { %398 = vst [vmem:[#allocation2 + $0xb8] sm:$0xff] %v2848_v0 }
  0x66   : > { %399 = vst [vmem:[#allocation2 + $0x60] sm:$0xff] %v2848_v0 }
  0x67   : > { %400 = vst [vmem:[#allocation2 + $0xf0] sm:$0xff] %v2848_v0 }
  0x68   : > { %401 = vst [vmem:[#allocation2 + $0x8] sm:$0xff] %v2848_v0 }
  0x69   : > { %402 = vst [vmem:[#allocation2 + $0x78] sm:$0xff] %v2848_v0 }
  0x6a   : > { %403 = vst [vmem:[#allocation2 + $0x38] sm:$0xff] %v2848_v0 }
  0x6b   : > { %404 = vst [vmem:[#allocation2 + $0x58] sm:$0xff] %v2848_v0 }
  0x6c   : > { %405 = vst [vmem:[#allocation2 + $0x40] sm:$0xff] %v2848_v0 }
  0x6d   : > { %406 = vst [vmem:[#allocation2 + $0xc8] sm:$0xff] %v2848_v0 }
  0x6e   : > { %407 = vst [vmem:[#allocation2 + $0xe0] sm:$0xff] %v2848_v0 }
  0x6f   : > { %408 = vst [vmem:[#allocation2 + $0x90] sm:$0xff] %v2848_v0 }
  0x70   : > { %409 = vst [vmem:[#allocation2 + $0x70] sm:$0xff] %v2848_v0 }
  0x71   : > { %410 = vst [vmem:[#allocation2 + $0xc0] sm:$0xff] %v2848_v0 }
  0x72   : > { %411 = vst [vmem:[#allocation2 + $0xa8] sm:$0xff] %v2848_v0 }
  0x73   : > { %412 = vst [vmem:[#allocation2 + $0xd0] sm:$0xff] %v2848_v0 }
  0x74   : > { %413 = vst [vmem:[#allocation2 + $0x10] sm:$0xff] %v2848_v0 }
  0x75   : > { %414 = vst [vmem:[#allocation2 + $0x28] sm:$0xff] %v2848_v0 }
  0x76   : > { %415 = vst [vmem:[#allocation2 + $0xa0] sm:$0xff] %v2848_v0 }
  0x77   : > { %416 = vst [vmem:[#allocation2 + $0xf8] sm:$0xff] %v2848_v0 }
  0x78   : > { %417 = vst [vmem:[#allocation2 + $0x20] sm:$0xff] %v2848_v0 }
  0x79   : > { %418 = vst [vmem:[#allocation2 + $0x98] sm:$0xff] %v2848_v0 }
  0x7a PF: > { %v2116_v1 = vld [vmem:[%s3099_s7 + $0x70] sm:$0xf]  ;;  %v2357_v2 = vld [vmem:[%s3099_s7 + $0x74] sm:$0xf0]  ;;  %v2356_v6 = vld [vmem:[%s3099_s7 + $0x74] sm:$0xf] }
  0x7b   : > { %v2180_v3 = vld [vmem:[%s3099_s7 + $0xf0] sm:$0xf]  ;;  %v2117_v4 = vor.u32 %v2357_v2, %v2116_v1  ;;  %v2373_v5 = vld [vmem:[%s3099_s7 + $0xf4] sm:$0xf0]  ;;  %v2118_v7 = vld [vmem:[%s3099_s7 + $0x78] sm:$0xf0] }
  0x7c   : > { %v2181_v8 = vor.u32 %v2373_v5, %v2180_v3  ;;  %v2121_v9 = vor.u32 %v2356_v6, %v2118_v7  ;;  %v2372_v10 = vld [vmem:[%s3099_s7 + $0xf4] sm:$0xf]  ;;  %v2182_v11 = vld [vmem:[%s3099_s7 + $0xf8] sm:$0xf0]  ;;  %v2108_v12 = vld [vmem:[%s3099_s7 + $0x60] sm:$0xf] }
  0x7d   : > { %713 = vmatpush.bf16.msra.mxu0 %v2117_v4  ;;  %v2185_v13 = vor.u32 %v2372_v10, %v2182_v11  ;;  %v2355_v14 = vld [vmem:[%s3099_s7 + $0x64] sm:$0xf0]  ;;  %v2172_v15 = vld [vmem:[%s3099_s7 + $0xe0] sm:$0xf]  ;;  %v2354_v19 = vld [vmem:[%s3099_s7 + $0x64] sm:$0xf] }
  0x7e   : > { %v2371_v16 = vld [vmem:[%s3099_s7 + $0xe4] sm:$0xf0]  ;;  %762 = vmatpush.bf16.msra.mxu1 %v2181_v8  ;;  %811 = vmatpush.bf16.msra.mxu2 %v2121_v9  ;;  %v2109_v17 = vor.u32 %v2355_v14, %v2108_v12  ;;  %v2110_v20 = vld [vmem:[%s3099_s7 + $0x68] sm:$0xf0]  ;;  %v2370_v21 = vld [vmem:[%s3099_s7 + $0xe4] sm:$0xf] }
  0x7f   : > { %v2173_v18 = vor.u32 %v2371_v16, %v2172_v15  ;;  %860 = vmatpush.bf16.msra.mxu3 %v2185_v13  ;;  %v2113_v22 = vor.u32 %v2354_v19, %v2110_v20  ;;  %v2174_v23 = vld [vmem:[%s3099_s7 + $0xe8] sm:$0xf0]  ;;  %v2100_v24 = vld [vmem:[%s3099_s7 + $0x50] sm:$0xf]  ;;  %v2353_v25 = vld [vmem:[%s3099_s7 + $0x54] sm:$0xf0] }
  0x80   : > { %v2177_v26 = vor.u32 %v2370_v21, %v2174_v23  ;;  %v2164_v27 = vld [vmem:[%s3099_s7 + $0xd0] sm:$0xf]  ;;  %v2369_v28 = vld [vmem:[%s3099_s7 + $0xd4] sm:$0xf0]  ;;  %v2352_v29 = vld [vmem:[%s3099_s7 + $0x54] sm:$0xf]  ;;  %v2101_v30 = vor.u32 %v2353_v25, %v2100_v24 }
  0x81   : > { %714 = vmatpush.bf16.msra.mxu0 %v2109_v17  ;;  %v2102_v31 = vld [vmem:[%s3099_s7 + $0x58] sm:$0xf0]  ;;  %v2368_v32 = vld [vmem:[%s3099_s7 + $0xd4] sm:$0xf]  ;;  %v2165_v34 = vor.u32 %v2369_v28, %v2164_v27  ;;  %v2092_v36 = vld [vmem:[%s3099_s7 + $0x40] sm:$0xf] }
  0x82   : > { %v2166_v33 = vld [vmem:[%s3099_s7 + $0xd8] sm:$0xf0]  ;;  %763 = vmatpush.bf16.msra.mxu1 %v2173_v18  ;;  %812 = vmatpush.bf16.msra.mxu2 %v2113_v22  ;;  %v2105_v35 = vor.u32 %v2352_v29, %v2102_v31  ;;  %v2351_v37 = vld [vmem:[%s3099_s7 + $0x44] sm:$0xf0]  ;;  %v2156_v38 = vld [vmem:[%s3099_s7 + $0xc0] sm:$0xf] }
  0x83   : > { %861 = vmatpush.bf16.msra.mxu3 %v2177_v26  ;;  %v2169_v39 = vor.u32 %v2368_v32, %v2166_v33  ;;  %v2367_v40 = vld [vmem:[%s3099_s7 + $0xc4] sm:$0xf0]  ;;  %v2350_v41 = vld [vmem:[%s3099_s7 + $0x44] sm:$0xf]  ;;  %v2094_v42 = vld [vmem:[%s3099_s7 + $0x48] sm:$0xf0]  ;;  %v2093_v45 = vor.u32 %v2351_v37, %v2092_v36 }
  0x84   : > { %v2366_v43 = vld [vmem:[%s3099_s7 + $0xc4] sm:$0xf]  ;;  %v2158_v44 = vld [vmem:[%s3099_s7 + $0xc8] sm:$0xf0]  ;;  %v2157_v46 = vor.u32 %v2367_v40, %v2156_v38  ;;  %v2097_v47 = vor.u32 %v2350_v41, %v2094_v42  ;;  %v2084_v48 = vld [vmem:[%s3099_s7 + $0x30] sm:$0xf] }
  0x85   : > { %715 = vmatpush.bf16.msra.mxu0 %v2101_v30  ;;  %v2349_v49 = vld [vmem:[%s3099_s7 + $0x34] sm:$0xf0]  ;;  %v2148_v50 = vld [vmem:[%s3099_s7 + $0xb0] sm:$0xf]  ;;  %v2161_v51 = vor.u32 %v2366_v43, %v2158_v44  ;;  %v2348_v53 = vld [vmem:[%s3099_s7 + $0x34] sm:$0xf] }
  0x86   : > { %764 = vmatpush.bf16.msra.mxu1 %v2165_v34  ;;  %813 = vmatpush.bf16.msra.mxu2 %v2105_v35  ;;  %v2365_v52 = vld [vmem:[%s3099_s7 + $0xb4] sm:$0xf0]  ;;  %v2086_v54 = vld [vmem:[%s3099_s7 + $0x38] sm:$0xf0]  ;;  %v2364_v55 = vld [vmem:[%s3099_s7 + $0xb4] sm:$0xf]  ;;  %v2085_v57 = vor.u32 %v2349_v49, %v2084_v48 }
  0x87   : > { %862 = vmatpush.bf16.msra.mxu3 %v2169_v39  ;;  %v2150_v56 = vld [vmem:[%s3099_s7 + $0xb8] sm:$0xf0]  ;;  %v2149_v58 = vor.u32 %v2365_v52, %v2148_v50  ;;  %v2089_v59 = vor.u32 %v2348_v53, %v2086_v54  ;;  %v2076_v60 = vld [vmem:[%s3099_s7 + $0x20] sm:$0xf]  ;;  %v2347_v61 = vld [vmem:[%s3099_s7 + $0x24] sm:$0xf0] }
  0x88   : > { %v2140_v62 = vld [vmem:[%s3099_s7 + $0xa0] sm:$0xf]  ;;  %v2153_v63 = vor.u32 %v2364_v55, %v2150_v56  ;;  %v2363_v0 = vld [vmem:[%s3099_s7 + $0xa4] sm:$0xf0]  ;;  %v2346_v1 = vld [vmem:[%s3099_s7 + $0x24] sm:$0xf]  ;;  %v2077_v5 = vor.u32 %v2347_v61, %v2076_v60 }
  0x89   : > { %716 = vmatpush.bf16.msra.mxu0 %v2093_v45  ;;  %v2078_v2 = vld [vmem:[%s3099_s7 + $0x28] sm:$0xf0]  ;;  %v2362_v3 = vld [vmem:[%s3099_s7 + $0xa4] sm:$0xf]  ;;  %v2141_v6 = vor.u32 %v2363_v0, %v2140_v62  ;;  %v2068_v8 = vld [vmem:[%s3099_s7 + $0x10] sm:$0xf] }
  0x8a   : > { %765 = vmatpush.bf16.msra.mxu1 %v2157_v46  ;;  %814 = vmatpush.bf16.msra.mxu2 %v2097_v47  ;;  %v2142_v4 = vld [vmem:[%s3099_s7 + $0xa8] sm:$0xf0]  ;;  %v2081_v7 = vor.u32 %v2346_v1, %v2078_v2  ;;  %v2345_v9 = vld [vmem:[%s3099_s7 + $0x14] sm:$0xf0]  ;;  %v2132_v10 = vld [vmem:[%s3099_s7 + $0x90] sm:$0xf] }
  0x8b   : > { %863 = vmatpush.bf16.msra.mxu3 %v2161_v51  ;;  %v2145_v11 = vor.u32 %v2362_v3, %v2142_v4  ;;  %v2361_v12 = vld [vmem:[%s3099_s7 + $0x94] sm:$0xf0]  ;;  %v2344_v13 = vld [vmem:[%s3099_s7 + $0x14] sm:$0xf]  ;;  %v2070_v14 = vld [vmem:[%s3099_s7 + $0x18] sm:$0xf0]  ;;  %v2069_v17 = vor.u32 %v2345_v9, %v2068_v8 }
  0x8c   : > { %v2360_v15 = vld [vmem:[%s3099_s7 + $0x94] sm:$0xf]  ;;  %v2134_v16 = vld [vmem:[%s3099_s7 + $0x98] sm:$0xf0]  ;;  %v2133_v18 = vor.u32 %v2361_v12, %v2132_v10  ;;  %v2073_v19 = vor.u32 %v2344_v13, %v2070_v14  ;;  %v2060_v20 = vld [vmem:[%s3099_s7] sm:$0xf] }
  0x8d   : > { %717 = vmatpush.bf16.msra.mxu0 %v2085_v57  ;;  %v2343_v21 = vld [vmem:[%s3099_s7 + $0x4] sm:$0xf0]  ;;  %v2124_v22 = vld [vmem:[%s3099_s7 + $0x80] sm:$0xf]  ;;  %v2137_v23 = vor.u32 %v2360_v15, %v2134_v16  ;;  %v2342_v25 = vld [vmem:[%s3099_s7 + $0x4] sm:$0xf] }
  0x8e   : > { %766 = vmatpush.bf16.msra.mxu1 %v2149_v58  ;;  %815 = vmatpush.bf16.msra.mxu2 %v2089_v59  ;;  %v2359_v24 = vld [vmem:[%s3099_s7 + $0x84] sm:$0xf0]  ;;  %v2062_v26 = vld [vmem:[%s3099_s7 + $0x8] sm:$0xf0]  ;;  %v2358_v27 = vld [vmem:[%s3099_s7 + $0x84] sm:$0xf]  ;;  %v2061_v29 = vor.u32 %v2343_v21, %v2060_v20 }
  0x8f   : > { %864 = vmatpush.bf16.msra.mxu3 %v2153_v63  ;;  %v2126_v28 = vld [vmem:[%s3099_s7 + $0x88] sm:$0xf0]  ;;  %v1996_v30 = vld [vmem:[%s3091_s15] sm:$0xf]  ;;  %v2327_v31 = vld [vmem:[%s3091_s15 + $0x4] sm:$0xf0]  ;;  %v2125_v32 = vor.u32 %v2359_v24, %v2124_v22  ;;  %v2065_v33 = vor.u32 %v2342_v25, %v2062_v26 }
  0x90   : > { %v2326_v34 = vld [vmem:[%s3091_s15 + $0x4] sm:$0xf]  ;;  %v1998_v35 = vld [vmem:[%s3091_s15 + $0x8] sm:$0xf0]  ;;  %v2129_v36 = vor.u32 %v2358_v27, %v2126_v28  ;;  %v1997_v37 = vor.u32 %v2327_v31, %v1996_v30  ;;  %v2388_v39 = vld [vmem:[%s3107_s1 + $0x74] sm:$0xf] }
  0x91   : > { %718 = vmatpush.bf16.msra.mxu0 %v2077_v5  ;;  %v2001_v38 = vor.u32 %v2326_v34, %v1998_v35  ;;  %v2246_v40 = vld [vmem:[%s3107_s1 + $0x78] sm:$0xf0]  ;;  %v2404_v41 = vld [vmem:[%s3107_s1 + $0xf4] sm:$0xf]  ;;  %v2244_v44 = vld [vmem:[%s3107_s1 + $0x70] sm:$0xf] }
  0x92   : > { %767 = vmatpush.bf16.msra.mxu1 %v2141_v6  ;;  %816 = vmatpush.bf16.msra.mxu2 %v2081_v7  ;;  %v2249_v42 = vor.u32 %v2388_v39, %v2246_v40  ;;  %v2310_v43 = vld [vmem:[%s3107_s1 + $0xf8] sm:$0xf0]  ;;  %v2389_v45 = vld [vmem:[%s3107_s1 + $0x74] sm:$0xf0]  ;;  %v2308_v48 = vld [vmem:[%s3107_s1 + $0xf0] sm:$0xf] }
  0x93   : > { %865 = vmatpush.bf16.msra.mxu3 %v2145_v11  ;;  %v2313_v46 = vor.u32 %v2404_v41, %v2310_v43  ;;  %v2245_v47 = vor.u32 %v2389_v45, %v2244_v44  ;;  %v2405_v49 = vld [vmem:[%s3107_s1 + $0xf4] sm:$0xf0]  ;;  %v2004_v51 = vld [vmem:[%s3091_s15 + $0x10] sm:$0xf]  ;;  %v2329_v52 = vld [vmem:[%s3091_s15 + $0x14] sm:$0xf0] }
  0x94   : > { %v2309_v50 = vor.u32 %v2405_v49, %v2308_v48  ;;  %v2328_v53 = vld [vmem:[%s3091_s15 + $0x14] sm:$0xf]  ;;  %v2006_v54 = vld [vmem:[%s3091_s15 + $0x18] sm:$0xf0]  ;;  %v2005_v55 = vor.u32 %v2329_v52, %v2004_v51  ;;  %v2386_v57 = vld [vmem:[%s3107_s1 + $0x64] sm:$0xf] }
  0x95   : > { %719 = vmatpush.bf16.msra.mxu0 %v2069_v17  ;;  %v2009_v56 = vor.u32 %v2328_v53, %v2006_v54  ;;  %v2238_v58 = vld [vmem:[%s3107_s1 + $0x68] sm:$0xf0]  ;;  %v2402_v59 = vld [vmem:[%s3107_s1 + $0xe4] sm:$0xf]  ;;  %v2236_v62 = vld [vmem:[%s3107_s1 + $0x60] sm:$0xf] }
  0x96   : > { %768 = vmatpush.bf16.msra.mxu1 %v2133_v18  ;;  %817 = vmatpush.bf16.msra.mxu2 %v2073_v19  ;;  %v2241_v60 = vor.u32 %v2386_v57, %v2238_v58  ;;  %v2302_v61 = vld [vmem:[%s3107_s1 + $0xe8] sm:$0xf0]  ;;  %v2387_v63 = vld [vmem:[%s3107_s1 + $0x64] sm:$0xf0]  ;;  %v2300_v2 = vld [vmem:[%s3107_s1 + $0xe0] sm:$0xf] }
  0x97   : > { %866 = vmatpush.bf16.msra.mxu3 %v2137_v23  ;;  %v2305_v0 = vor.u32 %v2402_v59, %v2302_v61  ;;  %v2237_v1 = vor.u32 %v2387_v63, %v2236_v62  ;;  %v2403_v3 = vld [vmem:[%s3107_s1 + $0xe4] sm:$0xf0]  ;;  %v2012_v5 = vld [vmem:[%s3091_s15 + $0x20] sm:$0xf]  ;;  %v2331_v6 = vld [vmem:[%s3091_s15 + $0x24] sm:$0xf0] }
  0x98   : > { %v2301_v4 = vor.u32 %v2403_v3, %v2300_v2  ;;  %v2330_v7 = vld [vmem:[%s3091_s15 + $0x24] sm:$0xf]  ;;  %v2014_v8 = vld [vmem:[%s3091_s15 + $0x28] sm:$0xf0]  ;;  %v2013_v9 = vor.u32 %v2331_v6, %v2012_v5  ;;  %v2384_v11 = vld [vmem:[%s3107_s1 + $0x54] sm:$0xf] }
  0x99   : > { %720 = vmatpush.bf16.msra.mxu0 %v2061_v29  ;;  %v2017_v10 = vor.u32 %v2330_v7, %v2014_v8  ;;  %v2230_v12 = vld [vmem:[%s3107_s1 + $0x58] sm:$0xf0]  ;;  %v2400_v13 = vld [vmem:[%s3107_s1 + $0xd4] sm:$0xf]  ;;  %v2228_v16 = vld [vmem:[%s3107_s1 + $0x50] sm:$0xf] }
  0x9a   : > { %769 = vmatpush.bf16.msra.mxu1 %v2125_v32  ;;  %818 = vmatpush.bf16.msra.mxu2 %v2065_v33  ;;  %v2233_v14 = vor.u32 %v2384_v11, %v2230_v12  ;;  %v2294_v15 = vld [vmem:[%s3107_s1 + $0xd8] sm:$0xf0]  ;;  %v2385_v17 = vld [vmem:[%s3107_s1 + $0x54] sm:$0xf0]  ;;  %v2292_v20 = vld [vmem:[%s3107_s1 + $0xd0] sm:$0xf] }
  0x9b   : > { %867 = vmatpush.bf16.msra.mxu3 %v2129_v36  ;;  %v2297_v18 = vor.u32 %v2400_v13, %v2294_v15  ;;  %v2229_v19 = vor.u32 %v2385_v17, %v2228_v16  ;;  %v2401_v21 = vld [vmem:[%s3107_s1 + $0xd4] sm:$0xf0]  ;;  %v2020_v23 = vld [vmem:[%s3091_s15 + $0x30] sm:$0xf]  ;;  %v2333_v24 = vld [vmem:[%s3091_s15 + $0x34] sm:$0xf0] }
  0x9c   : > { %721 = vmatmul.bf16.vlgmr.msra.gmra.mxu0 %v1997_v37  ;;  %v2293_v22 = vor.u32 %v2401_v21, %v2292_v20  ;;  %v2332_v25 = vld [vmem:[%s3091_s15 + $0x34] sm:$0xf]  ;;  %v2022_v26 = vld [vmem:[%s3091_s15 + $0x38] sm:$0xf0]  ;;  %v2021_v27 = vor.u32 %v2333_v24, %v2020_v23  ;;  %v2382_v29 = vld [vmem:[%s3107_s1 + $0x44] sm:$0xf] }
  0x9d   : > { %770 = vmatmul.bf16.vlgmr.msra.gmra.mxu1 %v2001_v38  ;;  %819 = vmatmul.bf16.vlgmr.msra.gmra.mxu2 %v1997_v37  ;;  %v2025_v28 = vor.u32 %v2332_v25, %v2022_v26  ;;  %v2222_v30 = vld [vmem:[%s3107_s1 + $0x48] sm:$0xf0]  ;;  %v2398_v31 = vld [vmem:[%s3107_s1 + $0xc4] sm:$0xf]  ;;  %v2220_v34 = vld [vmem:[%s3107_s1 + $0x40] sm:$0xf] }
  0x9e   : > { %868 = vmatmul.bf16.vlgmr.msra.gmra.mxu3 %v2001_v38  ;;  %1535 = vmatpush.bf16.msrb.mxu2 %v2249_v42  ;;  %v2225_v32 = vor.u32 %v2382_v29, %v2222_v30  ;;  %v2286_v33 = vld [vmem:[%s3107_s1 + $0xc8] sm:$0xf0]  ;;  %v2383_v35 = vld [vmem:[%s3107_s1 + $0x44] sm:$0xf0]  ;;  %v2284_v38 = vld [vmem:[%s3107_s1 + $0xc0] sm:$0xf] }
  0x9f   : > { %1584 = vmatpush.bf16.msrb.mxu3 %v2313_v46  ;;  %1437 = vmatpush.bf16.msrb.mxu0 %v2245_v47  ;;  %v2289_v36 = vor.u32 %v2398_v31, %v2286_v33  ;;  %v2221_v37 = vor.u32 %v2383_v35, %v2220_v34  ;;  %v2399_v39 = vld [vmem:[%s3107_s1 + $0xc4] sm:$0xf0]  ;;  %v2028_v41 = vld [vmem:[%s3091_s15 + $0x40] sm:$0xf]  ;;  %v2335_v42 = vld [vmem:[%s3091_s15 + $0x44] sm:$0xf0] }
  0xa0   : > { %1486 = vmatpush.bf16.msrb.mxu1 %v2309_v50  ;;  %v2285_v40 = vor.u32 %v2399_v39, %v2284_v38  ;;  %v2334_v43 = vld [vmem:[%s3091_s15 + $0x44] sm:$0xf]  ;;  %v2030_v44 = vld [vmem:[%s3091_s15 + $0x48] sm:$0xf0]  ;;  %v2029_v45 = vor.u32 %v2335_v42, %v2028_v41  ;;  %v2380_v47 = vld [vmem:[%s3107_s1 + $0x34] sm:$0xf] }
  0xa1   : > { %v2033_v46 = vor.u32 %v2334_v43, %v2030_v44  ;;  %v2214_v48 = vld [vmem:[%s3107_s1 + $0x38] sm:$0xf0]  ;;  %v2396_v49 = vld [vmem:[%s3107_s1 + $0xb4] sm:$0xf]  ;;  %v2212_v52 = vld [vmem:[%s3107_s1 + $0x30] sm:$0xf] }
  0xa2   : > { %1536 = vmatpush.bf16.msrb.mxu2 %v2241_v60  ;;  %v2217_v50 = vor.u32 %v2380_v47, %v2214_v48  ;;  %v2278_v51 = vld [vmem:[%s3107_s1 + $0xb8] sm:$0xf0]  ;;  %v2381_v53 = vld [vmem:[%s3107_s1 + $0x34] sm:$0xf0]  ;;  %v2036_v59 = vld [vmem:[%s3091_s15 + $0x50] sm:$0xf] }
  0xa3   : > { %1585 = vmatpush.bf16.msrb.mxu3 %v2305_v0  ;;  %1438 = vmatpush.bf16.msrb.mxu0 %v2237_v1  ;;  %v2281_v54 = vor.u32 %v2396_v49, %v2278_v51  ;;  %v2397_v57 = vld [vmem:[%s3107_s1 + $0xb4] sm:$0xf0]  ;;  %v2337_v60 = vld [vmem:[%s3091_s15 + $0x54] sm:$0xf0]  ;;  %v2336_v61 = vld [vmem:[%s3091_s15 + $0x54] sm:$0xf] }
  0xa4   : > { %1487 = vmatpush.bf16.msrb.mxu1 %v2301_v4  ;;  %v2038_v62 = vld [vmem:[%s3091_s15 + $0x58] sm:$0xf0]  ;;  %v2037_v63 = vor.u32 %v2337_v60, %v2036_v59  ;;  %v2378_v1 = vld [vmem:[%s3107_s1 + $0x24] sm:$0xf]  ;;  %v2206_v2 = vld [vmem:[%s3107_s1 + $0x28] sm:$0xf0] }
  0xa5   : > { %v2041_v0 = vor.u32 %v2336_v61, %v2038_v62  ;;  %v2394_v3 = vld [vmem:[%s3107_s1 + $0xa4] sm:$0xf]  ;;  %v2209_v4 = vor.u32 %v2378_v1, %v2206_v2  ;;  %v2270_v5 = vld [vmem:[%s3107_s1 + $0xa8] sm:$0xf0]  ;;  %v2044_v7 = vld [vmem:[%s3091_s15 + $0x60] sm:$0xf] }
  0xa6   : > { %1537 = vmatpush.bf16.msrb.mxu2 %v2233_v14  ;;  %v2273_v6 = vor.u32 %v2394_v3, %v2270_v5  ;;  %v2339_v8 = vld [vmem:[%s3091_s15 + $0x64] sm:$0xf0]  ;;  %v2204_v13 = vld [vmem:[%s3107_s1 + $0x20] sm:$0xf]  ;;  %v2379_v14 = vld [vmem:[%s3107_s1 + $0x24] sm:$0xf0] }
  0xa7   : > { %1586 = vmatpush.bf16.msrb.mxu3 %v2297_v18  ;;  %1439 = vmatpush.bf16.msrb.mxu0 %v2229_v19  ;;  %v2045_v11 = vor.u32 %v2339_v8, %v2044_v7  ;;  %v2268_v15 = vld [vmem:[%s3107_s1 + $0xa0] sm:$0xf]  ;;  %v2205_v16 = vor.u32 %v2379_v14, %v2204_v13  ;;  %v2395_v17 = vld [vmem:[%s3107_s1 + $0xa4] sm:$0xf0]  ;;  %v2052_v19 = vld [vmem:[%s3091_s15 + $0x70] sm:$0xf] }
  0xa8   : > { %1488 = vmatpush.bf16.msrb.mxu1 %v2293_v22  ;;  %v2269_v18 = vor.u32 %v2395_v17, %v2268_v15  ;;  %v2341_v20 = vld [vmem:[%s3091_s15 + $0x74] sm:$0xf0]  ;;  %v2340_v21 = vld [vmem:[%s3091_s15 + $0x74] sm:$0xf]  ;;  %v2054_v22 = vld [vmem:[%s3091_s15 + $0x78] sm:$0xf0] }
  0xa9   : > { %v2053_v23 = vor.u32 %v2341_v20, %v2052_v19  ;;  %v2376_v24 = vld [vmem:[%s3107_s1 + $0x14] sm:$0xf]  ;;  %v2198_v25 = vld [vmem:[%s3107_s1 + $0x18] sm:$0xf0]  ;;  %v2196_v31 = vld [vmem:[%s3107_s1 + $0x10] sm:$0xf] }
  0xaa   : > { %1538 = vmatpush.bf16.msrb.mxu2 %v2225_v32  ;;  %v2392_v26 = vld [vmem:[%s3107_s1 + $0x94] sm:$0xf]  ;;  %v2262_v29 = vld [vmem:[%s3107_s1 + $0x98] sm:$0xf0]  ;;  %v2377_v32 = vld [vmem:[%s3107_s1 + $0x14] sm:$0xf0] }
  0xab   : > { %1587 = vmatpush.bf16.msrb.mxu3 %v2289_v36  ;;  %1440 = vmatpush.bf16.msrb.mxu0 %v2221_v37  ;;  %v2265_v30 = vor.u32 %v2392_v26, %v2262_v29  ;;  %v2260_v33 = vld [vmem:[%s3107_s1 + $0x90] sm:$0xf]  ;;  %v2197_v34 = vor.u32 %v2377_v32, %v2196_v31  ;;  %v2393_v35 = vld [vmem:[%s3107_s1 + $0x94] sm:$0xf0]  ;;  %v467_v37 = vld [vmem:[%s3105_s18] sm:$0x3] }
  0xac   : > { %726 = vmatmul.bf16.gmra.mxu0 %v2005_v55  ;;  %1489 = vmatpush.bf16.msrb.mxu1 %v2285_v40  ;;  %v2261_v36 = vor.u32 %v2393_v35, %v2260_v33  ;;  %v2374_v38 = vld [vmem:[%s3107_s1 + $0x4] sm:$0xf]  ;;  %v2190_v39 = vld [vmem:[%s3107_s1 + $0x8] sm:$0xf0]  ;;  %v3272_v41 = vperm.slane %v467_v37, 0  ;;  %p2314_p7 = scmp.ne.s32.totalorder %s2828_s24, 3 }
  0xad   : > { %775 = vmatmul.bf16.gmra.mxu1 %v2009_v56  ;;  %824 = vmatmul.bf16.gmra.mxu2 %v2005_v55  ;;  %v2213_v55 = vor.u32 %v2381_v53, %v2212_v52  ;;  %v2390_v40 = vld [vmem:[%s3107_s1 + $0x84] sm:$0xf]  ;;  %v2193_v42 = vor.u32 %v2374_v38, %v2190_v39  ;;  %v2254_v43 = vld [vmem:[%s3107_s1 + $0x88] sm:$0xf0]  ;;  %v2375_v47 = vld [vmem:[%s3107_s1 + $0x4] sm:$0xf0] }
  0xae   : > { %873 = vmatmul.bf16.gmra.mxu3 %v2009_v56  ;;  %v2276_v56 = vld [vmem:[%s3107_s1 + $0xb0] sm:$0xf]  ;;  %1539 = vmatpush.bf16.msrb.mxu2 %v2217_v50  ;;  %v2257_v44 = vor.u32 %v2390_v40, %v2254_v43  ;;  %v3278_v52 = vperm.slane %v467_v37, 1  ;;  %s3668_s20 = sld [smem:[#allocation31_spill]] (!%p2314_p7) }
  0xaf   : > { %v2277_v58 = vor.u32 %v2397_v57, %v2276_v56  ;;  %1588 = vmatpush.bf16.msrb.mxu3 %v2281_v54  ;;  %1441 = vmatpush.bf16.msrb.mxu0 %v2213_v55  ;;  %v2252_v54 = vld [vmem:[%s3107_s1 + $0x80] sm:$0xf]  ;;  %v2391_v55 = vld [vmem:[%s3107_s1 + $0x84] sm:$0xf0] }
  0xb0   : > { %v2253_v56 = vor.u32 %v2391_v55, %v2252_v54 }
  0xb1   : > { %1490 = vmatpush.bf16.msrb.mxu1 %v2277_v58 }
  0xb2   : > { %1540 = vmatpush.bf16.msrb.mxu2 %v2209_v4 }
  0xb3   : > { %1589 = vmatpush.bf16.msrb.mxu3 %v2273_v6  ;;  %1442 = vmatpush.bf16.msrb.mxu0 %v2205_v16 }
  0xb5   : > { %1491 = vmatpush.bf16.msrb.mxu1 %v2269_v18 }
  0xb7   : > { %1590 = vmatpush.bf16.msrb.mxu3 %v2265_v30  ;;  %1443 = vmatpush.bf16.msrb.mxu0 %v2197_v34 }
  0xb9   : > { %1492 = vmatpush.bf16.msrb.mxu1 %v2261_v36 }
  0xbb   : > { %1591 = vmatpush.bf16.msrb.mxu3 %v2257_v44 }
  0xbc   : > { %731 = vmatmul.bf16.gmra.mxu0 %v2013_v9 }
  0xbd   : > { %780 = vmatmul.bf16.gmra.mxu1 %v2017_v10  ;;  %829 = vmatmul.bf16.gmra.mxu2 %v2013_v9  ;;  %v2338_v9 = vld [vmem:[%s3091_s15 + $0x64] sm:$0xf] }
  0xbe   : > { %878 = vmatmul.bf16.gmra.mxu3 %v2017_v10  ;;  %v2046_v10 = vld [vmem:[%s3091_s15 + $0x68] sm:$0xf0]  ;;  %1493 = vmatpush.bf16.msrb.mxu1 %v2253_v56 }
  0xbf   : > { %v2049_v12 = vor.u32 %v2338_v9, %v2046_v10 }
  0xcc   : > { %736 = vmatmul.bf16.gmra.mxu0 %v2021_v27 }
  0xcd   : > { %785 = vmatmul.bf16.gmra.mxu1 %v2025_v28  ;;  %834 = vmatmul.bf16.gmra.mxu2 %v2021_v27  ;;  %v2057_v27 = vor.u32 %v2340_v21, %v2054_v22 }
  0xce   : > { %883 = vmatmul.bf16.gmra.mxu3 %v2025_v28  ;;  %v2201_v28 = vor.u32 %v2376_v24, %v2198_v25 }
  0xd0   : > { %1541 = vmatpush.bf16.msrb.mxu2 %v2201_v28 }
  0xd4   : > { %1542 = vmatpush.bf16.msrb.mxu2 %v2193_v42 }
  0xdc   : > { %741 = vmatmul.bf16.gmra.mxu0 %v2029_v45 }
  0xdd   : > { %790 = vmatmul.bf16.gmra.mxu1 %v2033_v46  ;;  %839 = vmatmul.bf16.gmra.mxu2 %v2029_v45 }
  0xde   : > { %888 = vmatmul.bf16.gmra.mxu3 %v2033_v46  ;;  %v2188_v46 = vld [vmem:[%s3107_s1] sm:$0xf] }
  0xdf   : > { %v2189_v50 = vor.u32 %v2375_v47, %v2188_v46 }
  0xe1   : > { %1444 = vmatpush.bf16.msrb.mxu0 %v2189_v50 }
  0xec   : > { %746 = vmatmul.bf16.gmra.mxu0 %v2037_v63 }
  0xed   : > { %795 = vmatmul.bf16.gmra.mxu1 %v2041_v0  ;;  %844 = vmatmul.bf16.gmra.mxu2 %v2037_v63 }
  0xee   : > { %893 = vmatmul.bf16.gmra.mxu3 %v2041_v0 }
  0xfc   : > { %751 = vmatmul.bf16.gmra.mxu0 %v2045_v11 }
  0xfd   : > { %800 = vmatmul.bf16.gmra.mxu1 %v2049_v12  ;;  %849 = vmatmul.bf16.gmra.mxu2 %v2045_v11 }
  0xfe   : > { %898 = vmatmul.bf16.gmra.mxu3 %v2049_v12 }
 0x10c   : > { %756 = vmatmul.bf16.gmra.mxu0 %v2053_v23 }
 0x10d   : > { %805 = vmatmul.bf16.gmra.mxu1 %v2057_v27  ;;  %854 = vmatmul.bf16.gmra.mxu2 %v2053_v23 }
 0x10e   : > { %903 = vmatmul.bf16.gmra.mxu3 %v2057_v27 }
 0x119   : > { %v722_v45 = vpop.f32.mrf.mxu0 }
 0x11a   : > { %v723_v48 = vadd.f32 %v722_v45, %v3272_v41  ;;  %v771_v49 = vpop.f32.mrf.mxu1 }
 0x11c   : > { %v772_v51 = vadd.f32 %v771_v49, %v723_v48 }
 0x11e   : > { %v941_v53 = vmul.f32 0.044715, %v772_v51  ;;  %v909_v45 = vmul.f32 0.5, %v772_v51 }
 0x120   : > { %v973_v57 = vmul.f32 %v941_v53, %v772_v51  ;;  %v820_v58 = vpop.f32.mrf.mxu2 }
 0x121   : > { %v821_v59 = vadd.f32 %v820_v58, %v3278_v52  ;;  %v869_v60 = vpop.f32.mrf.mxu3  ;;  %v724_v61 = vpop.f32.mrf.mxu0 }
 0x122   : > { %v725_v62 = vadd.f32 %v724_v61, %v3272_v41  ;;  %v773_v63 = vpop.f32.mrf.mxu1  ;;  %v1005_v0 = vmul.f32 %v973_v57, %v772_v51 }
 0x123   : > { %v3284_v1 = vadd.f32 %v869_v60, %v821_v59 }
 0x124   : > { %v774_v2 = vadd.f32 %v773_v63, %v725_v62  ;;  %v1037_v3 = vadd.f32 %v1005_v0, %v772_v51 }
 0x125   : > { %v942_v4 = vmul.f32 0.044715, %v3284_v1 }
 0x126   : > { %v943_v5 = vmul.f32 0.044715, %v774_v2  ;;  %v1069_v9 = vmul.f32 0.7978846, %v1037_v3  ;;  %v911_v47 = vmul.f32 0.5, %v774_v2 }
 0x127   : > { %v974_v6 = vmul.f32 %v942_v4, %v3284_v1 }
 0x128   : > { %v975_v7 = vmul.f32 %v943_v5, %v774_v2  ;;  %v822_v8 = vpop.f32.mrf.mxu2  ;;  %2530 = vtanh.f32 %v1069_v9 }
 0x129   : > { %v823_v10 = vadd.f32 %v822_v8, %v3278_v52  ;;  %v871_v11 = vpop.f32.mrf.mxu3  ;;  %v727_v12 = vpop.f32.mrf.mxu0  ;;  %v1006_v13 = vmul.f32 %v974_v6, %v3284_v1  ;;  %v910_v8 = vmul.f32 0.5, %v3284_v1 }
 0x12a   : > { %v728_v14 = vadd.f32 %v727_v12, %v3272_v41  ;;  %v776_v15 = vpop.f32.mrf.mxu1  ;;  %v1007_v16 = vmul.f32 %v975_v7, %v774_v2 }
 0x12b   : > { %v872_v17 = vadd.f32 %v871_v11, %v823_v10  ;;  %v1038_v18 = vadd.f32 %v1006_v13, %v3284_v1 }
 0x12c   : > { %v3292_v19 = vadd.f32 %v776_v15, %v728_v14  ;;  %v1039_v20 = vadd.f32 %v1007_v16, %v774_v2 }
 0x12d   : > { %v944_v21 = vmul.f32 0.044715, %v872_v17  ;;  %v1070_v25 = vmul.f32 0.7978846, %v1038_v18  ;;  %v912_v11 = vmul.f32 0.5, %v872_v17 }
 0x12e   : > { %v945_v22 = vmul.f32 0.044715, %v3292_v19  ;;  %v1071_v23 = vmul.f32 0.7978846, %v1039_v20  ;;  %v2531_v32 = vpop.eup %2530 }
 0x12f   : > { %v976_v24 = vmul.f32 %v944_v21, %v872_v17  ;;  %v1133_v42 = vadd.f32 1.0, %v2531_v32 }
 0x130   : > { %v825_v26 = vpop.f32.mrf.mxu2  ;;  %2532 = vtanh.f32 %v1071_v23  ;;  %v977_v27 = vmul.f32 %v945_v22, %v3292_v19 }
 0x131   : > { %v826_v28 = vadd.f32 %v825_v26, %v3278_v52  ;;  %v874_v29 = vpop.f32.mrf.mxu3  ;;  %v729_v30 = vpop.f32.mrf.mxu0  ;;  %v1008_v31 = vmul.f32 %v976_v24, %v872_v17  ;;  %2534 = vtanh.f32 %v1070_v25  ;;  %v1165_v59 = vmul.f32 %v1133_v42, %v909_v45 }
 0x132   : > { %v730_v33 = vadd.f32 %v729_v30, %v3272_v41  ;;  %v778_v34 = vpop.f32.mrf.mxu1  ;;  %v1009_v35 = vmul.f32 %v977_v27, %v3292_v19 }
 0x133   : > { %v3299_v36 = vadd.f32 %v874_v29, %v826_v28  ;;  %v1040_v37 = vadd.f32 %v1008_v31, %v872_v17 }
 0x134   : > { %v3301_v38 = vadd.f32 %v778_v34, %v730_v33  ;;  %v1041_v39 = vadd.f32 %v1009_v35, %v3292_v19 }
 0x135   : > { %v946_v40 = vmul.f32 0.044715, %v3299_v36  ;;  %v1072_v43 = vmul.f32 0.7978846, %v1040_v37 }
 0x136   : > { %v2533_v44 = vpop.eup %2532  ;;  %v947_v46 = vmul.f32 0.044715, %v3301_v38  ;;  %v1073_v54 = vmul.f32 0.7978846, %v1041_v39  ;;  %v913_v39 = vmul.f32 0.5, %v3292_v19  ;;  %v915_v42 = vmul.f32 0.5, %v3301_v38 }
 0x137   : > { %v1135_v48 = vadd.f32 1.0, %v2533_v44  ;;  %2536 = vtanh.f32 %v1072_v43  ;;  %v978_v49 = vmul.f32 %v946_v40, %v3299_v36  ;;  %v2535_v55 = vpop.eup %2534 }
 0x138   : > { %v827_v50 = vpop.f32.mrf.mxu2  ;;  %v979_v53 = vmul.f32 %v947_v46, %v3301_v38  ;;  %v1134_v5 = vadd.f32 1.0, %v2535_v55  ;;  %2538 = vtanh.f32 %v1073_v54 }
 0x139   : > { %v828_v56 = vadd.f32 %v827_v50, %v3278_v52  ;;  %v876_v57 = vpop.f32.mrf.mxu3  ;;  %v732_v58 = vpop.f32.mrf.mxu0  ;;  %v1167_v60 = vmul.f32 %v1135_v48, %v911_v47  ;;  %v1010_v51 = vmul.f32 %v978_v49, %v3299_v36 }
 0x13a   : > { %v733_v61 = vadd.f32 %v732_v58, %v3272_v41  ;;  %v781_v62 = vpop.f32.mrf.mxu1  ;;  %v1011_v63 = vmul.f32 %v979_v53, %v3301_v38  ;;  %v1166_v18 = vmul.f32 %v1134_v5, %v910_v8 }
 0x13b   : > { %v3312_v0 = vadd.f32 %v876_v57, %v828_v56  ;;  %v1229_v2 = vpack.c.bf16 %v1167_v60, %v1165_v59  ;;  %v1042_v3 = vadd.f32 %v1010_v51, %v3299_v36 }
 0x13c   : > { %v3315_v4 = vadd.f32 %v781_v62, %v733_v61  ;;  %v1043_v6 = vadd.f32 %v1011_v63, %v3301_v38 }
 0x13d   : > { %v2537_v7 = vpop.eup %2536  ;;  %1445 = vmatmul.bf16.vlgmr.msrb.gmra.mxu0 %v1229_v2  ;;  %1543 = vmatmul.bf16.vlgmr.msrb.gmra.mxu2 %v1229_v2  ;;  %v948_v9 = vmul.f32 0.044715, %v3312_v0  ;;  %v1074_v15 = vmul.f32 0.7978846, %v1042_v3  ;;  %v914_v2 = vmul.f32 0.5, %v3299_v36 }
 0x13e   : > { %v949_v10 = vmul.f32 0.044715, %v3315_v4  ;;  %v1136_v12 = vadd.f32 1.0, %v2537_v7  ;;  %v1075_v13 = vmul.f32 0.7978846, %v1043_v6  ;;  %v2539_v25 = vpop.eup %2538  ;;  %v916_v6 = vmul.f32 0.5, %v3312_v0 }
 0x13f   : > { %v980_v14 = vmul.f32 %v948_v9, %v3312_v0  ;;  %v1137_v34 = vadd.f32 1.0, %v2539_v25 }
 0x140   : > { %v830_v16 = vpop.f32.mrf.mxu2  ;;  %v1168_v20 = vmul.f32 %v1136_v12, %v912_v11  ;;  %2540 = vtanh.f32 %v1075_v13  ;;  %v981_v21 = vmul.f32 %v949_v10, %v3315_v4 }
 0x141   : > { %v831_v22 = vadd.f32 %v830_v16, %v3278_v52  ;;  %v879_v23 = vpop.f32.mrf.mxu3  ;;  %v734_v1 = vpop.f32.mrf.mxu0  ;;  %v1012_v24 = vmul.f32 %v980_v14, %v3312_v0  ;;  %2542 = vtanh.f32 %v1074_v15  ;;  %v1169_v54 = vmul.f32 %v1137_v34, %v913_v39 }
 0x142   : > { %v735_v17 = vadd.f32 %v734_v1, %v3272_v41  ;;  %v783_v26 = vpop.f32.mrf.mxu1  ;;  %v1230_v27 = vpack.c.bf16 %v1168_v20, %v1166_v18  ;;  %v1013_v28 = vmul.f32 %v981_v21, %v3315_v4 }
 0x143   : > { %v3327_v29 = vadd.f32 %v879_v23, %v831_v22  ;;  %v1044_v30 = vadd.f32 %v1012_v24, %v3312_v0 }
 0x144   : > { %v3330_v31 = vadd.f32 %v783_v26, %v735_v17  ;;  %1494 = vmatmul.bf16.vlgmr.msrb.gmra.mxu1 %v1230_v27  ;;  %1592 = vmatmul.bf16.vlgmr.msrb.gmra.mxu3 %v1230_v27  ;;  %v1045_v32 = vadd.f32 %v1013_v28, %v3315_v4 }
 0x145   : > { %v950_v33 = vmul.f32 0.044715, %v3327_v29  ;;  %v1076_v35 = vmul.f32 0.7978846, %v1044_v30 }
 0x146   : > { %v2541_v37 = vpop.eup %2540  ;;  %v951_v40 = vmul.f32 0.044715, %v3330_v31  ;;  %v1077_v47 = vmul.f32 0.7978846, %v1045_v32  ;;  %v917_v32 = vmul.f32 0.5, %v3315_v4  ;;  %v919_v34 = vmul.f32 0.5, %v3330_v31 }
 0x147   : > { %v1139_v43 = vadd.f32 1.0, %v2541_v37  ;;  %2544 = vtanh.f32 %v1076_v35  ;;  %v982_v44 = vmul.f32 %v950_v33, %v3327_v29  ;;  %v2543_v48 = vpop.eup %2542 }
 0x148   : > { %v832_v45 = vpop.f32.mrf.mxu2  ;;  %v983_v46 = vmul.f32 %v951_v40, %v3330_v31  ;;  %v1138_v61 = vadd.f32 1.0, %v2543_v48  ;;  %2546 = vtanh.f32 %v1077_v47 }
 0x149   : > { %v833_v49 = vadd.f32 %v832_v45, %v3278_v52  ;;  %v881_v50 = vpop.f32.mrf.mxu3  ;;  %v737_v53 = vpop.f32.mrf.mxu0  ;;  %v1171_v55 = vmul.f32 %v1139_v43, %v915_v42  ;;  %v1014_v19 = vmul.f32 %v982_v44, %v3327_v29 }
 0x14a   : > { %v738_v56 = vadd.f32 %v737_v53, %v3272_v41  ;;  %v786_v38 = vpop.f32.mrf.mxu1  ;;  %v1015_v57 = vmul.f32 %v983_v46, %v3330_v31  ;;  %v1170_v12 = vmul.f32 %v1138_v61, %v914_v2 }
 0x14b   : > { %v3343_v58 = vadd.f32 %v881_v50, %v833_v49  ;;  %v1231_v59 = vpack.c.bf16 %v1171_v55, %v1169_v54  ;;  %v1046_v60 = vadd.f32 %v1014_v19, %v3327_v29 }
 0x14c   : > { %v3346_v51 = vadd.f32 %v786_v38, %v738_v56  ;;  %v1047_v62 = vadd.f32 %v1015_v57, %v3330_v31 }
 0x14d   : > { %v2545_v63 = vpop.eup %2544  ;;  %1450 = vmatmul.bf16.gmra.mxu0 %v1231_v59  ;;  %1548 = vmatmul.bf16.gmra.mxu2 %v1231_v59  ;;  %v952_v3 = vmul.f32 0.044715, %v3343_v58  ;;  %v1078_v10 = vmul.f32 0.7978846, %v1046_v60  ;;  %v918_v59 = vmul.f32 0.5, %v3327_v29 }
 0x14e   : > { %v953_v5 = vmul.f32 0.044715, %v3346_v51  ;;  %v1140_v7 = vadd.f32 1.0, %v2545_v63  ;;  %v1079_v8 = vmul.f32 0.7978846, %v1047_v62  ;;  %v2547_v20 = vpop.eup %2546  ;;  %v920_v62 = vmul.f32 0.5, %v3343_v58 }
 0x14f   : > { %v984_v9 = vmul.f32 %v952_v3, %v3343_v58  ;;  %v1141_v27 = vadd.f32 1.0, %v2547_v20 }
 0x150   : > { %v835_v11 = vpop.f32.mrf.mxu2  ;;  %v1172_v13 = vmul.f32 %v1140_v7, %v916_v6  ;;  %2548 = vtanh.f32 %v1079_v8  ;;  %v985_v14 = vmul.f32 %v953_v5, %v3346_v51 }
 0x151   : > { %v836_v15 = vadd.f32 %v835_v11, %v3278_v52  ;;  %v884_v36 = vpop.f32.mrf.mxu3  ;;  %v739_v16 = vpop.f32.mrf.mxu0  ;;  %v1016_v18 = vmul.f32 %v984_v9, %v3343_v58  ;;  %2550 = vtanh.f32 %v1078_v10  ;;  %v1173_v47 = vmul.f32 %v1141_v27, %v917_v32 }
 0x152   : > { %v740_v0 = vadd.f32 %v739_v16, %v3272_v41  ;;  %v788_v21 = vpop.f32.mrf.mxu1  ;;  %v1232_v22 = vpack.c.bf16 %v1172_v13, %v1170_v12  ;;  %v1017_v23 = vmul.f32 %v985_v14, %v3346_v51 }
 0x153   : > { %v3359_v1 = vadd.f32 %v884_v36, %v836_v15  ;;  %v1048_v24 = vadd.f32 %v1016_v18, %v3343_v58 }
 0x154   : > { %v3362_v25 = vadd.f32 %v788_v21, %v740_v0  ;;  %1499 = vmatmul.bf16.gmra.mxu1 %v1232_v22  ;;  %1597 = vmatmul.bf16.gmra.mxu3 %v1232_v22  ;;  %v1049_v17 = vadd.f32 %v1017_v23, %v3346_v51 }
 0x155   : > { %v954_v26 = vmul.f32 0.044715, %v3359_v1  ;;  %v1080_v28 = vmul.f32 0.7978846, %v1048_v24 }
 0x156   : > { %v2549_v30 = vpop.eup %2548  ;;  %v955_v33 = vmul.f32 0.044715, %v3362_v25  ;;  %v1081_v42 = vmul.f32 0.7978846, %v1049_v17 }
 0x157   : > { %v1143_v35 = vadd.f32 1.0, %v2549_v30  ;;  %2552 = vtanh.f32 %v1080_v28  ;;  %v986_v37 = vmul.f32 %v954_v26, %v3359_v1  ;;  %v2551_v43 = vpop.eup %2550  ;;  %v921_v26 = vmul.f32 0.5, %v3346_v51 }
 0x158   : > { %v837_v39 = vpop.f32.mrf.mxu2  ;;  %v987_v40 = vmul.f32 %v955_v33, %v3362_v25  ;;  %v1142_v56 = vadd.f32 1.0, %v2551_v43  ;;  %2554 = vtanh.f32 %v1081_v42  ;;  %v923_v28 = vmul.f32 0.5, %v3362_v25 }
 0x159   : > { %v838_v44 = vadd.f32 %v837_v39, %v3278_v52  ;;  %v886_v45 = vpop.f32.mrf.mxu3  ;;  %v742_v46 = vpop.f32.mrf.mxu0  ;;  %v1175_v48 = vmul.f32 %v1143_v35, %v919_v34  ;;  %v1018_v4 = vmul.f32 %v986_v37, %v3359_v1 }
 0x15a   : > { %v743_v49 = vadd.f32 %v742_v46, %v3272_v41  ;;  %v791_v31 = vpop.f32.mrf.mxu1  ;;  %v1019_v50 = vmul.f32 %v987_v40, %v3362_v25  ;;  %v1174_v8 = vmul.f32 %v1142_v56, %v918_v59 }
 0x15b   : > { %v3375_v53 = vadd.f32 %v886_v45, %v838_v44  ;;  %v1233_v54 = vpack.c.bf16 %v1175_v48, %v1173_v47  ;;  %v1050_v55 = vadd.f32 %v1018_v4, %v3359_v1 }
 0x15c   : > { %v3378_v19 = vadd.f32 %v791_v31, %v743_v49  ;;  %v1051_v38 = vadd.f32 %v1019_v50, %v3362_v25 }
 0x15d   : > { %v2553_v57 = vpop.eup %2552  ;;  %1455 = vmatmul.bf16.gmra.mxu0 %v1233_v54  ;;  %1553 = vmatmul.bf16.gmra.mxu2 %v1233_v54  ;;  %v956_v60 = vmul.f32 0.044715, %v3375_v53  ;;  %v1082_v5 = vmul.f32 0.7978846, %v1050_v55  ;;  %v922_v55 = vmul.f32 0.5, %v3359_v1 }
 0x15e   : > { %v957_v61 = vmul.f32 0.044715, %v3378_v19  ;;  %v1144_v63 = vadd.f32 1.0, %v2553_v57  ;;  %v1083_v2 = vmul.f32 0.7978846, %v1051_v38  ;;  %v2555_v13 = vpop.eup %2554  ;;  %v924_v38 = vmul.f32 0.5, %v3375_v53 }
 0x15f   : > { %v988_v3 = vmul.f32 %v956_v60, %v3375_v53  ;;  %v1145_v22 = vadd.f32 1.0, %v2555_v13 }
 0x160   : > { %v989_v6 = vmul.f32 %v957_v61, %v3378_v19  ;;  %v840_v7 = vpop.f32.mrf.mxu2  ;;  %v1176_v9 = vmul.f32 %v1144_v63, %v920_v62  ;;  %2556 = vtanh.f32 %v1083_v2 }
 0x161   : > { %v841_v10 = vadd.f32 %v840_v7, %v3278_v52  ;;  %v889_v29 = vpop.f32.mrf.mxu3  ;;  %v744_v11 = vpop.f32.mrf.mxu0  ;;  %v1020_v12 = vmul.f32 %v988_v3, %v3375_v53  ;;  %2558 = vtanh.f32 %v1082_v5  ;;  %v1177_v42 = vmul.f32 %v1145_v22, %v921_v26 }
 0x162   : > { %v745_v58 = vadd.f32 %v744_v11, %v3272_v41  ;;  %v793_v14 = vpop.f32.mrf.mxu1  ;;  %v1234_v15 = vpack.c.bf16 %v1176_v9, %v1174_v8  ;;  %v1021_v36 = vmul.f32 %v989_v6, %v3378_v19 }
 0x163   : > { %v3391_v16 = vadd.f32 %v889_v29, %v841_v10  ;;  %v1052_v18 = vadd.f32 %v1020_v12, %v3375_v53 }
 0x164   : > { %v3394_v20 = vadd.f32 %v793_v14, %v745_v58  ;;  %1504 = vmatmul.bf16.gmra.mxu1 %v1234_v15  ;;  %1602 = vmatmul.bf16.gmra.mxu3 %v1234_v15  ;;  %v1053_v0 = vadd.f32 %v1021_v36, %v3378_v19 }
 0x165   : > { %v958_v21 = vmul.f32 0.044715, %v3391_v16  ;;  %v1084_v23 = vmul.f32 0.7978846, %v1052_v18 }
 0x166   : > { %v2557_v24 = vpop.eup %2556  ;;  %v959_v17 = vmul.f32 0.044715, %v3394_v20  ;;  %v1085_v34 = vmul.f32 0.7978846, %v1053_v0 }
 0x167   : > { %v990_v27 = vmul.f32 %v958_v21, %v3391_v16  ;;  %v1147_v30 = vadd.f32 1.0, %v2557_v24  ;;  %2560 = vtanh.f32 %v1084_v23  ;;  %v2559_v35 = vpop.eup %2558  ;;  %v925_v21 = vmul.f32 0.5, %v3378_v19 }
 0x168   : > { %v991_v32 = vmul.f32 %v959_v17, %v3394_v20  ;;  %v842_v33 = vpop.f32.mrf.mxu2  ;;  %v1146_v49 = vadd.f32 1.0, %v2559_v35  ;;  %2562 = vtanh.f32 %v1085_v34  ;;  %v927_v23 = vmul.f32 0.5, %v3394_v20 }
 0x169   : > { %v843_v37 = vadd.f32 %v842_v33, %v3278_v52  ;;  %v891_v39 = vpop.f32.mrf.mxu3  ;;  %v747_v40 = vpop.f32.mrf.mxu0  ;;  %v1179_v43 = vmul.f32 %v1147_v30, %v923_v28  ;;  %v1022_v44 = vmul.f32 %v990_v27, %v3391_v16 }
 0x16a   : > { %v748_v51 = vadd.f32 %v747_v40, %v3272_v41  ;;  %v796_v45 = vpop.f32.mrf.mxu1  ;;  %v1023_v25 = vmul.f32 %v991_v32, %v3394_v20  ;;  %v1178_v2 = vmul.f32 %v1146_v49, %v922_v55 }
 0x16b   : > { %v3407_v46 = vadd.f32 %v891_v39, %v843_v37  ;;  %v1235_v47 = vpack.c.bf16 %v1179_v43, %v1177_v42  ;;  %v1054_v48 = vadd.f32 %v1022_v44, %v3391_v16 }
 0x16c   : > { %v3410_v4 = vadd.f32 %v796_v45, %v748_v51  ;;  %v1055_v31 = vadd.f32 %v1023_v25, %v3394_v20 }
 0x16d   : > { %v2561_v50 = vpop.eup %2560  ;;  %v960_v54 = vmul.f32 0.044715, %v3407_v46  ;;  %1460 = vmatmul.bf16.gmra.mxu0 %v1235_v47  ;;  %1558 = vmatmul.bf16.gmra.mxu2 %v1235_v47  ;;  %v1086_v61 = vmul.f32 0.7978846, %v1054_v48  ;;  %v926_v48 = vmul.f32 0.5, %v3391_v16 }
 0x16e   : > { %v961_v56 = vmul.f32 0.044715, %v3410_v4  ;;  %v1148_v57 = vadd.f32 1.0, %v2561_v50  ;;  %v1087_v59 = vmul.f32 0.7978846, %v1055_v31  ;;  %v2563_v8 = vpop.eup %2562  ;;  %v928_v31 = vmul.f32 0.5, %v3407_v46 }
 0x16f   : > { %v992_v60 = vmul.f32 %v960_v54, %v3407_v46  ;;  %v1149_v15 = vadd.f32 1.0, %v2563_v8 }
 0x170   : > { %v993_v62 = vmul.f32 %v961_v56, %v3410_v4  ;;  %v845_v63 = vpop.f32.mrf.mxu2  ;;  %v1180_v3 = vmul.f32 %v1148_v57, %v924_v38  ;;  %2564 = vtanh.f32 %v1087_v59 }
 0x171   : > { %v846_v5 = vadd.f32 %v845_v63, %v3278_v52  ;;  %v894_v6 = vpop.f32.mrf.mxu3  ;;  %v749_v7 = vpop.f32.mrf.mxu0  ;;  %v1024_v1 = vmul.f32 %v992_v60, %v3407_v46  ;;  %2566 = vtanh.f32 %v1086_v61  ;;  %v1181_v34 = vmul.f32 %v1149_v15, %v925_v21 }
 0x172   : > { %v750_v53 = vadd.f32 %v749_v7, %v3272_v41  ;;  %v798_v9 = vpop.f32.mrf.mxu1  ;;  %v1236_v10 = vpack.c.bf16 %v1180_v3, %v1178_v2  ;;  %v1025_v29 = vmul.f32 %v993_v62, %v3410_v4 }
 0x173   : > { %v3423_v11 = vadd.f32 %v894_v6, %v846_v5  ;;  %v1056_v12 = vadd.f32 %v1024_v1, %v3407_v46 }
 0x174   : > { %v3426_v13 = vadd.f32 %v798_v9, %v750_v53  ;;  %1509 = vmatmul.bf16.gmra.mxu1 %v1236_v10  ;;  %1607 = vmatmul.bf16.gmra.mxu3 %v1236_v10  ;;  %v1057_v58 = vadd.f32 %v1025_v29, %v3410_v4 }
 0x175   : > { %v962_v14 = vmul.f32 0.044715, %v3423_v11  ;;  %v1088_v36 = vmul.f32 0.7978846, %v1056_v12 }
 0x176   : > { %v2565_v18 = vpop.eup %2564  ;;  %v963_v0 = vmul.f32 0.044715, %v3426_v13  ;;  %v1089_v27 = vmul.f32 0.7978846, %v1057_v58 }
 0x177   : > { %v994_v22 = vmul.f32 %v962_v14, %v3423_v11  ;;  %v1151_v24 = vadd.f32 1.0, %v2565_v18  ;;  %2568 = vtanh.f32 %v1088_v36  ;;  %v2567_v28 = vpop.eup %2566  ;;  %v929_v14 = vmul.f32 0.5, %v3410_v4 }
 0x178   : > { %v995_v17 = vmul.f32 %v963_v0, %v3426_v13  ;;  %v847_v26 = vpop.f32.mrf.mxu2  ;;  %v1150_v51 = vadd.f32 1.0, %v2567_v28  ;;  %2570 = vtanh.f32 %v1089_v27  ;;  %v931_v36 = vmul.f32 0.5, %v3426_v13 }
 0x179   : > { %v848_v30 = vadd.f32 %v847_v26, %v3278_v52  ;;  %v896_v32 = vpop.f32.mrf.mxu3  ;;  %v752_v33 = vpop.f32.mrf.mxu0  ;;  %v1183_v35 = vmul.f32 %v1151_v24, %v927_v23  ;;  %v1026_v37 = vmul.f32 %v994_v22, %v3423_v11 }
 0x17a   : > { %v753_v19 = vadd.f32 %v752_v33, %v3272_v41  ;;  %v801_v39 = vpop.f32.mrf.mxu1  ;;  %v1027_v20 = vmul.f32 %v995_v17, %v3426_v13  ;;  %v1182_v59 = vmul.f32 %v1150_v51, %v926_v48 }
 0x17b   : > { %v3439_v40 = vadd.f32 %v896_v32, %v848_v30  ;;  %v1237_v42 = vpack.c.bf16 %v1183_v35, %v1181_v34  ;;  %v1058_v43 = vadd.f32 %v1026_v37, %v3423_v11 }
 0x17c   : > { %v3442_v44 = vadd.f32 %v801_v39, %v753_v19  ;;  %v1059_v45 = vadd.f32 %v1027_v20, %v3426_v13 }
 0x17d   : > { %v2569_v25 = vpop.eup %2568  ;;  %v964_v47 = vmul.f32 0.044715, %v3439_v40  ;;  %1465 = vmatmul.bf16.gmra.mxu0 %v1237_v42  ;;  %1563 = vmatmul.bf16.gmra.mxu2 %v1237_v42  ;;  %v1090_v56 = vmul.f32 0.7978846, %v1058_v43  ;;  %v930_v43 = vmul.f32 0.5, %v3423_v11 }
 0x17e   : > { %v965_v49 = vmul.f32 0.044715, %v3442_v44  ;;  %v1152_v50 = vadd.f32 1.0, %v2569_v25  ;;  %v1091_v54 = vmul.f32 0.7978846, %v1059_v45  ;;  %v2571_v2 = vpop.eup %2570  ;;  %v932_v45 = vmul.f32 0.5, %v3439_v40 }
 0x17f   : > { %v996_v55 = vmul.f32 %v964_v47, %v3439_v40  ;;  %v1153_v10 = vadd.f32 1.0, %v2571_v2 }
 0x180   : > { %v997_v38 = vmul.f32 %v965_v49, %v3442_v44  ;;  %v850_v57 = vpop.f32.mrf.mxu2  ;;  %v1184_v60 = vmul.f32 %v1152_v50, %v928_v31  ;;  %2572 = vtanh.f32 %v1091_v54 }
 0x181   : > { %v851_v61 = vadd.f32 %v850_v57, %v3278_v52  ;;  %v899_v62 = vpop.f32.mrf.mxu3  ;;  %v754_v63 = vpop.f32.mrf.mxu0  ;;  %v1028_v16 = vmul.f32 %v996_v55, %v3439_v40  ;;  %2574 = vtanh.f32 %v1090_v56  ;;  %v1185_v27 = vmul.f32 %v1153_v10, %v929_v14 }
 0x182   : > { %v755_v46 = vadd.f32 %v754_v63, %v3272_v41  ;;  %v803_v3 = vpop.f32.mrf.mxu1  ;;  %v1238_v5 = vpack.c.bf16 %v1184_v60, %v1182_v59  ;;  %v1029_v6 = vmul.f32 %v997_v38, %v3442_v44 }
 0x183   : > { %v3455_v7 = vadd.f32 %v899_v62, %v851_v61  ;;  %v1060_v1 = vadd.f32 %v1028_v16, %v3439_v40 }
 0x184   : > { %v3458_v8 = vadd.f32 %v803_v3, %v755_v46  ;;  %1514 = vmatmul.bf16.gmra.mxu1 %v1238_v5  ;;  %1612 = vmatmul.bf16.gmra.mxu3 %v1238_v5  ;;  %v1061_v53 = vadd.f32 %v1029_v6, %v3442_v44 }
 0x185   : > { %v966_v9 = vmul.f32 0.044715, %v3455_v7  ;;  %v1092_v29 = vmul.f32 0.7978846, %v1060_v1 }
 0x186   : > { %v2573_v12 = vpop.eup %2572  ;;  %v967_v58 = vmul.f32 0.044715, %v3458_v8  ;;  %v1093_v22 = vmul.f32 0.7978846, %v1061_v53  ;;  %v933_v53 = vmul.f32 0.5, %v3442_v44  ;;  %v935_v10 = vmul.f32 0.5, %v3458_v8 }
 0x187   : > { %v998_v15 = vmul.f32 %v966_v9, %v3455_v7  ;;  %v1155_v18 = vadd.f32 1.0, %v2573_v12  ;;  %2576 = vtanh.f32 %v1092_v29  ;;  %v2575_v23 = vpop.eup %2574 }
 0x188   : > { %v999_v0 = vmul.f32 %v967_v58, %v3458_v8  ;;  %v852_v21 = vpop.f32.mrf.mxu2  ;;  %v1154_v19 = vadd.f32 1.0, %v2575_v23  ;;  %2578 = vtanh.f32 %v1093_v22 }
 0x189   : > { %v853_v24 = vadd.f32 %v852_v21, %v3278_v52  ;;  %v901_v17 = vpop.f32.mrf.mxu3  ;;  %v757_v26 = vpop.f32.mrf.mxu0  ;;  %v1187_v28 = vmul.f32 %v1155_v18, %v931_v36  ;;  %v1030_v30 = vmul.f32 %v998_v15, %v3455_v7 }
 0x18a   : > { %v758_v4 = vadd.f32 %v757_v26, %v3272_v41  ;;  %v806_v32 = vpop.f32.mrf.mxu1  ;;  %v1031_v13 = vmul.f32 %v999_v0, %v3458_v8  ;;  %v1186_v54 = vmul.f32 %v1154_v19, %v930_v43 }
 0x18b   : > { %v3471_v33 = vadd.f32 %v901_v17, %v853_v24  ;;  %v1239_v34 = vpack.c.bf16 %v1187_v28, %v1185_v27  ;;  %v1062_v35 = vadd.f32 %v1030_v30, %v3455_v7  ;;  %v934_v30 = vmul.f32 0.5, %v3455_v7 }
 0x18c   : > { %v3474_v37 = vadd.f32 %v806_v32, %v758_v4  ;;  %v1063_v39 = vadd.f32 %v1031_v13, %v3458_v8 }
 0x18d   : > { %v2577_v20 = vpop.eup %2576  ;;  %v968_v42 = vmul.f32 0.044715, %v3471_v33  ;;  %1470 = vmatmul.bf16.gmra.mxu0 %v1239_v34  ;;  %1568 = vmatmul.bf16.gmra.mxu2 %v1239_v34  ;;  %v1094_v49 = vmul.f32 0.7978846, %v1062_v35 }
 0x18e   : > { %v969_v51 = vmul.f32 0.044715, %v3474_v37  ;;  %v1156_v25 = vadd.f32 1.0, %v2577_v20  ;;  %v1095_v47 = vmul.f32 0.7978846, %v1063_v39  ;;  %v2579_v59 = vpop.eup %2578  ;;  %v937_v7 = vmul.f32 0.5, %v3474_v37 }
 0x18f   : > { %v1000_v48 = vmul.f32 %v968_v42, %v3471_v33  ;;  %v1157_v5 = vadd.f32 1.0, %v2579_v59 }
 0x190   : > { %v1001_v31 = vmul.f32 %v969_v51, %v3474_v37  ;;  %v855_v50 = vpop.f32.mrf.mxu2  ;;  %v1188_v55 = vmul.f32 %v1156_v25, %v932_v45  ;;  %2580 = vtanh.f32 %v1095_v47 }
 0x191   : > { %v856_v56 = vadd.f32 %v855_v50, %v3278_v52  ;;  %v904_v38 = vpop.f32.mrf.mxu3  ;;  %v759_v57 = vpop.f32.mrf.mxu0  ;;  %v1032_v11 = vmul.f32 %v1000_v48, %v3471_v33  ;;  %2582 = vtanh.f32 %v1094_v49  ;;  %v1189_v18 = vmul.f32 %v1157_v5, %v933_v53 }
 0x192   : > { %v760_v40 = vadd.f32 %v759_v57, %v3272_v41  ;;  %v1240_v60 = vpack.c.bf16 %v1188_v55, %v1186_v54  ;;  %v1033_v61 = vmul.f32 %v1001_v31, %v3474_v37  ;;  %v808_v63 = vpop.f32.mrf.mxu1 }
 0x193   : > { %v3487_v62 = vadd.f32 %v904_v38, %v856_v56  ;;  %v1064_v16 = vadd.f32 %v1032_v11, %v3471_v33 }
 0x194   : > { %v809_v2 = vadd.f32 %v808_v63, %v760_v40  ;;  %1519 = vmatmul.bf16.gmra.mxu1 %v1240_v60  ;;  %1617 = vmatmul.bf16.gmra.mxu3 %v1240_v60  ;;  %v1065_v46 = vadd.f32 %v1033_v61, %v3474_v37  ;;  %v1197_v61 = vld [vmem:[#allocation2 + $0xb0] sm:$0xff] }
 0x195   : > { %v970_v3 = vmul.f32 0.044715, %v3487_v62  ;;  %v1096_v6 = vmul.f32 0.7978846, %v1064_v16  ;;  %v938_v56 = vmul.f32 0.5, %v3487_v62 }
 0x196   : > { %v2581_v1 = vpop.eup %2580  ;;  %v971_v41 = vmul.f32 0.044715, %v809_v2  ;;  %v1097_v14 = vmul.f32 0.7978846, %v1065_v46 }
 0x197   : > { %v1002_v9 = vmul.f32 %v970_v3, %v3487_v62  ;;  %v1159_v29 = vadd.f32 1.0, %v2581_v1  ;;  %2584 = vtanh.f32 %v1096_v6  ;;  %v2583_v15 = vpop.eup %2582  ;;  %v1198_v3 = vld [vmem:[#allocation2] sm:$0xff] }
 0x198   : > { %v1003_v12 = vmul.f32 %v971_v41, %v809_v2  ;;  %v857_v58 = vpop.f32.mrf.mxu2  ;;  %v1158_v26 = vadd.f32 1.0, %v2583_v15  ;;  %2586 = vtanh.f32 %v1097_v14 }
 0x199   : > { %v858_v36 = vadd.f32 %v857_v58, %v3278_v52  ;;  %v1191_v0 = vmul.f32 %v1159_v29, %v935_v10  ;;  %v1034_v21 = vmul.f32 %v1002_v9, %v3487_v62  ;;  %v906_v22 = vpop.f32.mrf.mxu3  ;;  %v936_v52 = vmul.f32 0.5, %v3471_v33 }
 0x19a   : > { %v1035_v23 = vmul.f32 %v1003_v12, %v809_v2  ;;  %v1190_v35 = vmul.f32 %v1158_v26, %v934_v30  ;;  %v939_v33 = vmul.f32 0.5, %v809_v2  ;;  %v1200_v12 = vld [vmem:[#allocation2 + $0x18] sm:$0xff] }
 0x19b   : > { %v907_v24 = vadd.f32 %v906_v22, %v858_v36  ;;  %v1241_v44 = vpack.c.bf16 %v1191_v0, %v1189_v18  ;;  %v1066_v17 = vadd.f32 %v1034_v21, %v3487_v62  ;;  %v1199_v62 = vld [vmem:[#allocation2 + $0xd8] sm:$0xff]  ;;  %v1201_v36 = vld [vmem:[#allocation2 + $0x50] sm:$0xff] }
 0x19c   : > { %v1067_v8 = vadd.f32 %v1035_v23, %v809_v2 }
 0x19d   : > { %v2585_v27 = vpop.eup %2584  ;;  %v972_v28 = vmul.f32 0.044715, %v907_v24  ;;  %1475 = vmatmul.bf16.gmra.mxu0 %v1241_v44  ;;  %1573 = vmatmul.bf16.gmra.mxu2 %v1241_v44  ;;  %v1098_v34 = vmul.f32 0.7978846, %v1066_v17  ;;  %v940_v38 = vmul.f32 0.5, %v907_v24 }
 0x19e   : > { %v1160_v4 = vadd.f32 1.0, %v2585_v27  ;;  %v1099_v32 = vmul.f32 0.7978846, %v1067_v8  ;;  %v2587_v20 = vpop.eup %2586  ;;  %v1203_v8 = vld [vmem:[#allocation2 + $0x30] sm:$0xff] }
 0x19f   : > { %v1004_v13 = vmul.f32 %v972_v28, %v907_v24  ;;  %v1161_v51 = vadd.f32 1.0, %v2587_v20 }
 0x1a0   : > { %v1192_v19 = vmul.f32 %v1160_v4, %v936_v52  ;;  %2588 = vtanh.f32 %v1099_v32  ;;  %v1204_v32 = vld [vmem:[#allocation2 + $0x48] sm:$0xff] }
 0x1a1   : > { %v1036_v39 = vmul.f32 %v1004_v13, %v907_v24  ;;  %2590 = vtanh.f32 %v1098_v34  ;;  %v1193_v49 = vmul.f32 %v1161_v51, %v937_v7 }
 0x1a2   : > { %v1242_v42 = vpack.c.bf16 %v1192_v19, %v1190_v35  ;;  %v1205_v19 = vld [vmem:[#allocation2 + $0x80] sm:$0xff] }
 0x1a3   : > { %v1068_v43 = vadd.f32 %v1036_v39, %v907_v24  ;;  %v1202_v24 = vld [vmem:[#allocation2 + $0x68] sm:$0xff] }
 0x1a4   : > { %1524 = vmatmul.bf16.gmra.mxu1 %v1242_v42  ;;  %1622 = vmatmul.bf16.gmra.mxu3 %v1242_v42 }
 0x1a5   : > { %v1100_v45 = vmul.f32 0.7978846, %v1068_v43 }
 0x1a6   : > { %v2589_v25 = vpop.eup %2588 }
 0x1a7   : > { %v1163_v47 = vadd.f32 1.0, %v2589_v25  ;;  %2592 = vtanh.f32 %v1100_v45  ;;  %v2591_v48 = vpop.eup %2590  ;;  %v1206_v45 = vld [vmem:[#allocation2 + $0x88] sm:$0xff] }
 0x1a8   : > { %v1162_v54 = vadd.f32 1.0, %v2591_v48 }
 0x1a9   : > { %v1195_v31 = vmul.f32 %v1163_v47, %v939_v33  ;;  %v1207_v47 = vld [vmem:[#allocation2 + $0xe8] sm:$0xff] }
 0x1aa   : > { %v1194_v11 = vmul.f32 %v1162_v54, %v938_v56 }
 0x1ab   : > { %v1243_v50 = vpack.c.bf16 %v1195_v31, %v1193_v49 }
 0x1ad   : > { %v2593_v55 = vpop.eup %2592  ;;  %1480 = vmatmul.bf16.gmra.mxu0 %v1243_v50  ;;  %1578 = vmatmul.bf16.gmra.mxu2 %v1243_v50 }
 0x1ae   : > { %v1164_v57 = vadd.f32 1.0, %v2593_v55  ;;  %v1208_v55 = vld [vmem:[#allocation2 + $0xb8] sm:$0xff] }
 0x1b0   : > { %v1196_v59 = vmul.f32 %v1164_v57, %v940_v38 }
 0x1b2   : > { %v1244_v40 = vpack.c.bf16 %v1196_v59, %v1194_v11  ;;  %v1209_v11 = vld [vmem:[#allocation2 + $0x60] sm:$0xff] }
 0x1b4   : > { %1529 = vmatmul.bf16.gmra.mxu1 %v1244_v40  ;;  %1627 = vmatmul.bf16.gmra.mxu3 %v1244_v40 }
 0x1ba   : > { %v1446_v37 = vpop.f32.mrf.mxu0 }
 0x1c0   : > { %v1544_v60 = vpop.f32.mrf.mxu2 }
 0x1c1   : > { %v1495_v63 = vpop.f32.mrf.mxu1 }
 0x1c2   : > { %v1496_v16 = vadd.f32 %v1495_v63, %v1446_v37  ;;  %v1448_v2 = vpop.f32.mrf.mxu0  ;;  %v1210_v63 = vld [vmem:[#allocation2 + $0xf0] sm:$0xff] }
 0x1c4   : > { %v1633_v46 = vadd.f32 %v1496_v16, %v1197_v61 }
 0x1c6   : > { %1665 = vst [vmem:[#allocation2 + $0xb0] sm:$0xff] %v1633_v46 }
 0x1c7   : > { %v1593_v5 = vpop.f32.mrf.mxu3 }
 0x1c8   : > { %v1594_v6 = vadd.f32 %v1593_v5, %v1544_v60  ;;  %v1546_v1 = vpop.f32.mrf.mxu2 }
 0x1c9   : > { %v1497_v41 = vpop.f32.mrf.mxu1 }
 0x1ca   : > { %v1634_v53 = vadd.f32 %v1594_v6, %v1198_v3  ;;  %v1498_v9 = vadd.f32 %v1497_v41, %v1448_v2  ;;  %v1451_v10 = vpop.f32.mrf.mxu0  ;;  %v1211_v3 = vld [vmem:[#allocation2 + $0x8] sm:$0xff] }
 0x1cc   : > { %1666 = vst [vmem:[#allocation2] sm:$0xff] %v1634_v53  ;;  %v1635_v29 = vadd.f32 %v1498_v9, %v1199_v62  ;;  %v1212_v53 = vld [vmem:[#allocation2 + $0x78] sm:$0xff] }
 0x1ce   : > { %1667 = vst [vmem:[#allocation2 + $0xd8] sm:$0xff] %v1635_v29 }
 0x1cf   : > { %v1595_v58 = vpop.f32.mrf.mxu3 }
 0x1d0   : > { %v1596_v14 = vadd.f32 %v1595_v58, %v1546_v1  ;;  %v1549_v15 = vpop.f32.mrf.mxu2 }
 0x1d1   : > { %v1500_v18 = vpop.f32.mrf.mxu1 }
 0x1d2   : > { %v1636_v0 = vadd.f32 %v1596_v14, %v1200_v12  ;;  %v1501_v21 = vadd.f32 %v1500_v18, %v1451_v10  ;;  %v1453_v22 = vpop.f32.mrf.mxu0  ;;  %v1213_v12 = vld [vmem:[#allocation2 + $0x38] sm:$0xff] }
 0x1d4   : > { %1668 = vst [vmem:[#allocation2 + $0x18] sm:$0xff] %v1636_v0  ;;  %v1637_v23 = vadd.f32 %v1501_v21, %v1201_v36  ;;  %v1214_v0 = vld [vmem:[#allocation2 + $0x58] sm:$0xff] }
 0x1d6   : > { %1669 = vst [vmem:[#allocation2 + $0x50] sm:$0xff] %v1637_v23 }
 0x1d7   : > { %v1598_v44 = vpop.f32.mrf.mxu3 }
 0x1d8   : > { %v1599_v17 = vadd.f32 %v1598_v44, %v1549_v15  ;;  %v1551_v26 = vpop.f32.mrf.mxu2 }
 0x1d9   : > { %v1502_v27 = vpop.f32.mrf.mxu1 }
 0x1da   : > { %v1638_v28 = vadd.f32 %v1599_v17, %v1202_v24  ;;  %v1503_v30 = vadd.f32 %v1502_v27, %v1453_v22  ;;  %v1456_v52 = vpop.f32.mrf.mxu0  ;;  %v1215_v24 = vld [vmem:[#allocation2 + $0x40] sm:$0xff] }
 0x1dc   : > { %1670 = vst [vmem:[#allocation2 + $0x68] sm:$0xff] %v1638_v28  ;;  %v1639_v4 = vadd.f32 %v1503_v30, %v1203_v8  ;;  %v1216_v28 = vld [vmem:[#allocation2 + $0xc8] sm:$0xff] }
 0x1de   : > { %1671 = vst [vmem:[#allocation2 + $0x30] sm:$0xff] %v1639_v4 }
 0x1df   : > { %v1600_v13 = vpop.f32.mrf.mxu3 }
 0x1e0   : > { %v1601_v34 = vadd.f32 %v1600_v13, %v1551_v26  ;;  %v1554_v35 = vpop.f32.mrf.mxu2 }
 0x1e1   : > { %v1505_v39 = vpop.f32.mrf.mxu1 }
 0x1e2   : > { %v1640_v20 = vadd.f32 %v1601_v34, %v1204_v32  ;;  %v1506_v42 = vadd.f32 %v1505_v39, %v1456_v52  ;;  %v1458_v43 = vpop.f32.mrf.mxu0  ;;  %v1217_v32 = vld [vmem:[#allocation2 + $0xe0] sm:$0xff] }
 0x1e4   : > { %1672 = vst [vmem:[#allocation2 + $0x48] sm:$0xff] %v1640_v20  ;;  %v1641_v51 = vadd.f32 %v1506_v42, %v1205_v19  ;;  %v1218_v20 = vld [vmem:[#allocation2 + $0x90] sm:$0xff] }
 0x1e6   : > { %1673 = vst [vmem:[#allocation2 + $0x80] sm:$0xff] %v1641_v51 }
 0x1e7   : > { %v1603_v25 = vpop.f32.mrf.mxu3 }
 0x1e8   : > { %v1604_v7 = vadd.f32 %v1603_v25, %v1554_v35  ;;  %v1556_v33 = vpop.f32.mrf.mxu2 }
 0x1e9   : > { %v1507_v48 = vpop.f32.mrf.mxu1 }
 0x1ea   : > { %v1642_v49 = vadd.f32 %v1604_v7, %v1206_v45  ;;  %v1508_v31 = vadd.f32 %v1507_v48, %v1458_v43  ;;  %v1461_v50 = vpop.f32.mrf.mxu0  ;;  %v1219_v45 = vld [vmem:[#allocation2 + $0x70] sm:$0xff] }
 0x1ec   : > { %1674 = vst [vmem:[#allocation2 + $0x88] sm:$0xff] %v1642_v49  ;;  %v1643_v54 = vadd.f32 %v1508_v31, %v1207_v47  ;;  %v1220_v49 = vld [vmem:[#allocation2 + $0xc0] sm:$0xff] }
 0x1ee   : > { %1675 = vst [vmem:[#allocation2 + $0xe8] sm:$0xff] %v1643_v54  ;;  %v1221_v54 = vld [vmem:[#allocation2 + $0xa8] sm:$0xff] }
 0x1ef   : > { %v1605_v56 = vpop.f32.mrf.mxu3 }
 0x1f0   : > { %v1606_v38 = vadd.f32 %v1605_v56, %v1556_v33  ;;  %v1559_v57 = vpop.f32.mrf.mxu2 }
 0x1f1   : > { %v1510_v59 = vpop.f32.mrf.mxu1 }
 0x1f2   : > { %v1644_v40 = vadd.f32 %v1606_v38, %v1208_v55  ;;  %v1511_v37 = vadd.f32 %v1510_v59, %v1461_v50  ;;  %v1463_v60 = vpop.f32.mrf.mxu0 }
 0x1f4   : > { %1676 = vst [vmem:[#allocation2 + $0xb8] sm:$0xff] %v1644_v40  ;;  %v1645_v61 = vadd.f32 %v1511_v37, %v1209_v11  ;;  %v1222_v40 = vld [vmem:[#allocation2 + $0xd0] sm:$0xff] }
 0x1f6   : > { %1677 = vst [vmem:[#allocation2 + $0x60] sm:$0xff] %v1645_v61  ;;  %v1223_v61 = vld [vmem:[#allocation2 + $0x10] sm:$0xff] }
 0x1f7   : > { %v1608_v16 = vpop.f32.mrf.mxu3 }
 0x1f8   : > { %v1609_v2 = vadd.f32 %v1608_v16, %v1559_v57  ;;  %v1561_v46 = vpop.f32.mrf.mxu2 }
 0x1f9   : > { %v1512_v5 = vpop.f32.mrf.mxu1 }
 0x1fa   : > { %v1646_v6 = vadd.f32 %v1609_v2, %v1210_v63  ;;  %v1513_v1 = vadd.f32 %v1512_v5, %v1463_v60  ;;  %v1466_v62 = vpop.f32.mrf.mxu0 }
 0x1fc   : > { %1678 = vst [vmem:[#allocation2 + $0xf0] sm:$0xff] %v1646_v6  ;;  %v1647_v41 = vadd.f32 %v1513_v1, %v1211_v3  ;;  %v1224_v6 = vld [vmem:[#allocation2 + $0x28] sm:$0xff] }
 0x1fe   : > { %1679 = vst [vmem:[#allocation2 + $0x8] sm:$0xff] %v1647_v41  ;;  %v1225_v41 = vld [vmem:[#allocation2 + $0xa0] sm:$0xff] }
 0x1ff   : > { %v1610_v9 = vpop.f32.mrf.mxu3 }
 0x200   : > { %v1611_v10 = vadd.f32 %v1610_v9, %v1561_v46  ;;  %v1564_v29 = vpop.f32.mrf.mxu2 }
 0x201   : > { %v1515_v58 = vpop.f32.mrf.mxu1 }
 0x202   : > { %v1648_v14 = vadd.f32 %v1611_v10, %v1212_v53  ;;  %v1516_v15 = vadd.f32 %v1515_v58, %v1466_v62  ;;  %v1468_v36 = vpop.f32.mrf.mxu0  ;;  %v1226_v58 = vld [vmem:[#allocation2 + $0xf8] sm:$0xff] }
 0x204   : > { %1680 = vst [vmem:[#allocation2 + $0x78] sm:$0xff] %v1648_v14  ;;  %v1649_v18 = vadd.f32 %v1516_v15, %v1213_v12 }
 0x206   : > { %1681 = vst [vmem:[#allocation2 + $0x38] sm:$0xff] %v1649_v18  ;;  %v1227_v18 = vld [vmem:[#allocation2 + $0x20] sm:$0xff] }
 0x207   : > { %v1613_v21 = vpop.f32.mrf.mxu3 }
 0x208   : > { %v1614_v22 = vadd.f32 %v1613_v21, %v1564_v29  ;;  %v1566_v23 = vpop.f32.mrf.mxu2 }
 0x209   : > { %v1517_v44 = vpop.f32.mrf.mxu1 }
 0x20a   : > { %v1650_v17 = vadd.f32 %v1614_v22, %v1214_v0  ;;  %v1518_v26 = vadd.f32 %v1517_v44, %v1468_v36  ;;  %v1471_v8 = vpop.f32.mrf.mxu0  ;;  %v1228_v44 = vld [vmem:[#allocation2 + $0x98] sm:$0xff] }
 0x20c   : > { %1682 = vst [vmem:[#allocation2 + $0x58] sm:$0xff] %v1650_v17  ;;  %v1651_v27 = vadd.f32 %v1518_v26, %v1215_v24 }
 0x20e   : > { %1683 = vst [vmem:[#allocation2 + $0x40] sm:$0xff] %v1651_v27 }
 0x20f   : > { %v1615_v30 = vpop.f32.mrf.mxu3 }
 0x210   : > { %v1616_v52 = vadd.f32 %v1615_v30, %v1566_v23  ;;  %v1569_v4 = vpop.f32.mrf.mxu2 }
 0x211   : > { %v1520_v13 = vpop.f32.mrf.mxu1 }
 0x212   : > { %v1652_v34 = vadd.f32 %v1616_v52, %v1216_v28  ;;  %v1521_v35 = vadd.f32 %v1520_v13, %v1471_v8  ;;  %v1473_v19 = vpop.f32.mrf.mxu0 }
 0x214   : > { %1684 = vst [vmem:[#allocation2 + $0xc8] sm:$0xff] %v1652_v34  ;;  %v1653_v39 = vadd.f32 %v1521_v35, %v1217_v32 }
 0x216   : > { %1685 = vst [vmem:[#allocation2 + $0xe0] sm:$0xff] %v1653_v39 }
 0x217   : > { %v1618_v42 = vpop.f32.mrf.mxu3 }
 0x218   : > { %v1619_v43 = vadd.f32 %v1618_v42, %v1569_v4  ;;  %v1571_v51 = vpop.f32.mrf.mxu2 }
 0x219   : > { %v1522_v25 = vpop.f32.mrf.mxu1 }
 0x21a   : > { %v1654_v7 = vadd.f32 %v1619_v43, %v1218_v20  ;;  %v1523_v33 = vadd.f32 %v1522_v25, %v1473_v19  ;;  %v1476_v47 = vpop.f32.mrf.mxu0 }
 0x21c   : > { %1686 = vst [vmem:[#allocation2 + $0x90] sm:$0xff] %v1654_v7  ;;  %v1655_v48 = vadd.f32 %v1523_v33, %v1219_v45 }
 0x21e   : > { %1687 = vst [vmem:[#allocation2 + $0x70] sm:$0xff] %v1655_v48 }
 0x21f   : > { %v1620_v31 = vpop.f32.mrf.mxu3 }
 0x220   : > { %v1621_v50 = vadd.f32 %v1620_v31, %v1571_v51  ;;  %v1574_v56 = vpop.f32.mrf.mxu2 }
 0x221   : > { %v1525_v55 = vpop.f32.mrf.mxu1 }
 0x222   : > { %v1656_v38 = vadd.f32 %v1621_v50, %v1220_v49  ;;  %v1526_v57 = vadd.f32 %v1525_v55, %v1476_v47  ;;  %v1478_v59 = vpop.f32.mrf.mxu0 }
 0x224   : > { %1688 = vst [vmem:[#allocation2 + $0xc0] sm:$0xff] %v1656_v38  ;;  %v1657_v11 = vadd.f32 %v1526_v57, %v1221_v54 }
 0x226   : > { %1689 = vst [vmem:[#allocation2 + $0xa8] sm:$0xff] %v1657_v11 }
 0x227   : > { %v1623_v37 = vpop.f32.mrf.mxu3 }
 0x228   : > { %v1624_v60 = vadd.f32 %v1623_v37, %v1574_v56  ;;  %v1576_v46 = vpop.f32.mrf.mxu2 }
 0x229   : > { %v1527_v63 = vpop.f32.mrf.mxu1 }
 0x22a   : > { %v1658_v16 = vadd.f32 %v1624_v60, %v1222_v40  ;;  %v1528_v2 = vadd.f32 %v1527_v63, %v1478_v59  ;;  %v1481_v5 = vpop.f32.mrf.mxu0 }
 0x22c   : > { %1690 = vst [vmem:[#allocation2 + $0xd0] sm:$0xff] %v1658_v16  ;;  %v1659_v3 = vadd.f32 %v1528_v2, %v1223_v61 }
 0x22e   : > { %1691 = vst [vmem:[#allocation2 + $0x10] sm:$0xff] %v1659_v3 }
 0x22f   : > { %v1625_v1 = vpop.f32.mrf.mxu3 }
 0x230   : > { %v1626_v62 = vadd.f32 %v1625_v1, %v1576_v46  ;;  %v1579_v12 = vpop.f32.mrf.mxu2 }
 0x231   : > { %v1530_v53 = vpop.f32.mrf.mxu1 }
 0x232   : > { %v1660_v9 = vadd.f32 %v1626_v62, %v1224_v6  ;;  %v1531_v10 = vadd.f32 %v1530_v53, %v1481_v5  ;;  %v1483_v36 = vpop.f32.mrf.mxu0 }
 0x234   : > { %1692 = vst [vmem:[#allocation2 + $0x28] sm:$0xff] %v1660_v9  ;;  %v1661_v29 = vadd.f32 %v1531_v10, %v1225_v41 }
 0x236   : > { %1693 = vst [vmem:[#allocation2 + $0xa0] sm:$0xff] %v1661_v29 }
 0x237   : > { %v1628_v14 = vpop.f32.mrf.mxu3 }
 0x238   : > { %v1629_v15 = vadd.f32 %v1628_v14, %v1579_v12  ;;  %v1581_v24 = vpop.f32.mrf.mxu2 }
 0x239   : > { %v1532_v0 = vpop.f32.mrf.mxu1 }
 0x23a   : > { %v1662_v21 = vadd.f32 %v1629_v15, %v1226_v58  ;;  %v1533_v22 = vadd.f32 %v1532_v0, %v1483_v36 }
 0x23c   : > { %1694 = vst [vmem:[#allocation2 + $0xf8] sm:$0xff] %v1662_v21  ;;  %v1663_v23 = vadd.f32 %v1533_v22, %v1227_v18 }
 0x23e   : > { %1695 = vst [vmem:[#allocation2 + $0x20] sm:$0xff] %v1663_v23 }
 0x23f   : > { %v1630_v17 = vpop.f32.mrf.mxu3 }
 0x240   : > { %v1631_v26 = vadd.f32 %v1630_v17, %v1581_v24  ;;  %1700 = sbr.rel (%p2314_p7) target bundleno = 605 (0x25d), region = 64 }
 0x242   : > { %v1664_v8 = vadd.f32 %v1631_v26, %v1228_v44 }
 0x244   : > { %1696 = vst [vmem:[#allocation2 + $0x98] sm:$0xff] %v1664_v8 }
 0x245   : > { %v1701_v27 = vld [vmem:[#allocation2 + $0xb0] sm:$0xff]  ;;  %v1702_v28 = vld [vmem:[#allocation2] sm:$0xff]  ;;  %v1703_v32 = vld [vmem:[#allocation2 + $0xd8] sm:$0xff] }
 0x246   : > { %v1733_v30 = vld [vmem:[%s3668_s20] sm:$0x3]  ;;  %v1704_v13 = vld [vmem:[#allocation2 + $0x18] sm:$0xff]  ;;  %v1705_v34 = vld [vmem:[#allocation2 + $0x50] sm:$0xff] }
 0x247   : > { %v3506_v52 = vperm.slane %v1733_v30, 0  ;;  %v3508_v4 = vperm.slane %v1733_v30, 1  ;;  %v1706_v35 = vld [vmem:[#allocation2 + $0x68] sm:$0xff]  ;;  %v1707_v19 = vld [vmem:[#allocation2 + $0x30] sm:$0xff]  ;;  %v1709_v45 = vld [vmem:[#allocation2 + $0x80] sm:$0xff] }
 0x248   : > { %v1708_v39 = vld [vmem:[#allocation2 + $0x48] sm:$0xff]  ;;  %v1712_v31 = vld [vmem:[#allocation2 + $0xb8] sm:$0xff]  ;;  %v1713_v50 = vld [vmem:[#allocation2 + $0x60] sm:$0xff] }
 0x249   : > { %v1739_v20 = vadd.f32 %v3506_v52, %v1701_v27  ;;  %v1740_v42 = vadd.f32 %v3508_v4, %v1702_v28  ;;  %v1741_v43 = vadd.f32 %v3506_v52, %v1703_v32  ;;  %v1742_v51 = vadd.f32 %v3508_v4, %v1704_v13  ;;  %v1710_v25 = vld [vmem:[#allocation2 + $0x88] sm:$0xff]  ;;  %v1714_v54 = vld [vmem:[#allocation2 + $0xf0] sm:$0xff]  ;;  %v1716_v59 = vld [vmem:[#allocation2 + $0x78] sm:$0xff] }
 0x24a   : > { %v1711_v7 = vld [vmem:[#allocation2 + $0xe8] sm:$0xff]  ;;  %v1743_v33 = vadd.f32 %v3506_v52, %v1705_v34  ;;  %v1744_v47 = vadd.f32 %v3508_v4, %v1706_v35  ;;  %v1745_v48 = vadd.f32 %v3506_v52, %v1707_v19  ;;  %v1746_v49 = vadd.f32 %v3508_v4, %v1708_v39  ;;  %v1717_v40 = vld [vmem:[#allocation2 + $0x38] sm:$0xff]  ;;  %v1719_v2 = vld [vmem:[#allocation2 + $0x40] sm:$0xff] }
 0x24b   : > { %v1771_v55 = vpack.c.bf16 %v1740_v42, %v1739_v20  ;;  %v1772_v56 = vpack.c.bf16 %v1742_v51, %v1741_v43  ;;  %v1747_v38 = vadd.f32 %v3506_v52, %v1709_v45  ;;  %v1748_v57 = vadd.f32 %v3508_v4, %v1710_v25  ;;  %v1715_v11 = vld [vmem:[#allocation2 + $0x8] sm:$0xff]  ;;  %v1718_v16 = vld [vmem:[#allocation2 + $0x58] sm:$0xff]  ;;  %v1721_v62 = vld [vmem:[#allocation2 + $0xe0] sm:$0xff] }
 0x24c   : > { %v1773_v37 = vpack.c.bf16 %v1744_v47, %v1743_v33  ;;  %v1774_v60 = vpack.c.bf16 %v1746_v49, %v1745_v48  ;;  %v1749_v61 = vadd.f32 %v3506_v52, %v1711_v7  ;;  %v1750_v63 = vadd.f32 %v3508_v4, %v1712_v31  ;;  %v1720_v46 = vld [vmem:[#allocation2 + $0xc8] sm:$0xff]  ;;  %v1722_v41 = vld [vmem:[#allocation2 + $0x90] sm:$0xff]  ;;  %v1724_v58 = vld [vmem:[#allocation2 + $0xc0] sm:$0xff] }
 0x24d   : > { %1787 = vst [vmem:[%s3113_s12] sm:$0xff] %v1771_v55  ;;  %v1775_v3 = vpack.c.bf16 %v1748_v57, %v1747_v38  ;;  %v1751_v5 = vadd.f32 %v3506_v52, %v1713_v50  ;;  %v1752_v6 = vadd.f32 %v3508_v4, %v1714_v54  ;;  %v1753_v1 = vadd.f32 %v3506_v52, %v1715_v11  ;;  %v1723_v53 = vld [vmem:[#allocation2 + $0x70] sm:$0xff]  ;;  %v1725_v14 = vld [vmem:[#allocation2 + $0xa8] sm:$0xff]  ;;  %v1729_v26 = vld [vmem:[#allocation2 + $0xa0] sm:$0xff] }
 0x24e   : > { %1788 = vst [vmem:[%s3113_s12 + $0x8] sm:$0xff] %v1772_v56  ;;  %v1776_v9 = vpack.c.bf16 %v1750_v63, %v1749_v61  ;;  %v1754_v10 = vadd.f32 %v3508_v4, %v1716_v59  ;;  %v1755_v29 = vadd.f32 %v3506_v52, %v1717_v40  ;;  %v1756_v12 = vadd.f32 %v3508_v4, %v1718_v16  ;;  %v1726_v15 = vld [vmem:[#allocation2 + $0xd0] sm:$0xff]  ;;  %v1728_v23 = vld [vmem:[#allocation2 + $0x28] sm:$0xff]  ;;  %v1730_v8 = vld [vmem:[#allocation2 + $0xf8] sm:$0xff] }
 0x24f   : > { %1789 = vst [vmem:[%s3113_s12 + $0x10] sm:$0xff] %v1773_v37  ;;  %v1777_v36 = vpack.c.bf16 %v1752_v6, %v1751_v5  ;;  %v1757_v18 = vadd.f32 %v3506_v52, %v1719_v2  ;;  %v1758_v0 = vadd.f32 %v3508_v4, %v1720_v46  ;;  %v1759_v21 = vadd.f32 %v3506_v52, %v1721_v62  ;;  %v1727_v22 = vld [vmem:[#allocation2 + $0x10] sm:$0xff]  ;;  %v1731_v13 = vld [vmem:[#allocation2 + $0x20] sm:$0xff]  ;;  %v1732_v34 = vld [vmem:[#allocation2 + $0x98] sm:$0xff] }
 0x250   : > { %1790 = vst [vmem:[%s3113_s12 + $0x18] sm:$0xff] %v1774_v60  ;;  %v1778_v24 = vpack.c.bf16 %v1754_v10, %v1753_v1  ;;  %v1760_v44 = vadd.f32 %v3508_v4, %v1722_v41  ;;  %v1761_v17 = vadd.f32 %v3506_v52, %v1723_v53  ;;  %v1779_v27 = vpack.c.bf16 %v1756_v12, %v1755_v29 }
 0x251   : > { %1791 = vst [vmem:[%s3113_s12 + $0x20] sm:$0xff] %v1775_v3  ;;  %v1762_v28 = vadd.f32 %v3508_v4, %v1724_v58  ;;  %v1763_v30 = vadd.f32 %v3506_v52, %v1725_v14  ;;  %v1764_v32 = vadd.f32 %v3508_v4, %v1726_v15  ;;  %v1780_v35 = vpack.c.bf16 %v1758_v0, %v1757_v18 }
 0x252   : > { %1792 = vst [vmem:[%s3113_s12 + $0x28] sm:$0xff] %v1776_v9  ;;  %v1765_v19 = vadd.f32 %v3506_v52, %v1727_v22  ;;  %v1766_v39 = vadd.f32 %v3508_v4, %v1728_v23  ;;  %v1781_v20 = vpack.c.bf16 %v1760_v44, %v1759_v21  ;;  %v1767_v42 = vadd.f32 %v3506_v52, %v1729_v26 }
 0x253   : > { %1793 = vst [vmem:[%s3113_s12 + $0x30] sm:$0xff] %v1777_v36  ;;  %v1768_v43 = vadd.f32 %v3508_v4, %v1730_v8  ;;  %v1782_v51 = vpack.c.bf16 %v1762_v28, %v1761_v17  ;;  %v1769_v45 = vadd.f32 %v3506_v52, %v1731_v13  ;;  %v1770_v25 = vadd.f32 %v3508_v4, %v1732_v34 }
 0x254   : > { %1794 = vst [vmem:[%s3113_s12 + $0x38] sm:$0xff] %v1778_v24  ;;  %v1783_v7 = vpack.c.bf16 %v1764_v32, %v1763_v30  ;;  %v1784_v33 = vpack.c.bf16 %v1766_v39, %v1765_v19 }
 0x255   : > { %1795 = vst [vmem:[%s3113_s12 + $0x40] sm:$0xff] %v1779_v27  ;;  %v1785_v47 = vpack.c.bf16 %v1768_v43, %v1767_v42  ;;  %v1786_v48 = vpack.c.bf16 %v1770_v25, %v1769_v45 }
 0x256   : > { %1796 = vst [vmem:[%s3113_s12 + $0x48] sm:$0xff] %v1780_v35 }
 0x257   : > { %1797 = vst [vmem:[%s3113_s12 + $0x50] sm:$0xff] %v1781_v20 }
 0x258   : > { %1798 = vst [vmem:[%s3113_s12 + $0x58] sm:$0xff] %v1782_v51 }
 0x259   : > { %1799 = vst [vmem:[%s3113_s12 + $0x60] sm:$0xff] %v1783_v7 }
 0x25a   : > { %1800 = vst [vmem:[%s3113_s12 + $0x68] sm:$0xff] %v1784_v33 }
 0x25b   : > { %1801 = vst [vmem:[%s3113_s12 + $0x70] sm:$0xff] %v1785_v47 }
 0x25c   : > { %1802 = vst [vmem:[%s3113_s12 + $0x78] sm:$0xff] %v1786_v48 }
 0x25d PF: > { %s3669_s24 = sld [smem:[#allocation19_spill]]  ;;  %s1817_s27 = sshll.u32 %s3113_s12, 4  ;;  %s1818_s27 = int_to_ptr.vmem [resolvable:$true] %s1817_s27 }
 0x25e   : > { %s3671_s17 = sld [smem:[#allocation32_spill]]  ;;  %s1804_s29 = scalar_lea.sflag [#allocation5], %s3087_s0 }
 0x263   : > { %s2407_s16 = sshll.u32 %s3669_s24, 7 }
 0x264   : > { %s1816_s23 = scalar_lea.hbm %s3671_s17, %s2407_s16  ;;  %s2734_s28 = scalar_lea.hbm %s3671_s17, 256 }
 0x265   : > { %s1819_s10 = sshll.u32 %s1816_s23, 4  ;;  %s1820_s10 = int_to_ptr.hbm [resolvable:$true] %s1819_s10 }
 0x266   : > { %s2728_s4 = sshra.s32 %s1820_s10, 4  ;;  %s2729_s4 = int_to_ptr.hbm [resolvable:$true] %s2728_s4 }
 0x267   : > { %s2730_s21 = scalar_lea.hbm %s2729_s4, 128  ;;  %p2735_p4 = scmp.lt.s32.totalorder %s2729_s4, %s3671_s17 }
 0x268   : > { %p2731_p10 = scmp.ne.s32.totalorder %s2729_s4, %s2730_s21  ;;  %p2736_p6 = scmp.lt.s32.totalorder %s2734_s28, %s2730_s21 }
 0x26a   : > { %p2732_p13 = pnand %p2731_p10, %p3037_p12  ;;  %p2737_p1 = por %p2736_p6, %p2735_p4 }
 0x26c   : > { %p2733_p2 = pneg %p2732_p13 }
 0x26e   : > { %p2738_p0 = pnand %p2737_p1, %p2733_p2 }
 0x270   : > { %2741 = shalt.err (!%p2738_p0)
}
 0x271   : > { %s2849_s0 = smov 128   ;;  %s2850_s7 = smov 8  }
 0x272   : > { %2416 = dma.vmem_to_hbm [thread:$0]  (%p3037_p12), %s1818_s27, 2048, %s1820_s10, %s1804_s29, %s2849_s0, %s2849_s0, %s2850_s7  }
 0x273 PF: > { %s3672_s6 = sld [smem:[#allocation21_spill]] }
 0x274   : > { %s3673_s18 = sld [smem:[#allocation17_spill]] }
 0x279   : > { %p2436_p8 = scmp.ge.s32.totalorder %s3672_s6, 2 }
 0x27a   : > { %s1834_s1 = sand.u32 1, %s3673_s18  }
 0x27b   : > { %p2432_p9 = pnand %p2436_p8, %p3048_p3  ;;  %s1835_s12 = scalar_lea.sflag [#allocation5], %s1834_s1 }
 0x27d   : > { %p2433_p11 = pneg %p2432_p9 }
 0x27f   : > { %2799 = dma.done.wait (%p2433_p11), %s1835_s12, 2048  }
 0x280   : > { %2801 = vsyncadd (%p2433_p11), %s1835_s12, 4294965248  ;;  %s27_s28 = sadd.s32 1, %s3672_s6   ;;  %s3675_s8 = sld [smem:[#allocation16_spill]] }
 0x281   : > { %p24_p5 = scmp.ge.s32.totalorder %s27_s28, 10   ;;  %s3676_s20 = sld [smem:[#allocation23_spill]] }
 0x282   : > { %s3677_s5 = sld [smem:[#allocation18_spill]]  ;;  %s3682_s18 = smov %s2808_s19 }
 0x283   : > { %s3678_s23 = sld [smem:[#allocation26_spill]]  ;;  %s3684_s21 = smov %s2820_s22 }
 0x284   : > { %s3679_s25 = sld [smem:[#allocation20_spill]]  ;;  %s3686_s24 = smov %s2836_s26 }
 0x285   : > { %s3680_s16 = sld [smem:[#allocation22_spill]] }
 0x286   : > { %s3681_s27 = sld [smem:[#allocation24_spill]]  ;;  %s3683_s19 = smov %s3675_s8 }
 0x287   :  { %26 = sbr.rel (!%p24_p5) target bundleno = 19 (0x13), region = 130 }
 0x288   : > { %s3685_s22 = smov %s3677_s5 }
 0x28b   : > { %s3687_s26 = smov %s3680_s16 }
 0x28c   :  { %1841 = vsyncpa [#allocation4], 1 }
 0x28d   :  { %1843 = vsyncpa [#allocation4 + $0x1], 1 }
 0x28e   :  { %1844 = vsyncpa [#allocation7], 1 }
 0x28f   :  { %1846 = vsyncpa [#allocation7 + $0x1], 1 }
 0x290   :  { %1847 = vsyncpa [#allocation10], 1 }
 0x291   :  { %1849 = vsyncpa [#allocation10 + $0x1], 1 }
 0x292   :  { %1850 = vsyncpa [#allocation5], 1 }
 0x293   :  { %1852 = vsyncpa [#allocation5 + $0x1], 1 }

</bundles_post_ra>
